<compile_context>
chip_gen: v6e
topology: v6e:2x2x1
jax: 0.10.0
libtpu: 0.0.40
codegen_flags: <defaults>
</compile_context>

<pallas_src>
import functools

import jax
import jax.numpy as jnp
from jax.experimental import pallas as pl
from jax.experimental.pallas import tpu as pltpu

LEAKY_SLOPE = 0.01  # nn.LeakyReLU default

# Layer/activation schedule for the fused chain (27 linears).
_MLP = ("leaky", "leaky", "none")  # MLP: Lin, LeakyReLU, Lin, LeakyReLU, Lin
ACTS = (_MLP                              #  0.. 2  mlp_delta1 (block-diag, 26 tok)
        + _MLP                            #  3.. 5  mlp_delta2
        + _MLP                            #  6.. 8  mlp11      (block-diag, 11 tok)
        + _MLP                            #  9..11  mlp12      (block-diag, 11 tok)
        + _MLP                            # 12..14  input_proj (cond added after 14)
        + ("leaky", "leaky", "leaky")     # 15..17  AE encoder
        + ("leaky", "leaky", "sigmoid")   # 18..20  AE decoder
        + _MLP                            # 21..23  mlp21
        + _MLP)                           # 24..26  mlp22      (block-diag, 11 tok)
N_LAYERS = len(ACTS)   # 27
_P_START = 6           # layers [0, 6) form the delta branch (produce cond)
_COND_AFTER = 14       # delta_feat added right after input_proj's last linear


# ---------------------------------------------------------------------------
# The single fused Pallas kernel: everything in VMEM, one chain of matmuls.
# refs = (x_ref, x2_ref, p_ref, bias_ref, w_0..w_26, out_ref)
# ---------------------------------------------------------------------------
def _fused_kernel(acts, out_dims, x_ref, x2_ref, p_ref, bias_ref, *rest):
    n = len(acts)
    w_refs = rest[:n]
    out_ref = rest[n]

    def layer(h, l):
        w = w_refs[l][...]                                  # bf16 (in, out)
        b = bias_ref[l:l + 1, :out_dims[l]]                 # f32  (1, out), static slice
        h = jnp.dot(h.astype(w.dtype), w,
                    preferred_element_type=jnp.float32) + b
        a = acts[l]
        if a == "leaky":
            h = jnp.where(h >= 0, h, LEAKY_SLOPE * h)
        elif a == "sigmoid":
            # stable sigmoid: exp on EUP, approx reciprocal (no inf intermediates)
            e = jnp.exp(-jnp.abs(h))
            s = pl.reciprocal(1.0 + e, approx=True)         # 1/(1+exp(-|h|))
            h = jnp.where(h >= 0, s, 1.0 - s)
        # 'none' -> identity
        return h

    # ---- delta branch: mlp_delta1(x - x2) (block-diag) -> mlp_delta2 ----
    h = x_ref[...] - x2_ref[...]                            # (bs, 52)
    for l in range(0, _P_START):
        h = layer(h, l)
    cond = h                                                # (bs, 176)

    # ---- keypoint branch: mlp11+12 -> input_proj(+cond) -> AE -> mlp21 -> mlp22
    h = p_ref[...]                                          # (bs, 22)
    for l in range(_P_START, n):
        h = layer(h, l)
        if l == _COND_AFTER:                                # _forward_with_cond
            h = h + cond
    out_ref[...] = h.astype(out_ref.dtype)                  # (bs, 11)


# ---------------------------------------------------------------------------
# Deterministic parameter construction (matches the nn.Module layer shapes).
# Weights stored as (in, out); forward computes x @ W + b (== torch Linear).
# ---------------------------------------------------------------------------
def _init_linear(key, in_dim, out_dim):
    kw, kb = jax.random.split(key)
    bound = 1.0 / (in_dim ** 0.5)
    w = jax.random.uniform(kw, (in_dim, out_dim), jnp.float32, -bound, bound)
    b = jax.random.uniform(kb, (out_dim,), jnp.float32, -bound, bound)
    return w, b


def _init_mlp(key, dims):
    keys = jax.random.split(key, len(dims) - 1)
    return [_init_linear(k, dims[i], dims[i + 1]) for i, k in enumerate(keys)]


def init_params(key, in_channels=2, ae_channels=11 * 16):
    ks = jax.random.split(key, 9)
    return {
        "mlp11":      _init_mlp(ks[0], [in_channels, 4, 4, 2]),
        "mlp12":      _init_mlp(ks[1], [2, 4, 4, 16]),
        "mlp_delta1": _init_mlp(ks[2], [2, 4, 4, 16]),
        "mlp_delta2": _init_mlp(ks[3], [26 * 16, 15 * 16, 15 * 16, 11 * 16]),
        "input_proj": _init_mlp(ks[4], [11 * 16, 11 * 16, 11 * 16, 11 * 16]),
        "ae_enc":     _init_mlp(ks[5], [ae_channels, 256, 64, 20]),
        "ae_dec":     _init_mlp(ks[6], [20, 64, 256, ae_channels]),
        "mlp21":      _init_mlp(ks[7], [ae_channels, ae_channels * 2,
                                        ae_channels * 2, 11 * 16]),
        "mlp22":      _init_mlp(ks[8], [16, 8, 8, 1]),
    }


# ---------------------------------------------------------------------------
# Parameter prep (done once, outside the hot path):
#   * block-diagonalize the per-token MLPs (token axis -> lane axis)
#   * cast weights to bf16
#   * pack all biases (f32) into a single (27, max_out) array
# ---------------------------------------------------------------------------
def prepare(params):
    def bd(layers, n_tok):
        return [(jnp.kron(jnp.eye(n_tok, dtype=jnp.float32), w),
                 jnp.tile(b, n_tok)) for (w, b) in layers]

    layers = []
    layers += bd(params["mlp_delta1"], 26)   #  0.. 2: (52,104)(104,104)(104,416)
    layers += list(params["mlp_delta2"])     #  3.. 5
    layers += bd(params["mlp11"], 11)        #  6.. 8: (22,44)(44,44)(44,22)
    layers += bd(params["mlp12"], 11)        #  9..11: (22,44)(44,44)(44,176)
    layers += list(params["input_proj"])     # 12..14
    layers += list(params["ae_enc"])         # 15..17
    layers += list(params["ae_dec"])         # 18..20
    layers += list(params["mlp21"])          # 21..23
    layers += bd(params["mlp22"], 11)        # 24..26: (176,88)(88,88)(88,11)
    assert len(layers) == N_LAYERS

    weights = [w.astype(jnp.bfloat16) for (w, _) in layers]
    max_out = max(w.shape[1] for w in weights)
    bias_pack = jnp.zeros((N_LAYERS, max_out), jnp.float32)
    for i, (_, b) in enumerate(layers):
        bias_pack = bias_pack.at[i, :b.shape[0]].set(b.astype(jnp.float32))
    return weights, bias_pack


# ---------------------------------------------------------------------------
# Forward pass: one pallas_call for the entire network.
#   x, x2 : (bs, 26, 2)     p : (bs, 11, 2)     -> output (bs, 11, 1)
# ---------------------------------------------------------------------------
def forward(weights, bias_pack, x, x2, p):
    bs = x.shape[0]
    x_flat = x.reshape(bs, -1).astype(jnp.float32)    # (bs, 52)
    x2_flat = x2.reshape(bs, -1).astype(jnp.float32)  # (bs, 52)
    p_flat = p.reshape(bs, -1).astype(jnp.float32)    # (bs, 22)

    out_dims = tuple(int(w.shape[1]) for w in weights)
    kernel = functools.partial(_fused_kernel, ACTS, out_dims)

    flops = 2 * bs * sum(int(w.shape[0]) * int(w.shape[1]) for w in weights)
    bytes_accessed = (sum(w.size * w.dtype.itemsize for w in weights)
                      + bias_pack.size * bias_pack.dtype.itemsize
                      + 4 * (x_flat.size + x2_flat.size + p_flat.size + bs * 11))

    vmem = pl.BlockSpec(memory_space=pltpu.MemorySpace.VMEM)
    out = pl.pallas_call(
        kernel,
        out_shape=jax.ShapeDtypeStruct((bs, 11), jnp.float32),
        in_specs=[vmem] * (4 + len(weights)),
        out_specs=vmem,
        cost_estimate=pl.CostEstimate(
            flops=int(flops),
            transcendentals=int(bs * 176),     # sigmoid exps (AE decoder output)
            bytes_accessed=int(bytes_accessed)),
    )(x_flat, x2_flat, p_flat, bias_pack, *weights)
    # NOTE: for large batch, add a 1-D row grid with
    # dimension_semantics=("parallel",) and constant-index weight BlockSpecs so
    # both v7x TensorCores are used; at bs=2 the gridless form is fastest.
    return out.reshape(bs, 11, 1)


# ---------------------------------------------------------------------------
# Pure-JAX reference (per-token form, same bf16 weight precision) for checking.
# ---------------------------------------------------------------------------
def reference_forward(params, x, x2, p):
    def mlp(h, layers, acts):
        for (w, b), a in zip(layers, acts):
            h = jnp.dot(h.astype(jnp.bfloat16), w.astype(jnp.bfloat16),
                        preferred_element_type=jnp.float32) + b
            if a == "leaky":
                h = jnp.where(h >= 0, h, LEAKY_SLOPE * h)
            elif a == "sigmoid":
                h = jax.nn.sigmoid(h)
        return h

    bs = x.shape[0]
    d = mlp(x - x2, params["mlp_delta1"], _MLP)               # (bs, 26, 16)
    d = mlp(d.reshape(bs, -1), params["mlp_delta2"], _MLP)    # (bs, 176)
    a = mlp(p, params["mlp11"], _MLP)
    a = mlp(a, params["mlp12"], _MLP)                         # (bs, 11, 16)
    a = mlp(a.reshape(bs, -1), params["input_proj"], _MLP) + d
    a = mlp(a, params["ae_enc"], ("leaky", "leaky", "leaky"))
    a = mlp(a, params["ae_dec"], ("leaky", "leaky", "sigmoid"))
    a = mlp(a, params["mlp21"], _MLP)                         # (bs, 176)
    y = a.reshape(bs, 11, 16)
    return mlp(y, params["mlp22"], _MLP)                      # (bs, 11, 1)


if __name__ == "__main__":
    key = jax.random.PRNGKey(0)
    k_par, kx, kx2, kp = jax.random.split(key, 4)

    params = init_params(k_par)
    weights, bias_pack = prepare(params)

    bs = 2
    x = jax.random.normal(kx, (bs, 26, 2), jnp.float32)
    x2 = jax.random.normal(kx2, (bs, 26, 2), jnp.float32)
    p = jax.random.normal(kp, (bs, 11, 2), jnp.float32)

    out = jax.jit(forward)(weights, bias_pack, x, x2, p)
    out = jax.block_until_ready(out)

    assert out.shape == (bs, 11, 1), out.shape
    assert bool(jnp.all(jnp.isfinite(out)))

    ref = reference_forward(params, x, x2, p)
    max_err = float(jnp.max(jnp.abs(out - ref)))
    assert max_err < 5e-2, f"kernel vs reference max |diff| = {max_err}"
    print("KERNEL_OK")
</pallas_src>

<mosaic_0001>
module attributes {stable_mosaic.version = 11 : i64} {
  func.func @_fused_kernel(%arg0: memref<2x52xf32, #tpu.memory_space<vmem>>, %arg1: memref<2x52xf32, #tpu.memory_space<vmem>>, %arg2: memref<2x22xf32, #tpu.memory_space<vmem>>, %arg3: memref<27x416xf32, #tpu.memory_space<vmem>>, %arg4: memref<52x104xbf16, #tpu.memory_space<vmem>>, %arg5: memref<104x104xbf16, #tpu.memory_space<vmem>>, %arg6: memref<104x416xbf16, #tpu.memory_space<vmem>>, %arg7: memref<416x240xbf16, #tpu.memory_space<vmem>>, %arg8: memref<240x240xbf16, #tpu.memory_space<vmem>>, %arg9: memref<240x176xbf16, #tpu.memory_space<vmem>>, %arg10: memref<22x44xbf16, #tpu.memory_space<vmem>>, %arg11: memref<44x44xbf16, #tpu.memory_space<vmem>>, %arg12: memref<44x22xbf16, #tpu.memory_space<vmem>>, %arg13: memref<22x44xbf16, #tpu.memory_space<vmem>>, %arg14: memref<44x44xbf16, #tpu.memory_space<vmem>>, %arg15: memref<44x176xbf16, #tpu.memory_space<vmem>>, %arg16: memref<176x176xbf16, #tpu.memory_space<vmem>>, %arg17: memref<176x176xbf16, #tpu.memory_space<vmem>>, %arg18: memref<176x176xbf16, #tpu.memory_space<vmem>>, %arg19: memref<176x256xbf16, #tpu.memory_space<vmem>>, %arg20: memref<256x64xbf16, #tpu.memory_space<vmem>>, %arg21: memref<64x20xbf16, #tpu.memory_space<vmem>>, %arg22: memref<20x64xbf16, #tpu.memory_space<vmem>>, %arg23: memref<64x256xbf16, #tpu.memory_space<vmem>>, %arg24: memref<256x176xbf16, #tpu.memory_space<vmem>>, %arg25: memref<176x352xbf16, #tpu.memory_space<vmem>>, %arg26: memref<352x352xbf16, #tpu.memory_space<vmem>>, %arg27: memref<352x176xbf16, #tpu.memory_space<vmem>>, %arg28: memref<176x88xbf16, #tpu.memory_space<vmem>>, %arg29: memref<88x88xbf16, #tpu.memory_space<vmem>>, %arg30: memref<88x11xbf16, #tpu.memory_space<vmem>>, %arg31: memref<2x11xf32, #tpu.memory_space<vmem>>) attributes {dimension_semantics = [], scalar_prefetch = 0 : i64, scratch_operands = 0 : i64, tpu.core_type = #tpu.core_type<tc>} {
    %c0 = arith.constant 0 : index
    %c0_0 = arith.constant 0 : index
    %0 = vector.load %arg0[%c0, %c0_0] : memref<2x52xf32, #tpu.memory_space<vmem>>, vector<2x52xf32>
    %c0_1 = arith.constant 0 : index
    %c0_2 = arith.constant 0 : index
    %1 = vector.load %arg1[%c0_1, %c0_2] : memref<2x52xf32, #tpu.memory_space<vmem>>, vector<2x52xf32>
    %2 = arith.subf %0, %1 : vector<2x52xf32>
    %c0_3 = arith.constant 0 : index
    %c0_4 = arith.constant 0 : index
    %3 = vector.load %arg4[%c0_3, %c0_4] : memref<52x104xbf16, #tpu.memory_space<vmem>>, vector<52x104xbf16>
    %c0_5 = arith.constant 0 : index
    %c0_6 = arith.constant 0 : index
    %4 = vector.load %arg3[%c0_5, %c0_6] : memref<27x416xf32, #tpu.memory_space<vmem>>, vector<1x104xf32>
    %5 = arith.truncf %2 : vector<2x52xf32> to vector<2x52xbf16>
    %cst = arith.constant dense<0.000000e+00> : vector<2x104xf32>
    %6 = tpu.matmul %5, %3, %cst {dimension_numbers = #tpu.dot_dimension_numbers<[1], [0], [0], [1], [0, 0, 1, 1], [], []>} : vector<2x52xbf16>, vector<52x104xbf16>, vector<2x104xf32> -> vector<2x104xf32>
    %7 = vector.broadcast %4 : vector<1x104xf32> to vector<2x104xf32>
    %8 = arith.addf %6, %7 : vector<2x104xf32>
    %cst_7 = arith.constant 0.000000e+00 : f32
    %9 = vector.broadcast %cst_7 : f32 to vector<2x104xf32>
    %10 = arith.cmpf oge, %8, %9 : vector<2x104xf32>
    %cst_8 = arith.constant 0.00999999977 : f32
    %11 = vector.broadcast %cst_8 : f32 to vector<2x104xf32>
    %12 = arith.mulf %11, %8 : vector<2x104xf32>
    %13 = arith.select %10, %8, %12 : vector<2x104xi1>, vector<2x104xf32>
    %c0_9 = arith.constant 0 : index
    %c0_10 = arith.constant 0 : index
    %14 = vector.load %arg5[%c0_9, %c0_10] : memref<104x104xbf16, #tpu.memory_space<vmem>>, vector<104x104xbf16>
    %c1 = arith.constant 1 : index
    %c0_11 = arith.constant 0 : index
    %15 = vector.load %arg3[%c1, %c0_11] : memref<27x416xf32, #tpu.memory_space<vmem>>, vector<1x104xf32>
    %16 = arith.truncf %13 : vector<2x104xf32> to vector<2x104xbf16>
    %cst_12 = arith.constant dense<0.000000e+00> : vector<2x104xf32>
    %17 = tpu.matmul %16, %14, %cst_12 {dimension_numbers = #tpu.dot_dimension_numbers<[1], [0], [0], [1], [0, 0, 1, 1], [], []>} : vector<2x104xbf16>, vector<104x104xbf16>, vector<2x104xf32> -> vector<2x104xf32>
    %18 = vector.broadcast %15 : vector<1x104xf32> to vector<2x104xf32>
    %19 = arith.addf %17, %18 : vector<2x104xf32>
    %cst_13 = arith.constant 0.000000e+00 : f32
    %20 = vector.broadcast %cst_13 : f32 to vector<2x104xf32>
    %21 = arith.cmpf oge, %19, %20 : vector<2x104xf32>
    %cst_14 = arith.constant 0.00999999977 : f32
    %22 = vector.broadcast %cst_14 : f32 to vector<2x104xf32>
    %23 = arith.mulf %22, %19 : vector<2x104xf32>
    %24 = arith.select %21, %19, %23 : vector<2x104xi1>, vector<2x104xf32>
    %c0_15 = arith.constant 0 : index
    %c0_16 = arith.constant 0 : index
    %25 = vector.load %arg6[%c0_15, %c0_16] : memref<104x416xbf16, #tpu.memory_space<vmem>>, vector<104x416xbf16>
    %c2 = arith.constant 2 : index
    %c0_17 = arith.constant 0 : index
    %26 = vector.load %arg3[%c2, %c0_17] : memref<27x416xf32, #tpu.memory_space<vmem>>, vector<1x416xf32>
    %27 = arith.truncf %24 : vector<2x104xf32> to vector<2x104xbf16>
    %cst_18 = arith.constant dense<0.000000e+00> : vector<2x416xf32>
    %28 = tpu.matmul %27, %25, %cst_18 {dimension_numbers = #tpu.dot_dimension_numbers<[1], [0], [0], [1], [0, 0, 1, 1], [], []>} : vector<2x104xbf16>, vector<104x416xbf16>, vector<2x416xf32> -> vector<2x416xf32>
    %29 = vector.broadcast %26 : vector<1x416xf32> to vector<2x416xf32>
    %30 = arith.addf %28, %29 : vector<2x416xf32>
    %c0_19 = arith.constant 0 : index
    %c0_20 = arith.constant 0 : index
    %31 = vector.load %arg7[%c0_19, %c0_20] : memref<416x240xbf16, #tpu.memory_space<vmem>>, vector<416x240xbf16>
    %c3 = arith.constant 3 : index
    %c0_21 = arith.constant 0 : index
    %32 = vector.load %arg3[%c3, %c0_21] : memref<27x416xf32, #tpu.memory_space<vmem>>, vector<1x240xf32>
    %33 = arith.truncf %30 : vector<2x416xf32> to vector<2x416xbf16>
    %cst_22 = arith.constant dense<0.000000e+00> : vector<2x240xf32>
    %34 = tpu.matmul %33, %31, %cst_22 {dimension_numbers = #tpu.dot_dimension_numbers<[1], [0], [0], [1], [0, 0, 1, 1], [], []>} : vector<2x416xbf16>, vector<416x240xbf16>, vector<2x240xf32> -> vector<2x240xf32>
    %35 = vector.broadcast %32 : vector<1x240xf32> to vector<2x240xf32>
    %36 = arith.addf %34, %35 : vector<2x240xf32>
    %cst_23 = arith.constant 0.000000e+00 : f32
    %37 = vector.broadcast %cst_23 : f32 to vector<2x240xf32>
    %38 = arith.cmpf oge, %36, %37 : vector<2x240xf32>
    %cst_24 = arith.constant 0.00999999977 : f32
    %39 = vector.broadcast %cst_24 : f32 to vector<2x240xf32>
    %40 = arith.mulf %39, %36 : vector<2x240xf32>
    %41 = arith.select %38, %36, %40 : vector<2x240xi1>, vector<2x240xf32>
    %c0_25 = arith.constant 0 : index
    %c0_26 = arith.constant 0 : index
    %42 = vector.load %arg8[%c0_25, %c0_26] : memref<240x240xbf16, #tpu.memory_space<vmem>>, vector<240x240xbf16>
    %c4 = arith.constant 4 : index
    %c0_27 = arith.constant 0 : index
    %43 = vector.load %arg3[%c4, %c0_27] : memref<27x416xf32, #tpu.memory_space<vmem>>, vector<1x240xf32>
    %44 = arith.truncf %41 : vector<2x240xf32> to vector<2x240xbf16>
    %cst_28 = arith.constant dense<0.000000e+00> : vector<2x240xf32>
    %45 = tpu.matmul %44, %42, %cst_28 {dimension_numbers = #tpu.dot_dimension_numbers<[1], [0], [0], [1], [0, 0, 1, 1], [], []>} : vector<2x240xbf16>, vector<240x240xbf16>, vector<2x240xf32> -> vector<2x240xf32>
    %46 = vector.broadcast %43 : vector<1x240xf32> to vector<2x240xf32>
    %47 = arith.addf %45, %46 : vector<2x240xf32>
    %cst_29 = arith.constant 0.000000e+00 : f32
    %48 = vector.broadcast %cst_29 : f32 to vector<2x240xf32>
    %49 = arith.cmpf oge, %47, %48 : vector<2x240xf32>
    %cst_30 = arith.constant 0.00999999977 : f32
    %50 = vector.broadcast %cst_30 : f32 to vector<2x240xf32>
    %51 = arith.mulf %50, %47 : vector<2x240xf32>
    %52 = arith.select %49, %47, %51 : vector<2x240xi1>, vector<2x240xf32>
    %c0_31 = arith.constant 0 : index
    %c0_32 = arith.constant 0 : index
    %53 = vector.load %arg9[%c0_31, %c0_32] : memref<240x176xbf16, #tpu.memory_space<vmem>>, vector<240x176xbf16>
    %c5 = arith.constant 5 : index
    %c0_33 = arith.constant 0 : index
    %54 = vector.load %arg3[%c5, %c0_33] : memref<27x416xf32, #tpu.memory_space<vmem>>, vector<1x176xf32>
    %55 = arith.truncf %52 : vector<2x240xf32> to vector<2x240xbf16>
    %cst_34 = arith.constant dense<0.000000e+00> : vector<2x176xf32>
    %56 = tpu.matmul %55, %53, %cst_34 {dimension_numbers = #tpu.dot_dimension_numbers<[1], [0], [0], [1], [0, 0, 1, 1], [], []>} : vector<2x240xbf16>, vector<240x176xbf16>, vector<2x176xf32> -> vector<2x176xf32>
    %57 = vector.broadcast %54 : vector<1x176xf32> to vector<2x176xf32>
    %58 = arith.addf %56, %57 : vector<2x176xf32>
    %c0_35 = arith.constant 0 : index
    %c0_36 = arith.constant 0 : index
    %59 = vector.load %arg2[%c0_35, %c0_36] : memref<2x22xf32, #tpu.memory_space<vmem>>, vector<2x22xf32>
    %c0_37 = arith.constant 0 : index
    %c0_38 = arith.constant 0 : index
    %60 = vector.load %arg10[%c0_37, %c0_38] : memref<22x44xbf16, #tpu.memory_space<vmem>>, vector<22x44xbf16>
    %c6 = arith.constant 6 : index
    %c0_39 = arith.constant 0 : index
    %61 = vector.load %arg3[%c6, %c0_39] : memref<27x416xf32, #tpu.memory_space<vmem>>, vector<1x44xf32>
    %62 = arith.truncf %59 : vector<2x22xf32> to vector<2x22xbf16>
    %cst_40 = arith.constant dense<0.000000e+00> : vector<2x44xf32>
    %63 = tpu.matmul %62, %60, %cst_40 {dimension_numbers = #tpu.dot_dimension_numbers<[1], [0], [0], [1], [0, 0, 1, 1], [], []>} : vector<2x22xbf16>, vector<22x44xbf16>, vector<2x44xf32> -> vector<2x44xf32>
    %64 = vector.broadcast %61 : vector<1x44xf32> to vector<2x44xf32>
    %65 = arith.addf %63, %64 : vector<2x44xf32>
    %cst_41 = arith.constant 0.000000e+00 : f32
    %66 = vector.broadcast %cst_41 : f32 to vector<2x44xf32>
    %67 = arith.cmpf oge, %65, %66 : vector<2x44xf32>
    %cst_42 = arith.constant 0.00999999977 : f32
    %68 = vector.broadcast %cst_42 : f32 to vector<2x44xf32>
    %69 = arith.mulf %68, %65 : vector<2x44xf32>
    %70 = arith.select %67, %65, %69 : vector<2x44xi1>, vector<2x44xf32>
    %c0_43 = arith.constant 0 : index
    %c0_44 = arith.constant 0 : index
    %71 = vector.load %arg11[%c0_43, %c0_44] : memref<44x44xbf16, #tpu.memory_space<vmem>>, vector<44x44xbf16>
    %c7 = arith.constant 7 : index
    %c0_45 = arith.constant 0 : index
    %72 = vector.load %arg3[%c7, %c0_45] : memref<27x416xf32, #tpu.memory_space<vmem>>, vector<1x44xf32>
    %73 = arith.truncf %70 : vector<2x44xf32> to vector<2x44xbf16>
    %cst_46 = arith.constant dense<0.000000e+00> : vector<2x44xf32>
    %74 = tpu.matmul %73, %71, %cst_46 {dimension_numbers = #tpu.dot_dimension_numbers<[1], [0], [0], [1], [0, 0, 1, 1], [], []>} : vector<2x44xbf16>, vector<44x44xbf16>, vector<2x44xf32> -> vector<2x44xf32>
    %75 = vector.broadcast %72 : vector<1x44xf32> to vector<2x44xf32>
    %76 = arith.addf %74, %75 : vector<2x44xf32>
    %cst_47 = arith.constant 0.000000e+00 : f32
    %77 = vector.broadcast %cst_47 : f32 to vector<2x44xf32>
    %78 = arith.cmpf oge, %76, %77 : vector<2x44xf32>
    %cst_48 = arith.constant 0.00999999977 : f32
    %79 = vector.broadcast %cst_48 : f32 to vector<2x44xf32>
    %80 = arith.mulf %79, %76 : vector<2x44xf32>
    %81 = arith.select %78, %76, %80 : vector<2x44xi1>, vector<2x44xf32>
    %c0_49 = arith.constant 0 : index
    %c0_50 = arith.constant 0 : index
    %82 = vector.load %arg12[%c0_49, %c0_50] : memref<44x22xbf16, #tpu.memory_space<vmem>>, vector<44x22xbf16>
    %c8 = arith.constant 8 : index
    %c0_51 = arith.constant 0 : index
    %83 = vector.load %arg3[%c8, %c0_51] : memref<27x416xf32, #tpu.memory_space<vmem>>, vector<1x22xf32>
    %84 = arith.truncf %81 : vector<2x44xf32> to vector<2x44xbf16>
    %cst_52 = arith.constant dense<0.000000e+00> : vector<2x22xf32>
    %85 = tpu.matmul %84, %82, %cst_52 {dimension_numbers = #tpu.dot_dimension_numbers<[1], [0], [0], [1], [0, 0, 1, 1], [], []>} : vector<2x44xbf16>, vector<44x22xbf16>, vector<2x22xf32> -> vector<2x22xf32>
    %86 = vector.broadcast %83 : vector<1x22xf32> to vector<2x22xf32>
    %87 = arith.addf %85, %86 : vector<2x22xf32>
    %c0_53 = arith.constant 0 : index
    %c0_54 = arith.constant 0 : index
    %88 = vector.load %arg13[%c0_53, %c0_54] : memref<22x44xbf16, #tpu.memory_space<vmem>>, vector<22x44xbf16>
    %c9 = arith.constant 9 : index
    %c0_55 = arith.constant 0 : index
    %89 = vector.load %arg3[%c9, %c0_55] : memref<27x416xf32, #tpu.memory_space<vmem>>, vector<1x44xf32>
    %90 = arith.truncf %87 : vector<2x22xf32> to vector<2x22xbf16>
    %cst_56 = arith.constant dense<0.000000e+00> : vector<2x44xf32>
    %91 = tpu.matmul %90, %88, %cst_56 {dimension_numbers = #tpu.dot_dimension_numbers<[1], [0], [0], [1], [0, 0, 1, 1], [], []>} : vector<2x22xbf16>, vector<22x44xbf16>, vector<2x44xf32> -> vector<2x44xf32>
    %92 = vector.broadcast %89 : vector<1x44xf32> to vector<2x44xf32>
    %93 = arith.addf %91, %92 : vector<2x44xf32>
    %cst_57 = arith.constant 0.000000e+00 : f32
    %94 = vector.broadcast %cst_57 : f32 to vector<2x44xf32>
    %95 = arith.cmpf oge, %93, %94 : vector<2x44xf32>
    %cst_58 = arith.constant 0.00999999977 : f32
    %96 = vector.broadcast %cst_58 : f32 to vector<2x44xf32>
    %97 = arith.mulf %96, %93 : vector<2x44xf32>
    %98 = arith.select %95, %93, %97 : vector<2x44xi1>, vector<2x44xf32>
    %c0_59 = arith.constant 0 : index
    %c0_60 = arith.constant 0 : index
    %99 = vector.load %arg14[%c0_59, %c0_60] : memref<44x44xbf16, #tpu.memory_space<vmem>>, vector<44x44xbf16>
    %c10 = arith.constant 10 : index
    %c0_61 = arith.constant 0 : index
    %100 = vector.load %arg3[%c10, %c0_61] : memref<27x416xf32, #tpu.memory_space<vmem>>, vector<1x44xf32>
    %101 = arith.truncf %98 : vector<2x44xf32> to vector<2x44xbf16>
    %cst_62 = arith.constant dense<0.000000e+00> : vector<2x44xf32>
    %102 = tpu.matmul %101, %99, %cst_62 {dimension_numbers = #tpu.dot_dimension_numbers<[1], [0], [0], [1], [0, 0, 1, 1], [], []>} : vector<2x44xbf16>, vector<44x44xbf16>, vector<2x44xf32> -> vector<2x44xf32>
    %103 = vector.broadcast %100 : vector<1x44xf32> to vector<2x44xf32>
    %104 = arith.addf %102, %103 : vector<2x44xf32>
    %cst_63 = arith.constant 0.000000e+00 : f32
    %105 = vector.broadcast %cst_63 : f32 to vector<2x44xf32>
    %106 = arith.cmpf oge, %104, %105 : vector<2x44xf32>
    %cst_64 = arith.constant 0.00999999977 : f32
    %107 = vector.broadcast %cst_64 : f32 to vector<2x44xf32>
    %108 = arith.mulf %107, %104 : vector<2x44xf32>
    %109 = arith.select %106, %104, %108 : vector<2x44xi1>, vector<2x44xf32>
    %c0_65 = arith.constant 0 : index
    %c0_66 = arith.constant 0 : index
    %110 = vector.load %arg15[%c0_65, %c0_66] : memref<44x176xbf16, #tpu.memory_space<vmem>>, vector<44x176xbf16>
    %c11 = arith.constant 11 : index
    %c0_67 = arith.constant 0 : index
    %111 = vector.load %arg3[%c11, %c0_67] : memref<27x416xf32, #tpu.memory_space<vmem>>, vector<1x176xf32>
    %112 = arith.truncf %109 : vector<2x44xf32> to vector<2x44xbf16>
    %cst_68 = arith.constant dense<0.000000e+00> : vector<2x176xf32>
    %113 = tpu.matmul %112, %110, %cst_68 {dimension_numbers = #tpu.dot_dimension_numbers<[1], [0], [0], [1], [0, 0, 1, 1], [], []>} : vector<2x44xbf16>, vector<44x176xbf16>, vector<2x176xf32> -> vector<2x176xf32>
    %114 = vector.broadcast %111 : vector<1x176xf32> to vector<2x176xf32>
    %115 = arith.addf %113, %114 : vector<2x176xf32>
    %c0_69 = arith.constant 0 : index
    %c0_70 = arith.constant 0 : index
    %116 = vector.load %arg16[%c0_69, %c0_70] : memref<176x176xbf16, #tpu.memory_space<vmem>>, vector<176x176xbf16>
    %c12 = arith.constant 12 : index
    %c0_71 = arith.constant 0 : index
    %117 = vector.load %arg3[%c12, %c0_71] : memref<27x416xf32, #tpu.memory_space<vmem>>, vector<1x176xf32>
    %118 = arith.truncf %115 : vector<2x176xf32> to vector<2x176xbf16>
    %cst_72 = arith.constant dense<0.000000e+00> : vector<2x176xf32>
    %119 = tpu.matmul %118, %116, %cst_72 {dimension_numbers = #tpu.dot_dimension_numbers<[1], [0], [0], [1], [0, 0, 1, 1], [], []>} : vector<2x176xbf16>, vector<176x176xbf16>, vector<2x176xf32> -> vector<2x176xf32>
    %120 = vector.broadcast %117 : vector<1x176xf32> to vector<2x176xf32>
    %121 = arith.addf %119, %120 : vector<2x176xf32>
    %cst_73 = arith.constant 0.000000e+00 : f32
    %122 = vector.broadcast %cst_73 : f32 to vector<2x176xf32>
    %123 = arith.cmpf oge, %121, %122 : vector<2x176xf32>
    %cst_74 = arith.constant 0.00999999977 : f32
    %124 = vector.broadcast %cst_74 : f32 to vector<2x176xf32>
    %125 = arith.mulf %124, %121 : vector<2x176xf32>
    %126 = arith.select %123, %121, %125 : vector<2x176xi1>, vector<2x176xf32>
    %c0_75 = arith.constant 0 : index
    %c0_76 = arith.constant 0 : index
    %127 = vector.load %arg17[%c0_75, %c0_76] : memref<176x176xbf16, #tpu.memory_space<vmem>>, vector<176x176xbf16>
    %c13 = arith.constant 13 : index
    %c0_77 = arith.constant 0 : index
    %128 = vector.load %arg3[%c13, %c0_77] : memref<27x416xf32, #tpu.memory_space<vmem>>, vector<1x176xf32>
    %129 = arith.truncf %126 : vector<2x176xf32> to vector<2x176xbf16>
    %cst_78 = arith.constant dense<0.000000e+00> : vector<2x176xf32>
    %130 = tpu.matmul %129, %127, %cst_78 {dimension_numbers = #tpu.dot_dimension_numbers<[1], [0], [0], [1], [0, 0, 1, 1], [], []>} : vector<2x176xbf16>, vector<176x176xbf16>, vector<2x176xf32> -> vector<2x176xf32>
    %131 = vector.broadcast %128 : vector<1x176xf32> to vector<2x176xf32>
    %132 = arith.addf %130, %131 : vector<2x176xf32>
    %cst_79 = arith.constant 0.000000e+00 : f32
    %133 = vector.broadcast %cst_79 : f32 to vector<2x176xf32>
    %134 = arith.cmpf oge, %132, %133 : vector<2x176xf32>
    %cst_80 = arith.constant 0.00999999977 : f32
    %135 = vector.broadcast %cst_80 : f32 to vector<2x176xf32>
    %136 = arith.mulf %135, %132 : vector<2x176xf32>
    %137 = arith.select %134, %132, %136 : vector<2x176xi1>, vector<2x176xf32>
    %c0_81 = arith.constant 0 : index
    %c0_82 = arith.constant 0 : index
    %138 = vector.load %arg18[%c0_81, %c0_82] : memref<176x176xbf16, #tpu.memory_space<vmem>>, vector<176x176xbf16>
    %c14 = arith.constant 14 : index
    %c0_83 = arith.constant 0 : index
    %139 = vector.load %arg3[%c14, %c0_83] : memref<27x416xf32, #tpu.memory_space<vmem>>, vector<1x176xf32>
    %140 = arith.truncf %137 : vector<2x176xf32> to vector<2x176xbf16>
    %cst_84 = arith.constant dense<0.000000e+00> : vector<2x176xf32>
    %141 = tpu.matmul %140, %138, %cst_84 {dimension_numbers = #tpu.dot_dimension_numbers<[1], [0], [0], [1], [0, 0, 1, 1], [], []>} : vector<2x176xbf16>, vector<176x176xbf16>, vector<2x176xf32> -> vector<2x176xf32>
    %142 = vector.broadcast %139 : vector<1x176xf32> to vector<2x176xf32>
    %143 = arith.addf %141, %142 : vector<2x176xf32>
    %144 = arith.addf %143, %58 : vector<2x176xf32>
    %c0_85 = arith.constant 0 : index
    %c0_86 = arith.constant 0 : index
    %145 = vector.load %arg19[%c0_85, %c0_86] : memref<176x256xbf16, #tpu.memory_space<vmem>>, vector<176x256xbf16>
    %c15 = arith.constant 15 : index
    %c0_87 = arith.constant 0 : index
    %146 = vector.load %arg3[%c15, %c0_87] : memref<27x416xf32, #tpu.memory_space<vmem>>, vector<1x256xf32>
    %147 = arith.truncf %144 : vector<2x176xf32> to vector<2x176xbf16>
    %cst_88 = arith.constant dense<0.000000e+00> : vector<2x256xf32>
    %148 = tpu.matmul %147, %145, %cst_88 {dimension_numbers = #tpu.dot_dimension_numbers<[1], [0], [0], [1], [0, 0, 1, 1], [], []>} : vector<2x176xbf16>, vector<176x256xbf16>, vector<2x256xf32> -> vector<2x256xf32>
    %149 = vector.broadcast %146 : vector<1x256xf32> to vector<2x256xf32>
    %150 = arith.addf %148, %149 : vector<2x256xf32>
    %cst_89 = arith.constant 0.000000e+00 : f32
    %151 = vector.broadcast %cst_89 : f32 to vector<2x256xf32>
    %152 = arith.cmpf oge, %150, %151 : vector<2x256xf32>
    %cst_90 = arith.constant 0.00999999977 : f32
    %153 = vector.broadcast %cst_90 : f32 to vector<2x256xf32>
    %154 = arith.mulf %153, %150 : vector<2x256xf32>
    %155 = arith.select %152, %150, %154 : vector<2x256xi1>, vector<2x256xf32>
    %c0_91 = arith.constant 0 : index
    %c0_92 = arith.constant 0 : index
    %156 = vector.load %arg20[%c0_91, %c0_92] : memref<256x64xbf16, #tpu.memory_space<vmem>>, vector<256x64xbf16>
    %c16 = arith.constant 16 : index
    %c0_93 = arith.constant 0 : index
    %157 = vector.load %arg3[%c16, %c0_93] : memref<27x416xf32, #tpu.memory_space<vmem>>, vector<1x64xf32>
    %158 = arith.truncf %155 : vector<2x256xf32> to vector<2x256xbf16>
    %cst_94 = arith.constant dense<0.000000e+00> : vector<2x64xf32>
    %159 = tpu.matmul %158, %156, %cst_94 {dimension_numbers = #tpu.dot_dimension_numbers<[1], [0], [0], [1], [0, 0, 1, 1], [], []>} : vector<2x256xbf16>, vector<256x64xbf16>, vector<2x64xf32> -> vector<2x64xf32>
    %160 = vector.broadcast %157 : vector<1x64xf32> to vector<2x64xf32>
    %161 = arith.addf %159, %160 : vector<2x64xf32>
    %cst_95 = arith.constant 0.000000e+00 : f32
    %162 = vector.broadcast %cst_95 : f32 to vector<2x64xf32>
    %163 = arith.cmpf oge, %161, %162 : vector<2x64xf32>
    %cst_96 = arith.constant 0.00999999977 : f32
    %164 = vector.broadcast %cst_96 : f32 to vector<2x64xf32>
    %165 = arith.mulf %164, %161 : vector<2x64xf32>
    %166 = arith.select %163, %161, %165 : vector<2x64xi1>, vector<2x64xf32>
    %c0_97 = arith.constant 0 : index
    %c0_98 = arith.constant 0 : index
    %167 = vector.load %arg21[%c0_97, %c0_98] : memref<64x20xbf16, #tpu.memory_space<vmem>>, vector<64x20xbf16>
    %c17 = arith.constant 17 : index
    %c0_99 = arith.constant 0 : index
    %168 = vector.load %arg3[%c17, %c0_99] : memref<27x416xf32, #tpu.memory_space<vmem>>, vector<1x20xf32>
    %169 = arith.truncf %166 : vector<2x64xf32> to vector<2x64xbf16>
    %cst_100 = arith.constant dense<0.000000e+00> : vector<2x20xf32>
    %170 = tpu.matmul %169, %167, %cst_100 {dimension_numbers = #tpu.dot_dimension_numbers<[1], [0], [0], [1], [0, 0, 1, 1], [], []>} : vector<2x64xbf16>, vector<64x20xbf16>, vector<2x20xf32> -> vector<2x20xf32>
    %171 = vector.broadcast %168 : vector<1x20xf32> to vector<2x20xf32>
    %172 = arith.addf %170, %171 : vector<2x20xf32>
    %cst_101 = arith.constant 0.000000e+00 : f32
    %173 = vector.broadcast %cst_101 : f32 to vector<2x20xf32>
    %174 = arith.cmpf oge, %172, %173 : vector<2x20xf32>
    %cst_102 = arith.constant 0.00999999977 : f32
    %175 = vector.broadcast %cst_102 : f32 to vector<2x20xf32>
    %176 = arith.mulf %175, %172 : vector<2x20xf32>
    %177 = arith.select %174, %172, %176 : vector<2x20xi1>, vector<2x20xf32>
    %c0_103 = arith.constant 0 : index
    %c0_104 = arith.constant 0 : index
    %178 = vector.load %arg22[%c0_103, %c0_104] : memref<20x64xbf16, #tpu.memory_space<vmem>>, vector<20x64xbf16>
    %c18 = arith.constant 18 : index
    %c0_105 = arith.constant 0 : index
    %179 = vector.load %arg3[%c18, %c0_105] : memref<27x416xf32, #tpu.memory_space<vmem>>, vector<1x64xf32>
    %180 = arith.truncf %177 : vector<2x20xf32> to vector<2x20xbf16>
    %cst_106 = arith.constant dense<0.000000e+00> : vector<2x64xf32>
    %181 = tpu.matmul %180, %178, %cst_106 {dimension_numbers = #tpu.dot_dimension_numbers<[1], [0], [0], [1], [0, 0, 1, 1], [], []>} : vector<2x20xbf16>, vector<20x64xbf16>, vector<2x64xf32> -> vector<2x64xf32>
    %182 = vector.broadcast %179 : vector<1x64xf32> to vector<2x64xf32>
    %183 = arith.addf %181, %182 : vector<2x64xf32>
    %cst_107 = arith.constant 0.000000e+00 : f32
    %184 = vector.broadcast %cst_107 : f32 to vector<2x64xf32>
    %185 = arith.cmpf oge, %183, %184 : vector<2x64xf32>
    %cst_108 = arith.constant 0.00999999977 : f32
    %186 = vector.broadcast %cst_108 : f32 to vector<2x64xf32>
    %187 = arith.mulf %186, %183 : vector<2x64xf32>
    %188 = arith.select %185, %183, %187 : vector<2x64xi1>, vector<2x64xf32>
    %c0_109 = arith.constant 0 : index
    %c0_110 = arith.constant 0 : index
    %189 = vector.load %arg23[%c0_109, %c0_110] : memref<64x256xbf16, #tpu.memory_space<vmem>>, vector<64x256xbf16>
    %c19 = arith.constant 19 : index
    %c0_111 = arith.constant 0 : index
    %190 = vector.load %arg3[%c19, %c0_111] : memref<27x416xf32, #tpu.memory_space<vmem>>, vector<1x256xf32>
    %191 = arith.truncf %188 : vector<2x64xf32> to vector<2x64xbf16>
    %cst_112 = arith.constant dense<0.000000e+00> : vector<2x256xf32>
    %192 = tpu.matmul %191, %189, %cst_112 {dimension_numbers = #tpu.dot_dimension_numbers<[1], [0], [0], [1], [0, 0, 1, 1], [], []>} : vector<2x64xbf16>, vector<64x256xbf16>, vector<2x256xf32> -> vector<2x256xf32>
    %193 = vector.broadcast %190 : vector<1x256xf32> to vector<2x256xf32>
    %194 = arith.addf %192, %193 : vector<2x256xf32>
    %cst_113 = arith.constant 0.000000e+00 : f32
    %195 = vector.broadcast %cst_113 : f32 to vector<2x256xf32>
    %196 = arith.cmpf oge, %194, %195 : vector<2x256xf32>
    %cst_114 = arith.constant 0.00999999977 : f32
    %197 = vector.broadcast %cst_114 : f32 to vector<2x256xf32>
    %198 = arith.mulf %197, %194 : vector<2x256xf32>
    %199 = arith.select %196, %194, %198 : vector<2x256xi1>, vector<2x256xf32>
    %c0_115 = arith.constant 0 : index
    %c0_116 = arith.constant 0 : index
    %200 = vector.load %arg24[%c0_115, %c0_116] : memref<256x176xbf16, #tpu.memory_space<vmem>>, vector<256x176xbf16>
    %c20 = arith.constant 20 : index
    %c0_117 = arith.constant 0 : index
    %201 = vector.load %arg3[%c20, %c0_117] : memref<27x416xf32, #tpu.memory_space<vmem>>, vector<1x176xf32>
    %202 = arith.truncf %199 : vector<2x256xf32> to vector<2x256xbf16>
    %cst_118 = arith.constant dense<0.000000e+00> : vector<2x176xf32>
    %203 = tpu.matmul %202, %200, %cst_118 {dimension_numbers = #tpu.dot_dimension_numbers<[1], [0], [0], [1], [0, 0, 1, 1], [], []>} : vector<2x256xbf16>, vector<256x176xbf16>, vector<2x176xf32> -> vector<2x176xf32>
    %204 = vector.broadcast %201 : vector<1x176xf32> to vector<2x176xf32>
    %205 = arith.addf %203, %204 : vector<2x176xf32>
    %206 = math.absf %205 : vector<2x176xf32>
    %cst_119 = arith.constant 0.000000e+00 : f32
    %207 = vector.broadcast %cst_119 : f32 to vector<2x176xf32>
    %208 = arith.subf %207, %206 : vector<2x176xf32>
    %209 = math.exp %208 : vector<2x176xf32>
    %cst_120 = arith.constant 1.000000e+00 : f32
    %210 = vector.broadcast %cst_120 : f32 to vector<2x176xf32>
    %211 = arith.addf %210, %209 : vector<2x176xf32>
    %212 = tpu.reciprocal %211 {approx = true} : vector<2x176xf32> -> vector<2x176xf32>
    %cst_121 = arith.constant 0.000000e+00 : f32
    %213 = vector.broadcast %cst_121 : f32 to vector<2x176xf32>
    %214 = arith.cmpf oge, %205, %213 : vector<2x176xf32>
    %cst_122 = arith.constant 1.000000e+00 : f32
    %215 = vector.broadcast %cst_122 : f32 to vector<2x176xf32>
    %216 = arith.subf %215, %212 : vector<2x176xf32>
    %217 = arith.select %214, %212, %216 : vector<2x176xi1>, vector<2x176xf32>
    %c0_123 = arith.constant 0 : index
    %c0_124 = arith.constant 0 : index
    %218 = vector.load %arg25[%c0_123, %c0_124] : memref<176x352xbf16, #tpu.memory_space<vmem>>, vector<176x352xbf16>
    %c21 = arith.constant 21 : index
    %c0_125 = arith.constant 0 : index
    %219 = vector.load %arg3[%c21, %c0_125] : memref<27x416xf32, #tpu.memory_space<vmem>>, vector<1x352xf32>
    %220 = arith.truncf %217 : vector<2x176xf32> to vector<2x176xbf16>
    %cst_126 = arith.constant dense<0.000000e+00> : vector<2x352xf32>
    %221 = tpu.matmul %220, %218, %cst_126 {dimension_numbers = #tpu.dot_dimension_numbers<[1], [0], [0], [1], [0, 0, 1, 1], [], []>} : vector<2x176xbf16>, vector<176x352xbf16>, vector<2x352xf32> -> vector<2x352xf32>
    %222 = vector.broadcast %219 : vector<1x352xf32> to vector<2x352xf32>
    %223 = arith.addf %221, %222 : vector<2x352xf32>
    %cst_127 = arith.constant 0.000000e+00 : f32
    %224 = vector.broadcast %cst_127 : f32 to vector<2x352xf32>
    %225 = arith.cmpf oge, %223, %224 : vector<2x352xf32>
    %cst_128 = arith.constant 0.00999999977 : f32
    %226 = vector.broadcast %cst_128 : f32 to vector<2x352xf32>
    %227 = arith.mulf %226, %223 : vector<2x352xf32>
    %228 = arith.select %225, %223, %227 : vector<2x352xi1>, vector<2x352xf32>
    %c0_129 = arith.constant 0 : index
    %c0_130 = arith.constant 0 : index
    %229 = vector.load %arg26[%c0_129, %c0_130] : memref<352x352xbf16, #tpu.memory_space<vmem>>, vector<352x352xbf16>
    %c22 = arith.constant 22 : index
    %c0_131 = arith.constant 0 : index
    %230 = vector.load %arg3[%c22, %c0_131] : memref<27x416xf32, #tpu.memory_space<vmem>>, vector<1x352xf32>
    %231 = arith.truncf %228 : vector<2x352xf32> to vector<2x352xbf16>
    %cst_132 = arith.constant dense<0.000000e+00> : vector<2x352xf32>
    %232 = tpu.matmul %231, %229, %cst_132 {dimension_numbers = #tpu.dot_dimension_numbers<[1], [0], [0], [1], [0, 0, 1, 1], [], []>} : vector<2x352xbf16>, vector<352x352xbf16>, vector<2x352xf32> -> vector<2x352xf32>
    %233 = vector.broadcast %230 : vector<1x352xf32> to vector<2x352xf32>
    %234 = arith.addf %232, %233 : vector<2x352xf32>
    %cst_133 = arith.constant 0.000000e+00 : f32
    %235 = vector.broadcast %cst_133 : f32 to vector<2x352xf32>
    %236 = arith.cmpf oge, %234, %235 : vector<2x352xf32>
    %cst_134 = arith.constant 0.00999999977 : f32
    %237 = vector.broadcast %cst_134 : f32 to vector<2x352xf32>
    %238 = arith.mulf %237, %234 : vector<2x352xf32>
    %239 = arith.select %236, %234, %238 : vector<2x352xi1>, vector<2x352xf32>
    %c0_135 = arith.constant 0 : index
    %c0_136 = arith.constant 0 : index
    %240 = vector.load %arg27[%c0_135, %c0_136] : memref<352x176xbf16, #tpu.memory_space<vmem>>, vector<352x176xbf16>
    %c23 = arith.constant 23 : index
    %c0_137 = arith.constant 0 : index
    %241 = vector.load %arg3[%c23, %c0_137] : memref<27x416xf32, #tpu.memory_space<vmem>>, vector<1x176xf32>
    %242 = arith.truncf %239 : vector<2x352xf32> to vector<2x352xbf16>
    %cst_138 = arith.constant dense<0.000000e+00> : vector<2x176xf32>
    %243 = tpu.matmul %242, %240, %cst_138 {dimension_numbers = #tpu.dot_dimension_numbers<[1], [0], [0], [1], [0, 0, 1, 1], [], []>} : vector<2x352xbf16>, vector<352x176xbf16>, vector<2x176xf32> -> vector<2x176xf32>
    %244 = vector.broadcast %241 : vector<1x176xf32> to vector<2x176xf32>
    %245 = arith.addf %243, %244 : vector<2x176xf32>
    %c0_139 = arith.constant 0 : index
    %c0_140 = arith.constant 0 : index
    %246 = vector.load %arg28[%c0_139, %c0_140] : memref<176x88xbf16, #tpu.memory_space<vmem>>, vector<176x88xbf16>
    %c24 = arith.constant 24 : index
    %c0_141 = arith.constant 0 : index
    %247 = vector.load %arg3[%c24, %c0_141] : memref<27x416xf32, #tpu.memory_space<vmem>>, vector<1x88xf32>
    %248 = arith.truncf %245 : vector<2x176xf32> to vector<2x176xbf16>
    %cst_142 = arith.constant dense<0.000000e+00> : vector<2x88xf32>
    %249 = tpu.matmul %248, %246, %cst_142 {dimension_numbers = #tpu.dot_dimension_numbers<[1], [0], [0], [1], [0, 0, 1, 1], [], []>} : vector<2x176xbf16>, vector<176x88xbf16>, vector<2x88xf32> -> vector<2x88xf32>
    %250 = vector.broadcast %247 : vector<1x88xf32> to vector<2x88xf32>
    %251 = arith.addf %249, %250 : vector<2x88xf32>
    %cst_143 = arith.constant 0.000000e+00 : f32
    %252 = vector.broadcast %cst_143 : f32 to vector<2x88xf32>
    %253 = arith.cmpf oge, %251, %252 : vector<2x88xf32>
    %cst_144 = arith.constant 0.00999999977 : f32
    %254 = vector.broadcast %cst_144 : f32 to vector<2x88xf32>
    %255 = arith.mulf %254, %251 : vector<2x88xf32>
    %256 = arith.select %253, %251, %255 : vector<2x88xi1>, vector<2x88xf32>
    %c0_145 = arith.constant 0 : index
    %c0_146 = arith.constant 0 : index
    %257 = vector.load %arg29[%c0_145, %c0_146] : memref<88x88xbf16, #tpu.memory_space<vmem>>, vector<88x88xbf16>
    %c25 = arith.constant 25 : index
    %c0_147 = arith.constant 0 : index
    %258 = vector.load %arg3[%c25, %c0_147] : memref<27x416xf32, #tpu.memory_space<vmem>>, vector<1x88xf32>
    %259 = arith.truncf %256 : vector<2x88xf32> to vector<2x88xbf16>
    %cst_148 = arith.constant dense<0.000000e+00> : vector<2x88xf32>
    %260 = tpu.matmul %259, %257, %cst_148 {dimension_numbers = #tpu.dot_dimension_numbers<[1], [0], [0], [1], [0, 0, 1, 1], [], []>} : vector<2x88xbf16>, vector<88x88xbf16>, vector<2x88xf32> -> vector<2x88xf32>
    %261 = vector.broadcast %258 : vector<1x88xf32> to vector<2x88xf32>
    %262 = arith.addf %260, %261 : vector<2x88xf32>
    %cst_149 = arith.constant 0.000000e+00 : f32
    %263 = vector.broadcast %cst_149 : f32 to vector<2x88xf32>
    %264 = arith.cmpf oge, %262, %263 : vector<2x88xf32>
    %cst_150 = arith.constant 0.00999999977 : f32
    %265 = vector.broadcast %cst_150 : f32 to vector<2x88xf32>
    %266 = arith.mulf %265, %262 : vector<2x88xf32>
    %267 = arith.select %264, %262, %266 : vector<2x88xi1>, vector<2x88xf32>
    %c0_151 = arith.constant 0 : index
    %c0_152 = arith.constant 0 : index
    %268 = vector.load %arg30[%c0_151, %c0_152] : memref<88x11xbf16, #tpu.memory_space<vmem>>, vector<88x11xbf16>
    %c26 = arith.constant 26 : index
    %c0_153 = arith.constant 0 : index
    %269 = vector.load %arg3[%c26, %c0_153] : memref<27x416xf32, #tpu.memory_space<vmem>>, vector<1x11xf32>
    %270 = arith.truncf %267 : vector<2x88xf32> to vector<2x88xbf16>
    %cst_154 = arith.constant dense<0.000000e+00> : vector<2x11xf32>
    %271 = tpu.matmul %270, %268, %cst_154 {dimension_numbers = #tpu.dot_dimension_numbers<[1], [0], [0], [1], [0, 0, 1, 1], [], []>} : vector<2x88xbf16>, vector<88x11xbf16>, vector<2x11xf32> -> vector<2x11xf32>
    %272 = vector.broadcast %269 : vector<1x11xf32> to vector<2x11xf32>
    %273 = arith.addf %271, %272 : vector<2x11xf32>
    %c0_155 = arith.constant 0 : index
    %c0_156 = arith.constant 0 : index
    %274 = vector.load %arg31[%c0_155, %c0_156] : memref<2x11xf32, #tpu.memory_space<vmem>>, vector<2x11xf32>
    tpu.vector_store %arg31[%c0_155, %c0_156], %273 {strides = array<i32>} : memref<2x11xf32, #tpu.memory_space<vmem>>, vector<2x11xf32>,
    return
  }
}

</mosaic_0001>

<bundles_post_ra>
// kernel: forward.1
= control target key start
LH: loop header
LB: loop body
LE: loop exit
PB: predicated region body
PF: predicated region fallthrough
CT: control target
= control target key end

     0   :  { %s7194_s6 = smov 1   ;;  %s7195_s10 = smov 2   ;;  %s8012_s0 = inlined_call_operand.smem [shape: u32[32], index: -1, kind: input, shape index: {}] }
   0x1   :  { %s7258_s5 = sld [smem:[%s8012_s0]]   ;;  %s7196_s14 = smov 3  }
   0x2   :  { %s7263_s9 = sld [smem:[%s8012_s0 + %s7194_s6]]   ;;  %s7197_s18 = smov 4  }
   0x3   :  { %s7268_s13 = sld [smem:[%s8012_s0 + %s7195_s10]]   ;;  %s7198_s22 = smov 5  }
   0x4   :  { %s7273_s17 = sld [smem:[%s8012_s0 + %s7196_s14]]   ;;  %s7199_s26 = smov 6  }
   0x5   :  { %s7278_s21 = sld [smem:[%s8012_s0 + %s7197_s18]]   ;;  %s7200_s30 = smov 7  }
   0x6   :  { %s7283_s25 = sld [smem:[%s8012_s0 + %s7198_s22]]   ;;  %s7201_s4 = smov 8  }
   0x7   :  { %8024 = sst [smem:[#allocation36_spill]] %s7258_s5  ;;  %s7202_s10 = smov 9  }
   0x8   :  { %8025 = sst [smem:[#allocation37_spill]] %s7263_s9  ;;  %s7203_s15 = smov 10  }
   0x9   :  { %8026 = sst [smem:[#allocation38_spill]] %s7268_s13  ;;  %s7204_s20 = smov 11  }
   0xa   :  { %s7288_s29 = sld [smem:[%s8012_s0 + %s7199_s26]]   ;;  %s7205_s26 = smov 12  }
   0xb   :  { %s7293_s3 = sld [smem:[%s8012_s0 + %s7200_s30]]   ;;  %s7206_s1 = smov 13  }
   0xc   :  { %s7298_s8 = sld [smem:[%s8012_s0 + %s7201_s4]]   ;;  %s7207_s7 = smov 14  }
   0xd   :  { %s7303_s14 = sld [smem:[%s8012_s0 + %s7202_s10]]   ;;  %s7209_s22 = smov 16  }
   0xe   :  { %s7308_s19 = sld [smem:[%s8012_s0 + %s7203_s15]]   ;;  %s7208_s15 = smov 15  }
   0xf   :  { %s7313_s24 = sld [smem:[%s8012_s0 + %s7204_s20]]   ;;  %s7210_s28 = smov 17  }
  0x10   :  { %8027 = sst [smem:[#allocation39_spill]] %s7288_s29 }
  0x11   :  { %8028 = sst [smem:[#allocation40_spill]] %s7293_s3 }
  0x12   :  { %8029 = sst [smem:[#allocation41_spill]] %s7298_s8 }
  0x13   :  { %8030 = sst [smem:[#allocation42_spill]] %s7303_s14 }
  0x14   :  { %s7318_s30 = sld [smem:[%s8012_s0 + %s7205_s26]]  }
  0x15   :  { %s7323_s6 = sld [smem:[%s8012_s0 + %s7206_s1]]  }
  0x16   :  { %s7328_s12 = sld [smem:[%s8012_s0 + %s7207_s7]]   ;;  %s7211_s7 = smov 18  }
  0x17   :  { %s7333_s20 = sld [smem:[%s8012_s0 + %s7208_s15]]   ;;  %s7212_s15 = smov 19  }
  0x18   :  { %s7338_s27 = sld [smem:[%s8012_s0 + %s7209_s22]]   ;;  %s7213_s22 = smov 20  }
  0x19   :  { %s7343_s4 = sld [smem:[%s8012_s0 + %s7210_s28]]   ;;  %s7214_s28 = smov 21  }
  0x1a   :  { %8031 = sst [smem:[#allocation43_spill]] %s7318_s30 }
  0x1b   :  { %s7348_s30 = sld [smem:[%s8012_s0 + %s7211_s7]]   ;;  %s7215_s7 = smov 22  }
  0x1c   :  { %s7353_s13 = sld [smem:[%s8012_s0 + %s7212_s15]]   ;;  %s7216_s15 = smov 23  }
  0x1d   :  { %s7358_s14 = sld [smem:[%s8012_s0 + %s7213_s22]]   ;;  %s7217_s22 = smov 24  }
  0x1e   :  { %s7363_s8 = sld [smem:[%s8012_s0 + %s7214_s28]]   ;;  %s7218_s28 = smov 25  }
  0x1f   :  { %s7368_s3 = sld [smem:[%s8012_s0 + %s7215_s7]]   ;;  %s7219_s7 = smov 26  }
  0x20   :  { %s7373_s29 = sld [smem:[%s8012_s0 + %s7216_s15]]   ;;  %s7220_s15 = smov 27  }
  0x21   :  { %s7388_s9 = sld [smem:[%s8012_s0 + %s7219_s7]]   ;;  %s7223_s7 = smov 30  }
  0x22   :  { %s7393_s5 = sld [smem:[%s8012_s0 + %s7220_s15]]   ;;  %s7224_s15 = smov 31  }
  0x23   :  { %8032 = sst [smem:[#allocation44_spill]] %s7358_s14 }
  0x24   :  { %8033 = sst [smem:[#allocation45_spill]] %s7363_s8 }
  0x25   :  { %s7378_s14 = sld [smem:[%s8012_s0 + %s7217_s22]]   ;;  %s7221_s22 = smov 28  }
  0x26   :  { %s7383_s8 = sld [smem:[%s8012_s0 + %s7218_s28]]   ;;  %s7222_s28 = smov 29  }
  0x27   :  { %8036 = sst [smem:[#allocation48_spill]] %s7388_s9 }
  0x28   :  { %8037 = sst [smem:[#allocation49_spill]] %s7393_s5 }
  0x29   :  { %s7408_s9 = sld [smem:[%s8012_s0 + %s7223_s7]]  }
  0x2a   :  { %s7413_s5 = sld [smem:[%s8012_s0 + %s7224_s15]]  }
  0x2b   :  { %8034 = sst [smem:[#allocation46_spill]] %s7378_s14 }
  0x2c   :  { %8035 = sst [smem:[#allocation47_spill]] %s7383_s8 }
  0x2d   :  { %s7398_s14 = sld [smem:[%s8012_s0 + %s7221_s22]]  }
  0x2e   :  { %s7403_s8 = sld [smem:[%s8012_s0 + %s7222_s28]]  }
  0x2f   :  { %68 = vsyncpa [#allocation3], 0 }
  0x30   :  { %69 = vsyncpa [#allocation6], 0 }
  0x31   :  { %70 = vsyncpa [#allocation9], 0 }
  0x32   :  { %71 = vsyncpa [#allocation12], 0 }
  0x33   :  { %72 = vsyncpa [#allocation15], 0 }
  0x34   :  { %73 = vsyncpa [#allocation18], 0 }
  0x35   :  { %74 = vsyncpa [#allocation21], 0 }
  0x36   :  { %75 = vsyncpa [#allocation24], 0 }
  0x37   :  { %76 = vsyncpa [#allocation4], 0  ;;  %s7225_s22 = smov [#allocation5]  }
  0x38   :  { %s100_s23 = sshll.u32 %s7225_s22, 4  ;;  %s101_s23 = int_to_ptr.vmem [resolvable:$true] %s100_s23 }
  0x39   :  { %s6864_s26 = scalar_lea.vmem %s101_s23, 448  ;;  %p6869_p1 = scmp.lt.s32.totalorder %s101_s23, %s101_s23 }
  0x3a   :  { %p6865_p0 = scmp.ne.s32.totalorder %s101_s23, %s6864_s26  ;;  %p6870_p2 = scmp.lt.s32.totalorder %s6864_s26, %s6864_s26 }
  0x3c   :  { %p6871_p3 = por %p6870_p2, %p6869_p1 }
  0x3e   :  { %p6872_p4 = pnand %p6871_p3, %p6865_p0 }
  0x40   :  { %6875 = shalt.err (!%p6872_p4)
}
  0x41   :  { %s7226_s0 = smov 64   ;;  %s7227_s28 = smov 4  }
  0x42   :  { %106 = dma.hbm_to_vmem [thread:$0]  %s7278_s21, 448, %s101_s23, [#allocation6], %s7226_s0, %s7226_s0, %s7227_s28  }
  0x43   :  { %s7228_s1 = smov [#allocation8]   ;;  %s7229_s7 = smov [#allocation11]  }
  0x44   :  { %s132_s2 = sshll.u32 %s7228_s1, 4  ;;  %s158_s10 = sshll.u32 %s7229_s7, 4  ;;  %s133_s2 = int_to_ptr.vmem [resolvable:$true] %s132_s2  ;;  %s159_s10 = int_to_ptr.vmem [resolvable:$true] %s158_s10 }
  0x45   :  { %s6884_s11 = scalar_lea.vmem %s133_s2, 192  ;;  %p6889_p6 = scmp.lt.s32.totalorder %s133_s2, %s133_s2 }
  0x46   :  { %p6885_p5 = scmp.ne.s32.totalorder %s133_s2, %s6884_s11  ;;  %p6890_p7 = scmp.lt.s32.totalorder %s6884_s11, %s6884_s11 }
  0x48   :  { %p6891_p8 = por %p6890_p7, %p6889_p6 }
  0x4a   :  { %p6892_p9 = pnand %p6891_p8, %p6885_p5 }
  0x4c   :  { %6895 = shalt.err (!%p6892_p9)
}
  0x4d   :  { %138 = dma.hbm_to_vmem [thread:$0]  %s7308_s19, 192, %s133_s2, [#allocation9], %s7226_s0, %s7226_s0, %s7227_s28  }
  0x4e   :  { %s6904_s15 = scalar_lea.vmem %s159_s10, 192  ;;  %p6909_p11 = scmp.lt.s32.totalorder %s159_s10, %s159_s10 }
  0x4f   :  { %p6905_p10 = scmp.ne.s32.totalorder %s159_s10, %s6904_s15  ;;  %p6910_p12 = scmp.lt.s32.totalorder %s6904_s15, %s6904_s15 }
  0x51   :  { %p6911_p13 = por %p6910_p12, %p6909_p11 }
  0x53   :  { %p6912_p0 = pnand %p6911_p13, %p6905_p10 }
  0x55   :  { %6915 = shalt.err (!%p6912_p0)
}
  0x56   :  { %164 = dma.hbm_to_vmem [thread:$0]  %s7323_s6, 192, %s159_s10, [#allocation12], %s7226_s0, %s7226_s0, %s7227_s28  }
  0x57   :  { %s7230_s21 = smov [#allocation14]  }
  0x58   :  { %s182_s16 = sshll.u32 %s7230_s21, 4  ;;  %s183_s16 = int_to_ptr.vmem [resolvable:$true] %s182_s16 }
  0x59   :  { %s6924_s18 = scalar_lea.vmem %s183_s16, 768  ;;  %p6929_p2 = scmp.lt.s32.totalorder %s183_s16, %s183_s16 }
  0x5a   :  { %p6925_p1 = scmp.ne.s32.totalorder %s183_s16, %s6924_s18  ;;  %p6930_p3 = scmp.lt.s32.totalorder %s6924_s18, %s6924_s18 }
  0x5c   :  { %p6931_p4 = por %p6930_p3, %p6929_p2 }
  0x5e   :  { %p6932_p5 = pnand %p6931_p4, %p6925_p1 }
  0x60   :  { %6935 = shalt.err (!%p6932_p5)
}
  0x61   :  { %s7231_s19 = smov 128   ;;  %s7232_s22 = smov 8  }
  0x62   :  { %188 = dma.hbm_to_vmem [thread:$0]  %s7333_s20, 768, %s183_s16, [#allocation15], %s7231_s19, %s7231_s19, %s7232_s22  }
  0x63   :  { %s7233_s23 = smov [#allocation17]   ;;  %s7234_s6 = smov [#allocation20]  }
  0x64   :  { %s206_s26 = sshll.u32 %s7233_s23, 4  ;;  %s230_s1 = sshll.u32 %s7234_s6, 4  ;;  %s207_s26 = int_to_ptr.vmem [resolvable:$true] %s206_s26  ;;  %s231_s1 = int_to_ptr.vmem [resolvable:$true] %s230_s1 }
  0x65   :  { %s6944_s2 = scalar_lea.vmem %s207_s26, 2816  ;;  %p6949_p7 = scmp.lt.s32.totalorder %s207_s26, %s207_s26 }
  0x66   :  { %p6945_p6 = scmp.ne.s32.totalorder %s207_s26, %s6944_s2  ;;  %p6950_p8 = scmp.lt.s32.totalorder %s6944_s2, %s6944_s2 }
  0x68   :  { %p6951_p9 = por %p6950_p8, %p6949_p7 }
  0x6a   :  { %p6952_p10 = pnand %p6951_p9, %p6945_p6 }
  0x6c   :  { %6955 = shalt.err (!%p6952_p10)
}
  0x6d   :  { %212 = dma.hbm_to_vmem [thread:$0]  %s7343_s4, 2816, %s207_s26, [#allocation18], %s7231_s19, %s7231_s19, %s7232_s22  }
  0x6e   :  { %s6964_s7 = scalar_lea.vmem %s231_s1, 2816  ;;  %p6969_p12 = scmp.lt.s32.totalorder %s231_s1, %s231_s1 }
  0x6f   :  { %p6965_p11 = scmp.ne.s32.totalorder %s231_s1, %s6964_s7  ;;  %p6970_p13 = scmp.lt.s32.totalorder %s6964_s7, %s6964_s7 }
  0x71   :  { %p6971_p0 = por %p6970_p13, %p6969_p12 }
  0x73   :  { %p6972_p1 = pnand %p6971_p0, %p6965_p11 }
  0x75   :  { %6975 = shalt.err (!%p6972_p1)
}
  0x76   :  { %236 = dma.hbm_to_vmem [thread:$0]  %s7353_s13, 2816, %s231_s1, [#allocation21], %s7231_s19, %s7231_s19, %s7232_s22  }
  0x77   :  { %s7235_s20 = smov [#allocation23]   ;;  %s7236_s11 = smov [#allocation2]  }
  0x78   :  { %s258_s10 = sshll.u32 %s7235_s20, 4  ;;  %s88_s15 = sshll.u32 %s7236_s11, 4  ;;  %s259_s10 = int_to_ptr.vmem [resolvable:$true] %s258_s10  ;;  %s89_s15 = int_to_ptr.vmem [resolvable:$true] %s88_s15 }
  0x79   :  { %s6984_s21 = scalar_lea.vmem %s259_s10, 1024  ;;  %p6989_p3 = scmp.lt.s32.totalorder %s259_s10, %s259_s10 }
  0x7a   :  { %p6985_p2 = scmp.ne.s32.totalorder %s259_s10, %s6984_s21  ;;  %p6990_p4 = scmp.lt.s32.totalorder %s6984_s21, %s6984_s21 }
  0x7c   :  { %p6991_p5 = por %p6990_p4, %p6989_p3 }
  0x7e   :  { %p6992_p6 = pnand %p6991_p5, %p6985_p2 }
  0x80   :  { %6995 = shalt.err (!%p6992_p6)
}
  0x81   :  { %264 = dma.hbm_to_vmem [thread:$0]  %s7373_s29, 1024, %s259_s10, [#allocation24], %s7231_s19, %s7231_s19, %s7232_s22  }
  0x82   :  { %s7004_s4 = scalar_lea.vmem %s89_s15, 2048  ;;  %p7009_p8 = scmp.lt.s32.totalorder %s89_s15, %s89_s15 }
  0x83   :  { %p7005_p7 = scmp.ne.s32.totalorder %s89_s15, %s7004_s4  ;;  %p7010_p9 = scmp.lt.s32.totalorder %s7004_s4, %s7004_s4 }
  0x85   :  { %p7011_p10 = por %p7010_p9, %p7009_p8 }
  0x87   :  { %p7012_p11 = pnand %p7011_p10, %p7005_p7 }
  0x89   :  { %7015 = shalt.err (!%p7012_p11)
}
  0x8a   :  { %s7237_s13 = smov 512   ;;  %s7238_s16 = smov 32  }
  0x8b   :  { %94 = dma.hbm_to_vmem [thread:$0]  %s7273_s17, 2048, %s89_s15, [#allocation3], %s7237_s13, %s7237_s13, %s7238_s16  }
  0x8c   :  { %s7239_s18 = smov [#allocation7]   ;;  %s7240_s26 = smov [#allocation10]  }
  0x8d   :  { %s112_s23 = sshll.u32 %s7239_s18, 4  ;;  %s144_s6 = sshll.u32 %s7240_s26, 4  ;;  %s113_s23 = int_to_ptr.vmem [resolvable:$true] %s112_s23  ;;  %s145_s6 = int_to_ptr.vmem [resolvable:$true] %s144_s6 }
  0x8e   :  { %s7024_s1 = scalar_lea.vmem %s113_s23, 832  ;;  %p7029_p13 = scmp.lt.s32.totalorder %s113_s23, %s113_s23 }
  0x8f   :  { %p7025_p12 = scmp.ne.s32.totalorder %s113_s23, %s7024_s1  ;;  %p7030_p0 = scmp.lt.s32.totalorder %s7024_s1, %s7024_s1 }
  0x91   :  { %p7031_p1 = por %p7030_p0, %p7029_p13 }
  0x93   :  { %p7032_p2 = pnand %p7031_p1, %p7025_p12 }
  0x95   :  { %7035 = shalt.err (!%p7032_p2)
}
  0x96   :  { %118 = dma.hbm_to_vmem [thread:$0]  %s7283_s25, 832, %s113_s23, [#allocation6], %s7226_s0, %s7226_s0, %s7227_s28  }
  0x97   :  { %s7044_s29 = scalar_lea.vmem %s145_s6, 384  ;;  %p7049_p4 = scmp.lt.s32.totalorder %s145_s6, %s145_s6 }
  0x98   :  { %p7045_p3 = scmp.ne.s32.totalorder %s145_s6, %s7044_s29  ;;  %p7050_p5 = scmp.lt.s32.totalorder %s7044_s29, %s7044_s29 }
  0x9a   :  { %p7051_p6 = por %p7050_p5, %p7049_p4 }
  0x9c   :  { %p7052_p7 = pnand %p7051_p6, %p7045_p3 }
  0x9e   :  { %7055 = shalt.err (!%p7052_p7)
}
  0x9f   :  { %150 = dma.hbm_to_vmem [thread:$0]  %s7313_s24, 384, %s145_s6, [#allocation9], %s7226_s0, %s7226_s0, %s7227_s28  }
  0xa0   :  { %s7241_s17 = smov [#allocation13]   ;;  %s7242_s7 = smov [#allocation16]  }
  0xa1   :  { %s170_s2 = sshll.u32 %s7241_s17, 4  ;;  %s194_s20 = sshll.u32 %s7242_s7, 4  ;;  %s171_s2 = int_to_ptr.vmem [resolvable:$true] %s170_s2  ;;  %s195_s20 = int_to_ptr.vmem [resolvable:$true] %s194_s20 }
  0xa2   :  { %s7064_s10 = scalar_lea.vmem %s171_s2, 384  ;;  %p7069_p9 = scmp.lt.s32.totalorder %s171_s2, %s171_s2 }
  0xa3   :  { %p7065_p8 = scmp.ne.s32.totalorder %s171_s2, %s7064_s10  ;;  %p7070_p10 = scmp.lt.s32.totalorder %s7064_s10, %s7064_s10 }
  0xa5   :  { %p7071_p11 = por %p7070_p10, %p7069_p9 }
  0xa7   :  { %p7072_p12 = pnand %p7071_p11, %p7065_p8 }
  0xa9   :  { %7075 = shalt.err (!%p7072_p12)
}
  0xaa   :  { %176 = dma.hbm_to_vmem [thread:$0]  %s7328_s12, 384, %s171_s2, [#allocation12], %s7226_s0, %s7226_s0, %s7227_s28  }
  0xab   :  { %s7084_s25 = scalar_lea.vmem %s195_s20, 2816  ;;  %p7089_p0 = scmp.lt.s32.totalorder %s195_s20, %s195_s20 }
  0xac   :  { %p7085_p13 = scmp.ne.s32.totalorder %s195_s20, %s7084_s25  ;;  %p7090_p1 = scmp.lt.s32.totalorder %s7084_s25, %s7084_s25 }
  0xae   :  { %p7091_p2 = por %p7090_p1, %p7089_p0 }
  0xb0   :  { %p7092_p3 = pnand %p7091_p2, %p7085_p13 }
  0xb2   :  { %7095 = shalt.err (!%p7092_p3)
}
  0xb3   :  { %200 = dma.hbm_to_vmem [thread:$0]  %s7338_s27, 2816, %s195_s20, [#allocation15], %s7231_s19, %s7231_s19, %s7232_s22  }
  0xb4   :  { %s7243_s24 = smov [#allocation19]   ;;  %s7244_s15 = smov [#allocation22]  }
  0xb5   :  { %s218_s11 = sshll.u32 %s7243_s24, 4  ;;  %s246_s21 = sshll.u32 %s7244_s15, 4  ;;  %s219_s11 = int_to_ptr.vmem [resolvable:$true] %s218_s11  ;;  %s247_s21 = int_to_ptr.vmem [resolvable:$true] %s246_s21 }
  0xb6   :  { %s7104_s4 = scalar_lea.vmem %s219_s11, 2816  ;;  %p7109_p5 = scmp.lt.s32.totalorder %s219_s11, %s219_s11 }
  0xb7   :  { %p7105_p4 = scmp.ne.s32.totalorder %s219_s11, %s7104_s4  ;;  %p7110_p6 = scmp.lt.s32.totalorder %s7104_s4, %s7104_s4 }
  0xb9   :  { %p7111_p7 = por %p7110_p6, %p7109_p5 }
  0xbb   :  { %p7112_p8 = pnand %p7111_p7, %p7105_p4 }
  0xbd   :  { %7115 = shalt.err (!%p7112_p8)
}
  0xbe   :  { %224 = dma.hbm_to_vmem [thread:$0]  %s7348_s30, 2816, %s219_s11, [#allocation18], %s7231_s19, %s7231_s19, %s7232_s22  }
  0xbf   :  { %s7124_s12 = scalar_lea.vmem %s247_s21, 192  ;;  %p7129_p10 = scmp.lt.s32.totalorder %s247_s21, %s247_s21 }
  0xc0   :  { %p7125_p9 = scmp.ne.s32.totalorder %s247_s21, %s7124_s12  ;;  %p7130_p11 = scmp.lt.s32.totalorder %s7124_s12, %s7124_s12 }
  0xc2   :  { %p7131_p12 = por %p7130_p11, %p7129_p10 }
  0xc4   :  { %p7132_p13 = pnand %p7131_p12, %p7125_p9 }
  0xc6   :  { %7135 = shalt.err (!%p7132_p13)
}
  0xc7   :  { %252 = dma.hbm_to_vmem [thread:$0]  %s7368_s3, 192, %s247_s21, [#allocation21], %s7226_s0, %s7226_s0, %s7227_s28  }
  0xc8   :  { %s7245_s27 = smov [#allocation25]  }
  0xc9   :  { %s278_s13 = sshll.u32 %s7245_s27, 4  ;;  %s279_s13 = int_to_ptr.vmem [resolvable:$true] %s278_s13 }
  0xca   :  { %s7144_s16 = scalar_lea.vmem %s279_s13, 1408  ;;  %p7149_p1 = scmp.lt.s32.totalorder %s279_s13, %s279_s13 }
  0xcb   :  { %p7145_p0 = scmp.ne.s32.totalorder %s279_s13, %s7144_s16  ;;  %p7150_p2 = scmp.lt.s32.totalorder %s7144_s16, %s7144_s16 }
  0xcd   :  { %p7151_p3 = por %p7150_p2, %p7149_p1 }
  0xcf   :  { %p7152_p4 = pnand %p7151_p3, %p7145_p0 }
  0xd1   :  { %7155 = shalt.err (!%p7152_p4)
}
  0xd2   :  { %284 = dma.hbm_to_vmem [thread:$0]  %s7398_s14, 1408, %s279_s13, [#allocation24], %s7226_s0, %s7226_s0, %s7227_s28  }
  0xd3   :  { %7176 = dma.done.wait [#allocation3], 2048  }
  0xd4   :  { %7177 = vsyncadd [#allocation3], 4294965248 }
  0xd5   :  { %7178 = dma.done.wait [#allocation6], 1280  }
  0xd6   :  { %7179 = vsyncadd [#allocation6], 4294966016 }
  0xd7   :  { %7180 = dma.done.wait [#allocation9], 576  }
  0xd8   :  { %7181 = vsyncadd [#allocation9], 4294966720 }
  0xd9   :  { %7182 = dma.done.wait [#allocation12], 576  }
  0xda   :  { %7183 = vsyncadd [#allocation12], 4294966720 }
  0xdb   :  { %7184 = dma.done.wait [#allocation15], 3584  }
  0xdc   :  { %7185 = vsyncadd [#allocation15], 4294963712 }
  0xdd   :  { %7186 = dma.done.wait [#allocation18], 5632  }
  0xde   :  { %7187 = vsyncadd [#allocation18], 4294961664 }
  0xdf   :  { %7188 = dma.done.wait [#allocation21], 3008  }
  0xe0   :  { %7189 = vsyncadd [#allocation21], 4294964288 }
  0xe1   :  { %7190 = dma.done.wait [#allocation24], 2432  }
  0xe2   :  { %7191 = vsyncadd [#allocation24], 4294964864  ;;  %s8038_s3 = sld [smem:[#allocation36_spill]]  ;;  %v7246_v0 = vmov 0.0   ;;  %vm7247_vm0 = vmmov 0   ;;  %vm372_vm1 = vcmask 1041408  }
  0xe3   :  { %s8039_s30 = sld [smem:[#allocation37_spill]]  ;;  %5972 = vmatprep.subr.bf16.mxu0 %v7246_v0  ;;  %5980 = vmatprep.mubr.msk.bf16.mxu0 %vm7247_vm0, %v7246_v0  ;;  %v6172_v1 = vld [vmem:[#allocation5 + $0x18] ss:$0 sps:$4 sm:$0x33]   ;;  %v6174_v3 = vld [vmem:[#allocation5 + $0x10] sm:$0xff]   ;;  %vm477_vm2 = vcmask 1043456  }
  0xe4   :  { %5984 = vmatprep.subr.bf16.mxu1 %v7246_v0  ;;  %5998 = vmatprep.mubr.msk.bf16.mxu1 %vm7247_vm0, %v7246_v0  ;;  %v374_v2 = vsel %vm372_vm1, %v6172_v1, 0  ;;  %v6177_v6 = vld [vmem:[#allocation7 + $0x30] ss:$0 sps:$4 sm:$0xff]   ;;  %v6178_v9 = vld [vmem:[#allocation7 + $0x28] sm:$0xff]   ;;  %v6179_v12 = vld [vmem:[#allocation7 + $0x20] sm:$0xff]   ;;  %s8040_s14 = sld [smem:[#allocation39_spill]] }
  0xe5   :  { %5973 = vmatpush3.bf16.msra.mxu0 %v374_v2  ;;  %v6175_v7 = vld [vmem:[#allocation5 + $0x8] sm:$0xff]   ;;  %v479_v8 = vsel %vm477_vm2, %v6177_v6, 0  ;;  %v6176_v10 = vld [vmem:[#allocation5] sm:$0xff]   ;;  %v6180_v14 = vld [vmem:[#allocation7 + $0x18] sm:$0xff]   ;;  %vm368_vm3 = vcmask 424960   ;;  %vm473_vm5 = vcmask 850944  }
  0xe6   :  { %5974 = vmatprep.subr.bf16.mxu0 %v7246_v0  ;;  %5985 = vmatpush3.bf16.msra.mxu1 %v479_v8  ;;  %v6181_v15 = vld [vmem:[#allocation7 + $0x10] sm:$0xff]   ;;  %v6182_v16 = vld [vmem:[#allocation7 + $0x8] sm:$0xff]   ;;  %v6183_v17 = vld [vmem:[#allocation7] sm:$0xff]   ;;  %s8041_s0 = sld [smem:[#allocation40_spill]]  ;;  %v7248_v59 = vmov 0   ;;  %vm1130_vm7 = vcmask 261120  }
  0xe7   :  { %5986 = vmatprep.subr.bf16.mxu1 %v7246_v0  ;;  %v345_v32 = vld [vmem:[#allocation2] ss:$0 sm:$0xff]  ;;  %v432_v62 = vld [vmem:[#allocation2 + $0x1] ss:$0 sm:$0xff]  ;;  %s8042_s28 = sld [smem:[#allocation41_spill]]  ;;  %vm1726_vm10 = vcmask 1042432  }
  0xe8   :  { %v335_v4 = vld [vmem:[%s8038_s3] sm:$0x3]  ;;  %s8043_s19 = sld [smem:[#allocation42_spill]]  ;;  %vm1417_vm11 = vcmask 916480   ;;  %vm1722_vm12 = vcmask 179200   ;;  %vm1802_vm13 = vcmask 1045504  }
  0xe9   :  { %v336_v5 = vld [vmem:[%s8039_s30] sm:$0x3]  ;;  %5975 = vmatpush3.bf16.msra.mxu0 %v6174_v3  ;;  %s8044_s22 = sld [smem:[#allocation38_spill]] }
  0xea   :  { %5976 = vmatprep.subr.bf16.mxu0 %v7246_v0  ;;  %v337_v11 = vsub.f32 %v335_v4, %v336_v5  ;;  %5987 = vmatpush3.bf16.msra.mxu1 %v6178_v9  ;;  %v548_v18 = vld [vmem:[%s8040_s14 + $0xc0] sm:$0xff]  ;;  %v549_v19 = vld [vmem:[%s8040_s14 + $0xc8] sm:$0xff]  ;;  %s8045_s18 = sld [smem:[#allocation43_spill]] }
  0xeb   :  { %5988 = vmatprep.subr.bf16.mxu1 %v7246_v0  ;;  %v5389_v20 = vcombine.high %v548_v18, %v548_v18  ;;  %v5391_v21 = vcombine.high %v549_v19, %v549_v19  ;;  %v5388_v22 = vcombine.low %v548_v18, %v548_v18  ;;  %v6190_v23 = vld [vmem:[%s8040_s14 + $0xa4] ss:$16 sps:$4 sm:$0xff]   ;;  %v6188_v24 = vld [vmem:[%s8040_s14 + $0xa0] ss:$16 sps:$4 sm:$0xff]   ;;  %v5390_v36 = vcombine.low %v549_v19, %v549_v19  ;;  %v6193_v43 = vld [vmem:[%s8040_s14 + $0xac] ss:$16 sps:$4 sm:$0xff]  }
  0xec   :  { %v346_v13 = vpack.c.bf16 %v337_v11, %v337_v11  ;;  %v6196_v26 = vld [vmem:[%s8040_s14 + $0x84] ss:$16 sps:$4 sm:$0xff]   ;;  %v6194_v27 = vld [vmem:[%s8040_s14 + $0x80] ss:$16 sps:$4 sm:$0xff]   ;;  %v6191_v44 = vld [vmem:[%s8040_s14 + $0xa8] ss:$16 sps:$4 sm:$0xff]  }
  0xed   :  { %5977 = vmatpush3.bf16.msra.mxu0 %v6175_v7  ;;  %v708_v25 = vsel %vm477_vm2, %v5388_v22, 0  ;;  %v6202_v28 = vld [vmem:[%s8040_s14 + $0x64] ss:$16 sps:$4 sm:$0xff]   ;;  %v6200_v29 = vld [vmem:[%s8040_s14 + $0x60] ss:$16 sps:$4 sm:$0xff]   ;;  %v714_v42 = vsel %vm477_vm2, %v5390_v36, 0 }
  0xee   :  { %5978 = vmatprep.subr.bf16.mxu0 %v7246_v0  ;;  %5989 = vmatpush3.bf16.msra.mxu1 %v6179_v12  ;;  %v6208_v30 = vld [vmem:[%s8040_s14 + $0x44] ss:$16 sps:$4 sm:$0xff]   ;;  %v6206_v31 = vld [vmem:[%s8040_s14 + $0x40] ss:$16 sps:$4 sm:$0xff]   ;;  %v6199_v45 = vld [vmem:[%s8040_s14 + $0x8c] ss:$16 sps:$4 sm:$0xff]  }
  0xef   :  { %5990 = vmatprep.subr.bf16.mxu1 %v7246_v0  ;;  %v6197_v46 = vld [vmem:[%s8040_s14 + $0x88] ss:$16 sps:$4 sm:$0xff]   ;;  %v6205_v47 = vld [vmem:[%s8040_s14 + $0x6c] ss:$16 sps:$4 sm:$0xff]   ;;  %v6214_v51 = vld [vmem:[%s8040_s14 + $0x24] ss:$16 sps:$4 sm:$0xff]  }
  0xf0   :  { %v6203_v48 = vld [vmem:[%s8040_s14 + $0x68] ss:$16 sps:$4 sm:$0xff]   ;;  %v6211_v49 = vld [vmem:[%s8040_s14 + $0x4c] ss:$16 sps:$4 sm:$0xff]   ;;  %v6212_v53 = vld [vmem:[%s8040_s14 + $0x20] ss:$16 sps:$4 sm:$0xff]  }
  0xf1   :  { %5979 = vmatpush3.bf16.msra.mxu0 %v6176_v10  ;;  %v6209_v50 = vld [vmem:[%s8040_s14 + $0x48] ss:$16 sps:$4 sm:$0xff]   ;;  %v6217_v52 = vld [vmem:[%s8040_s14 + $0x2c] ss:$16 sps:$4 sm:$0xff]   ;;  %v6220_v55 = vld [vmem:[%s8040_s14 + $0x4] ss:$16 sps:$4 sm:$0xff]  }
  0xf2   :  { %5991 = vmatpush3.bf16.msra.mxu1 %v6180_v14  ;;  %5392 = vmatprep.subr.msk.bf16.mxu0 %vm477_vm2, %v5389_v20  ;;  %v6215_v54 = vld [vmem:[%s8040_s14 + $0x28] ss:$16 sps:$4 sm:$0xff]   ;;  %v6223_v56 = vld [vmem:[%s8040_s14 + $0xc] ss:$16 sps:$4 sm:$0xff]   ;;  %v6218_v57 = vld [vmem:[%s8040_s14] ss:$16 sps:$4 sm:$0xff]  }
  0xf3   :  { %5992 = vmatprep.subr.bf16.mxu1 %v7246_v0  ;;  %v6221_v58 = vld [vmem:[%s8040_s14 + $0x8] ss:$16 sps:$4 sm:$0xff]   ;;  %v6226_v60 = vld [vmem:[%s8041_s0 + $0x74] ss:$8 sps:$4 sm:$0xff]   ;;  %v6229_v10 = vld [vmem:[%s8041_s0 + $0x64] ss:$8 sps:$4 sm:$0xff]  }
  0xf4   :  { %5981 = vmatmul.mubr.msk.bf16.vlgmr.msra.gmra.mxu0 %vm368_vm3, %v346_v13  ;;  %v6247_v61 = vld [vmem:[%s8041_s0 + $0x174] ss:$8 sps:$4 sm:$0xff]   ;;  %v6224_v6 = vld [vmem:[%s8041_s0 + $0x70] ss:$8 sps:$4 sm:$0xff]   ;;  %v6253_v11 = vld [vmem:[%s8041_s0 + $0x164] ss:$8 sps:$4 sm:$0xff]  }
  0xf5   :  { %722 = vmatpush1.bf16.msra.mxu0 %v708_v25  ;;  %751 = vmatprep.mubr.bf16.mxu0 %v7248_v59  ;;  %v6245_v7 = vld [vmem:[%s8041_s0 + $0x170] ss:$8 sps:$4 sm:$0xff]   ;;  %v6227_v12 = vld [vmem:[%s8041_s0 + $0x60] ss:$8 sps:$4 sm:$0xff]   ;;  %v6232_v14 = vld [vmem:[%s8041_s0 + $0x54] ss:$8 sps:$4 sm:$0xff]  }
  0xf6   :  { %5993 = vmatpush3.bf16.msra.mxu1 %v6181_v15  ;;  %723 = vmatprep.subr.bf16.mxu0 %v6190_v23  ;;  %v6251_v13 = vld [vmem:[%s8041_s0 + $0x160] ss:$8 sps:$4 sm:$0xff]   ;;  %v6259_v15 = vld [vmem:[%s8041_s0 + $0x154] ss:$8 sps:$4 sm:$0xff]   ;;  %v6235_v18 = vld [vmem:[%s8041_s0 + $0x44] ss:$8 sps:$4 sm:$0xff]  }
  0xf7   :  { %5994 = vmatprep.subr.bf16.mxu1 %v7246_v0  ;;  %v6265_v19 = vld [vmem:[%s8041_s0 + $0x144] ss:$8 sps:$4 sm:$0xff]   ;;  %v6233_v20 = vld [vmem:[%s8041_s0 + $0x40] ss:$8 sps:$4 sm:$0xff]   ;;  %v6238_v22 = vld [vmem:[%s8041_s0 + $0x34] ss:$8 sps:$4 sm:$0xff]  }
  0xf8   :  { %v6271_v23 = vld [vmem:[%s8041_s0 + $0x134] ss:$8 sps:$4 sm:$0xff]   ;;  %v6269_v25 = vld [vmem:[%s8041_s0 + $0x130] ss:$8 sps:$4 sm:$0xff]   ;;  %v6248_v36 = vld [vmem:[%s8041_s0] ss:$8 sps:$4 sm:$0xff]  }
  0xf9   :  { %724 = vmatpush1.bf16.msra.mxu0 %v6188_v24  ;;  %v6236_v24 = vld [vmem:[%s8041_s0 + $0x30] ss:$8 sps:$4 sm:$0xff]   ;;  %s8046_s23 = sld [smem:[#allocation44_spill]] }
  0xfa   :  { %5995 = vmatpush3.bf16.msra.mxu1 %v6182_v16  ;;  %725 = vmatprep.subr.bf16.mxu0 %v6196_v26  ;;  %v6230_v16 = vld [vmem:[%s8041_s0 + $0x50] ss:$8 sps:$4 sm:$0xff]   ;;  %v6241_v26 = vld [vmem:[%s8041_s0 + $0x24] ss:$8 sps:$4 sm:$0xff]   ;;  %s8047_s26 = sld [smem:[#allocation45_spill]] }
  0xfb   :  { %5996 = vmatprep.subr.bf16.mxu1 %v7246_v0  ;;  %s8048_s6 = sld [smem:[#allocation46_spill]] }
  0xfc   :  { %s8049_s1 = sld [smem:[#allocation47_spill]] }
  0xfd   :  { %726 = vmatpush1.bf16.msra.mxu0 %v6194_v27  ;;  %v6277_v27 = vld [vmem:[%s8041_s0 + $0x124] ss:$8 sps:$4 sm:$0xff]   ;;  %s8050_s29 = sld [smem:[#allocation48_spill]] }
  0xfe   :  { %5997 = vmatpush3.bf16.msra.mxu1 %v6183_v17  ;;  %727 = vmatprep.subr.bf16.mxu0 %v6202_v28  ;;  %v6257_v17 = vld [vmem:[%s8041_s0 + $0x150] ss:$8 sps:$4 sm:$0xff]   ;;  %v6239_v28 = vld [vmem:[%s8041_s0 + $0x20] ss:$8 sps:$4 sm:$0xff]   ;;  %s8051_s17 = sld [smem:[#allocation49_spill]] }
  0xff   :  { %5394 = vmatprep.subr.msk.bf16.mxu1 %vm477_vm2, %v5391_v21  ;;  %v6263_v21 = vld [vmem:[%s8041_s0 + $0x140] ss:$8 sps:$4 sm:$0xff]  }
 0x101   :  { %728 = vmatpush1.bf16.msra.mxu0 %v6200_v29  ;;  %v6275_v29 = vld [vmem:[%s8041_s0 + $0x120] ss:$8 sps:$4 sm:$0xff]  }
 0x102   :  { %729 = vmatprep.subr.bf16.mxu0 %v6208_v30  ;;  %v6244_v30 = vld [vmem:[%s8041_s0 + $0x14] ss:$8 sps:$4 sm:$0xff]  }
 0x105   :  { %730 = vmatpush1.bf16.msra.mxu0 %v6206_v31  ;;  %v6283_v31 = vld [vmem:[%s8041_s0 + $0x114] ss:$8 sps:$4 sm:$0xff]  }
 0x106   :  { %731 = vmatprep.subr.bf16.mxu0 %v6214_v51  ;;  %v6295_v51 = vld [vmem:[%s8041_s0 + $0x194] ss:$8 sps:$4 sm:$0xff]  }
 0x109   :  { %732 = vmatpush1.bf16.msra.mxu0 %v6212_v53  ;;  %v6293_v53 = vld [vmem:[%s8041_s0 + $0x190] ss:$8 sps:$4 sm:$0xff]  }
 0x10a   :  { %733 = vmatprep.subr.bf16.mxu0 %v6220_v55  ;;  %v6301_v55 = vld [vmem:[%s8041_s0 + $0x184] ss:$8 sps:$4 sm:$0xff]  }
 0x10d   :  { %734 = vmatpush1.bf16.msra.mxu0 %v6218_v57  ;;  %v6299_v57 = vld [vmem:[%s8041_s0 + $0x180] ss:$8 sps:$4 sm:$0xff]  }
 0x10e   :  { %1134 = vmatprep.subr.bf16.mxu0 %v6226_v60  ;;  %v554_v60 = vlaneseq }
 0x1b4   :  { %v410_v33 = vpop.f32.mrf.mxu0 }
 0x1b5   :  { %v411_v34 = vadd.f32 %v410_v33, %v345_v32  ;;  %v6242_v32 = vld [vmem:[%s8041_s0 + $0x10] ss:$8 sps:$4 sm:$0xff]  }
 0x1b6   :  { %v5982_v35 = vpop.f32.mrf.mxu0  ;;  %v6281_v33 = vld [vmem:[%s8041_s0 + $0x110] ss:$8 sps:$4 sm:$0xff]  }
 0x1b7   :  { %vm416_vm4 = vcmp.ge.f32.partialorder %v411_v34, 0.0  ;;  %v417_v37 = vmul.f32 0.01, %v411_v34  ;;  %v6289_v35 = vld [vmem:[%s8041_s0 + $0x104] ss:$8 sps:$4 sm:$0xff]  }
 0x1b8   :  { %v413_v38 = vpop.f32.mrf.mxu0 }
 0x1b9   :  { %v418_v39 = vsel %vm416_vm4, %v411_v34, %v417_v37  ;;  %v6250_v34 = vld [vmem:[%s8041_s0 + $0x4] ss:$8 sps:$4 sm:$0xff]   ;;  %v6287_v37 = vld [vmem:[%s8041_s0 + $0x100] ss:$8 sps:$4 sm:$0xff]   ;;  %v6256_v38 = vld [vmem:[%s8041_s0 + $0xf4] ss:$8 sps:$4 sm:$0xff]  }
 0x1ba   :  { %v433_v40 = vpack.c.bf16 %v418_v39, %v418_v39  ;;  %v5983_v41 = vpop.f32.mrf.mxu0  ;;  %v6254_v39 = vld [vmem:[%s8041_s0 + $0xf0] ss:$8 sps:$4 sm:$0xff]   ;;  %vm1798_vm4 = vcmask 359424  }
 0x1bb   :  { %v6260_v41 = vld [vmem:[%s8041_s0 + $0xe0] ss:$8 sps:$4 sm:$0xff]  }
 0x1bc   :  { %5999 = vmatmul.mubr.msk.bf16.vlgmr.msra.gmra.mxu1 %vm473_vm5, %v433_v40  ;;  %v6262_v40 = vld [vmem:[%s8041_s0 + $0xe4] ss:$8 sps:$4 sm:$0xff]  }
 0x1bd   :  { %763 = vmatpush1.bf16.msra.mxu1 %v714_v42  ;;  %792 = vmatprep.mubr.bf16.mxu1 %v7248_v59  ;;  %v6268_v42 = vld [vmem:[%s8041_s0 + $0xd4] ss:$8 sps:$4 sm:$0xff]  }
 0x1be   :  { %764 = vmatprep.subr.bf16.mxu1 %v6193_v43  ;;  %v6266_v43 = vld [vmem:[%s8041_s0 + $0xd0] ss:$8 sps:$4 sm:$0xff]  }
 0x1c1   :  { %765 = vmatpush1.bf16.msra.mxu1 %v6191_v44  ;;  %v6274_v44 = vld [vmem:[%s8041_s0 + $0xc4] ss:$8 sps:$4 sm:$0xff]  }
 0x1c2   :  { %766 = vmatprep.subr.bf16.mxu1 %v6199_v45  ;;  %v6272_v45 = vld [vmem:[%s8041_s0 + $0xc0] ss:$8 sps:$4 sm:$0xff]  }
 0x1c5   :  { %767 = vmatpush1.bf16.msra.mxu1 %v6197_v46  ;;  %v6280_v46 = vld [vmem:[%s8041_s0 + $0xb4] ss:$8 sps:$4 sm:$0xff]  }
 0x1c6   :  { %768 = vmatprep.subr.bf16.mxu1 %v6205_v47  ;;  %v6278_v47 = vld [vmem:[%s8041_s0 + $0xb0] ss:$8 sps:$4 sm:$0xff]  }
 0x1c9   :  { %769 = vmatpush1.bf16.msra.mxu1 %v6203_v48  ;;  %v6286_v48 = vld [vmem:[%s8041_s0 + $0xa4] ss:$8 sps:$4 sm:$0xff]  }
 0x1ca   :  { %770 = vmatprep.subr.bf16.mxu1 %v6211_v49  ;;  %v6284_v49 = vld [vmem:[%s8041_s0 + $0xa0] ss:$8 sps:$4 sm:$0xff]  }
 0x1cd   :  { %771 = vmatpush1.bf16.msra.mxu1 %v6209_v50  ;;  %v6292_v50 = vld [vmem:[%s8041_s0 + $0x94] ss:$8 sps:$4 sm:$0xff]  }
 0x1ce   :  { %772 = vmatprep.subr.bf16.mxu1 %v6217_v52  ;;  %v6290_v52 = vld [vmem:[%s8041_s0 + $0x90] ss:$8 sps:$4 sm:$0xff]  }
 0x1d1   :  { %773 = vmatpush1.bf16.msra.mxu1 %v6215_v54  ;;  %v6298_v54 = vld [vmem:[%s8041_s0 + $0x84] ss:$8 sps:$4 sm:$0xff]  }
 0x1d2   :  { %774 = vmatprep.subr.bf16.mxu1 %v6223_v56  ;;  %v6296_v56 = vld [vmem:[%s8041_s0 + $0x80] ss:$8 sps:$4 sm:$0xff]  }
 0x1d5   :  { %775 = vmatpush1.bf16.msra.mxu1 %v6221_v58  ;;  %v6304_v58 = vld [vmem:[%s8042_s28 + $0x74] ss:$8 sps:$4 sm:$0xff]  }
 0x1d6   :  { %1175 = vmatprep.subr.bf16.mxu1 %v6247_v61  ;;  %v555_v61 = vshrl.u32 %v554_v60, 7  ;;  %v6360_v60 = vld [vmem:[%s8043_s19 + $0x44] ss:$8 sps:$4 sm:$0xff]  }
 0x27c   :  { %v515_v63 = vpop.f32.mrf.mxu1 }
 0x27d   :  { %v516_v1 = vadd.f32 %v515_v63, %v432_v62  ;;  %v7579_v62 = vsub.s32 0, %v555_v61  ;;  %v7581_v63 = vsub.s32 2, %v555_v61 }
 0x27e   :  { %v6000_v2 = vpop.f32.mrf.mxu1 }
 0x27f   :  { %vm521_vm6 = vcmp.ge.f32.partialorder %v516_v1, 0.0  ;;  %v522_v3 = vmul.f32 0.01, %v516_v1  ;;  %v7583_v2 = vsub.s32 1, %v555_v61 }
 0x280   :  { %v518_v4 = vpop.f32.mrf.mxu1 }
 0x281   :  { %v523_v5 = vsel %vm521_vm6, %v516_v1, %v522_v3  ;;  %v551_v1 = vld [vmem:[#allocation2 + $0x2] ss:$8 sm:$0xf]  ;;  %v568_v3 = vsub.s32 3, %v555_v61 }
 0x282   :  { %v552_v8 = vpack.c.bf16 %v523_v5, %v523_v5  ;;  %v6001_v9 = vpop.f32.mrf.mxu1  ;;  %v557_v4 = vrot.slane %v551_v1, %v7579_v62  ;;  %v565_v5 = vrot.slane %v551_v1, %v7581_v63  ;;  %v6358_v61 = vld [vmem:[%s8043_s19 + $0x40] ss:$8 sps:$4 sm:$0xff]  }
 0x284   :  { %5393 = vmatmul.mubr.msk.bf16.vlgmr.msra.gmra.mxu0 %vm473_vm5, %v552_v8  ;;  %5395 = vmatmul.mubr.msk.bf16.vlgmr.msra.gmra.mxu1 %vm473_vm5, %v552_v8 }
 0x285   :  { %1135 = vmatpush1.bf16.msra.mxu0 %v6224_v6  ;;  %1176 = vmatpush1.bf16.msra.mxu1 %v6245_v7  ;;  %v561_v6 = vrot.slane %v551_v1, %v7583_v2  ;;  %v569_v7 = vrot.slane %v551_v1, %v568_v3  ;;  %v6363_v1 = vld [vmem:[%s8043_s19 + $0x34] ss:$8 sps:$4 sm:$0xff]   ;;  %v6361_v3 = vld [vmem:[%s8043_s19 + $0x30] ss:$8 sps:$4 sm:$0xff]  }
 0x286   :  { %1136 = vmatprep.subr.bf16.mxu0 %v6229_v10  ;;  %1177 = vmatprep.subr.bf16.mxu1 %v6253_v11 }
 0x289   :  { %1137 = vmatpush1.bf16.msra.mxu0 %v6227_v12  ;;  %1178 = vmatpush1.bf16.msra.mxu1 %v6251_v13 }
 0x28a   :  { %1138 = vmatprep.subr.bf16.mxu0 %v6232_v14  ;;  %1179 = vmatprep.subr.bf16.mxu1 %v6259_v15 }
 0x28d   :  { %1139 = vmatpush1.bf16.msra.mxu0 %v6230_v16  ;;  %1180 = vmatpush1.bf16.msra.mxu1 %v6257_v17 }
 0x28e   :  { %1140 = vmatprep.subr.bf16.mxu0 %v6235_v18  ;;  %1181 = vmatprep.subr.bf16.mxu1 %v6265_v19 }
 0x291   :  { %1141 = vmatpush1.bf16.msra.mxu0 %v6233_v20  ;;  %1182 = vmatpush1.bf16.msra.mxu1 %v6263_v21  ;;  %v6302_v20 = vld [vmem:[%s8042_s28 + $0x70] ss:$8 sps:$4 sm:$0xff]  }
 0x292   :  { %1142 = vmatprep.subr.bf16.mxu0 %v6238_v22  ;;  %1183 = vmatprep.subr.bf16.mxu1 %v6271_v23 }
 0x295   :  { %1143 = vmatpush1.bf16.msra.mxu0 %v6236_v24  ;;  %1184 = vmatpush1.bf16.msra.mxu1 %v6269_v25  ;;  %v6307_v25 = vld [vmem:[%s8042_s28 + $0x64] ss:$8 sps:$4 sm:$0xff]  }
 0x296   :  { %1144 = vmatprep.subr.bf16.mxu0 %v6241_v26  ;;  %1185 = vmatprep.subr.bf16.mxu1 %v6277_v27  ;;  %v6305_v26 = vld [vmem:[%s8042_s28 + $0x60] ss:$8 sps:$4 sm:$0xff]   ;;  %v6310_v27 = vld [vmem:[%s8042_s28 + $0x54] ss:$8 sps:$4 sm:$0xff]  }
 0x299   :  { %1145 = vmatpush1.bf16.msra.mxu0 %v6239_v28  ;;  %1186 = vmatpush1.bf16.msra.mxu1 %v6275_v29  ;;  %v6308_v28 = vld [vmem:[%s8042_s28 + $0x50] ss:$8 sps:$4 sm:$0xff]   ;;  %v6313_v29 = vld [vmem:[%s8042_s28 + $0x44] ss:$8 sps:$4 sm:$0xff]  }
 0x29a   :  { %1146 = vmatprep.subr.bf16.mxu0 %v6244_v30  ;;  %1187 = vmatprep.subr.bf16.mxu1 %v6283_v31  ;;  %v6311_v30 = vld [vmem:[%s8042_s28 + $0x40] ss:$8 sps:$4 sm:$0xff]   ;;  %v6316_v31 = vld [vmem:[%s8042_s28 + $0x34] ss:$8 sps:$4 sm:$0xff]  }
 0x29d   :  { %1147 = vmatpush1.bf16.msra.mxu0 %v6242_v32  ;;  %1188 = vmatpush1.bf16.msra.mxu1 %v6281_v33  ;;  %v6314_v32 = vld [vmem:[%s8042_s28 + $0x30] ss:$8 sps:$4 sm:$0xff]   ;;  %v6319_v33 = vld [vmem:[%s8042_s28 + $0x24] ss:$8 sps:$4 sm:$0xff]  }
 0x29e   :  { %1148 = vmatprep.subr.bf16.mxu0 %v6250_v34  ;;  %1189 = vmatprep.subr.bf16.mxu1 %v6289_v35  ;;  %v6317_v34 = vld [vmem:[%s8042_s28 + $0x20] ss:$8 sps:$4 sm:$0xff]   ;;  %v6322_v35 = vld [vmem:[%s8042_s28 + $0x14] ss:$8 sps:$4 sm:$0xff]  }
 0x2a1   :  { %1149 = vmatpush1.bf16.msra.mxu0 %v6248_v36  ;;  %1190 = vmatpush1.bf16.msra.mxu1 %v6287_v37  ;;  %v6320_v36 = vld [vmem:[%s8042_s28 + $0x10] ss:$8 sps:$4 sm:$0xff]   ;;  %v6325_v37 = vld [vmem:[%s8042_s28 + $0x4] ss:$8 sps:$4 sm:$0xff]  }
 0x2a2   :  { %1150 = vmatprep.subr.bf16.mxu0 %v6256_v38  ;;  %1203 = vmatprep.subr.bf16.mxu1 %v6295_v51  ;;  %v6323_v38 = vld [vmem:[%s8042_s28] ss:$8 sps:$4 sm:$0xff]   ;;  %v6346_v51 = vld [vmem:[%s8042_s28 + $0x84] ss:$8 sps:$4 sm:$0xff]  }
 0x2a5   :  { %1151 = vmatpush2.bf16.msra.mxu0 %v6254_v39  ;;  %1204 = vmatpush2.bf16.msra.mxu1 %v6293_v53  ;;  %v6328_v39 = vld [vmem:[%s8042_s28 + $0xe4] ss:$8 sps:$4 sm:$0xff]   ;;  %v6349_v53 = vld [vmem:[%s8043_s19 + $0x70] ss:$8 sps:$4 sm:$0xff]  }
 0x2a6   :  { %1152 = vmatprep.subr.bf16.mxu0 %v6262_v40  ;;  %1205 = vmatprep.subr.bf16.mxu1 %v6301_v55  ;;  %v6326_v40 = vld [vmem:[%s8042_s28 + $0xe0] ss:$8 sps:$4 sm:$0xff]   ;;  %v6354_v55 = vld [vmem:[%s8043_s19 + $0x64] ss:$8 sps:$4 sm:$0xff]  }
 0x2a9   :  { %1153 = vmatpush2.bf16.msra.mxu0 %v6260_v41  ;;  %1206 = vmatpush2.bf16.msra.mxu1 %v6299_v57  ;;  %v6331_v41 = vld [vmem:[%s8042_s28 + $0xd4] ss:$8 sps:$4 sm:$0xff]  }
 0x2aa   :  { %1154 = vmatprep.subr.bf16.mxu0 %v6268_v42  ;;  %1421 = vmatprep.subr.bf16.mxu1 %v6304_v58  ;;  %v6329_v42 = vld [vmem:[%s8042_s28 + $0xd0] ss:$8 sps:$4 sm:$0xff]   ;;  %v6357_v57 = vld [vmem:[%s8043_s19 + $0x54] ss:$8 sps:$4 sm:$0xff]  }
 0x2ab   :  { %v6355_v58 = vld [vmem:[%s8043_s19 + $0x50] ss:$8 sps:$4 sm:$0xff]  }
 0x2ad   :  { %1155 = vmatpush2.bf16.msra.mxu0 %v6266_v43  ;;  %v6334_v43 = vld [vmem:[%s8042_s28 + $0xc4] ss:$8 sps:$4 sm:$0xff]  }
 0x2ae   :  { %1156 = vmatprep.subr.bf16.mxu0 %v6274_v44  ;;  %v6332_v44 = vld [vmem:[%s8042_s28 + $0xc0] ss:$8 sps:$4 sm:$0xff]  }
 0x2b1   :  { %1157 = vmatpush2.bf16.msra.mxu0 %v6272_v45  ;;  %v6337_v45 = vld [vmem:[%s8042_s28 + $0xb4] ss:$8 sps:$4 sm:$0xff]  }
 0x2b2   :  { %1158 = vmatprep.subr.bf16.mxu0 %v6280_v46  ;;  %v6335_v46 = vld [vmem:[%s8042_s28 + $0xb0] ss:$8 sps:$4 sm:$0xff]  }
 0x2b5   :  { %1159 = vmatpush2.bf16.msra.mxu0 %v6278_v47  ;;  %v6340_v47 = vld [vmem:[%s8042_s28 + $0xa4] ss:$8 sps:$4 sm:$0xff]  }
 0x2b6   :  { %1160 = vmatprep.subr.bf16.mxu0 %v6286_v48  ;;  %v6338_v48 = vld [vmem:[%s8042_s28 + $0xa0] ss:$8 sps:$4 sm:$0xff]  }
 0x2b9   :  { %1161 = vmatpush2.bf16.msra.mxu0 %v6284_v49  ;;  %v6343_v49 = vld [vmem:[%s8042_s28 + $0x94] ss:$8 sps:$4 sm:$0xff]  }
 0x2ba   :  { %1162 = vmatprep.subr.bf16.mxu0 %v6292_v50  ;;  %v6341_v50 = vld [vmem:[%s8042_s28 + $0x90] ss:$8 sps:$4 sm:$0xff]  }
 0x2bd   :  { %1163 = vmatpush2.bf16.msra.mxu0 %v6290_v52  ;;  %v6344_v52 = vld [vmem:[%s8042_s28 + $0x80] ss:$8 sps:$4 sm:$0xff]  }
 0x2be   :  { %1164 = vmatprep.subr.bf16.mxu0 %v6298_v54  ;;  %v6351_v54 = vld [vmem:[%s8043_s19 + $0x74] ss:$8 sps:$4 sm:$0xff]  }
 0x2c1   :  { %1165 = vmatpush2.bf16.msra.mxu0 %v6296_v56  ;;  %v6352_v56 = vld [vmem:[%s8043_s19 + $0x60] ss:$8 sps:$4 sm:$0xff]  }
 0x2c2   :  { %1666 = vmatprep.subr.bf16.mxu0 %v6351_v54  ;;  %v1253_v54 = vld [vmem:[#allocation2 + $0x4] ss:$8 sm:$0x3] }
 0x344   :  { %v753_v8 = vpop.f32.mrf.mxu0  ;;  %v794_v9 = vpop.f32.mrf.mxu1 }
 0x345   :  { %v754_v10 = vadd.f32 %v753_v8, %v557_v4  ;;  %v795_v11 = vadd.f32 %v794_v9, %v565_v5  ;;  %v6366_v4 = vld [vmem:[%s8043_s19 + $0x24] ss:$8 sps:$4 sm:$0xff]   ;;  %v6364_v5 = vld [vmem:[%s8043_s19 + $0x20] ss:$8 sps:$4 sm:$0xff]  }
 0x346   :  { %v755_v12 = vpop.f32.mrf.mxu0  ;;  %v796_v13 = vpop.f32.mrf.mxu1  ;;  %v6372_v8 = vld [vmem:[%s8043_s19 + $0x4] ss:$8 sps:$4 sm:$0xff]   ;;  %v6370_v9 = vld [vmem:[%s8043_s19] ss:$8 sps:$4 sm:$0xff]  }
 0x347   :  { %v756_v14 = vadd.f32 %v755_v12, %v561_v6  ;;  %v797_v15 = vadd.f32 %v796_v13, %v569_v7  ;;  %v855_v21 = vpack.c.bf16 %v754_v10, %v754_v10  ;;  %v857_v22 = vpack.c.bf16 %v795_v11, %v795_v11  ;;  %v6369_v6 = vld [vmem:[%s8043_s19 + $0x14] ss:$8 sps:$4 sm:$0xff]   ;;  %v6367_v7 = vld [vmem:[%s8043_s19 + $0x10] ss:$8 sps:$4 sm:$0xff]   ;;  %v6375_v10 = vld [vmem:[%s8043_s19 + $0xe4] ss:$8 sps:$4 sm:$0xff]  }
 0x348   :  { %v757_v16 = vpop.f32.mrf.mxu0  ;;  %v798_v17 = vpop.f32.mrf.mxu1  ;;  %v6373_v11 = vld [vmem:[%s8043_s19 + $0xe0] ss:$8 sps:$4 sm:$0xff]   ;;  %v6378_v12 = vld [vmem:[%s8043_s19 + $0xd4] ss:$8 sps:$4 sm:$0xff]   ;;  %v6376_v13 = vld [vmem:[%s8043_s19 + $0xd0] ss:$8 sps:$4 sm:$0xff]  }
 0x349   :  { %v856_v18 = vpack.c.bf16 %v756_v14, %v756_v14  ;;  %v858_v19 = vpack.c.bf16 %v797_v15, %v797_v15  ;;  %v6381_v14 = vld [vmem:[%s8043_s19 + $0xc4] ss:$8 sps:$4 sm:$0xff]   ;;  %v6379_v15 = vld [vmem:[%s8043_s19 + $0xc0] ss:$8 sps:$4 sm:$0xff]   ;;  %v6384_v16 = vld [vmem:[%s8043_s19 + $0xb4] ss:$8 sps:$4 sm:$0xff]  }
 0x34a   :  { %v758_v23 = vpop.f32.mrf.mxu0  ;;  %v799_v24 = vpop.f32.mrf.mxu1  ;;  %v6382_v17 = vld [vmem:[%s8043_s19 + $0xb0] ss:$8 sps:$4 sm:$0xff]  }
 0x34b   :  { %1166 = vmatprep.mubr.bf16.mxu0 %v856_v18  ;;  %5448 = vmatprep.mubr.msk.bf16.mxu1 %vm1130_vm7, %v858_v19  ;;  %v6387_v18 = vld [vmem:[%s8043_s19 + $0xa4] ss:$8 sps:$4 sm:$0xff]   ;;  %v6385_v19 = vld [vmem:[%s8043_s19 + $0xa0] ss:$8 sps:$4 sm:$0xff]  }
 0x34c   :  { %1167 = vmatmul.mubr.bf16.vlgmr.msra.gmra.mxu0 %v855_v21  ;;  %1208 = vmatmul.mubr.bf16.vlgmr.msra.gmra.mxu1 %v857_v22 }
 0x34d   :  { %1422 = vmatpush1.bf16.msra.mxu1 %v6302_v20  ;;  %1667 = vmatpush1.bf16.msra.mxu0 %v6349_v53  ;;  %v854_v20 = vld [vmem:[#allocation2 + $0x3] ss:$8 sm:$0x3] }
 0x34e   :  { %1423 = vmatprep.subr.bf16.mxu1 %v6307_v25  ;;  %1668 = vmatprep.subr.bf16.mxu0 %v6354_v55  ;;  %v863_v21 = vrot.slane %v854_v20, %v7579_v62  ;;  %v867_v22 = vrot.slane %v854_v20, %v7583_v2  ;;  %v6396_v53 = vld [vmem:[#allocation10] sm:$0xff]   ;;  %v1260_v55 = vrot.slane %v1253_v54, %v7579_v62 }
 0x351   :  { %1424 = vmatpush1.bf16.msra.mxu1 %v6305_v26  ;;  %1669 = vmatpush1.bf16.msra.mxu0 %v6352_v56  ;;  %v1264_v56 = vrot.slane %v1253_v54, %v7583_v2 }
 0x352   :  { %1425 = vmatprep.subr.bf16.mxu1 %v6310_v27  ;;  %1670 = vmatprep.subr.bf16.mxu0 %v6357_v57 }
 0x355   :  { %1426 = vmatpush1.bf16.msra.mxu1 %v6308_v28  ;;  %1671 = vmatpush1.bf16.msra.mxu0 %v6355_v58 }
 0x356   :  { %1427 = vmatprep.subr.bf16.mxu1 %v6313_v29  ;;  %1672 = vmatprep.subr.bf16.mxu0 %v6360_v60 }
 0x359   :  { %1428 = vmatpush1.bf16.msra.mxu1 %v6311_v30  ;;  %1673 = vmatpush1.bf16.msra.mxu0 %v6358_v61 }
 0x35a   :  { %1429 = vmatprep.subr.bf16.mxu1 %v6316_v31  ;;  %1674 = vmatprep.subr.bf16.mxu0 %v6363_v1 }
 0x35d   :  { %1430 = vmatpush1.bf16.msra.mxu1 %v6314_v32  ;;  %1675 = vmatpush1.bf16.msra.mxu0 %v6361_v3 }
 0x35e   :  { %1431 = vmatprep.subr.bf16.mxu1 %v6319_v33  ;;  %1676 = vmatprep.subr.bf16.mxu0 %v6366_v4 }
 0x361   :  { %1432 = vmatpush1.bf16.msra.mxu1 %v6317_v34  ;;  %1677 = vmatpush1.bf16.msra.mxu0 %v6364_v5 }
 0x362   :  { %1433 = vmatprep.subr.bf16.mxu1 %v6322_v35  ;;  %1678 = vmatprep.subr.bf16.mxu0 %v6369_v6 }
 0x365   :  { %1434 = vmatpush1.bf16.msra.mxu1 %v6320_v36  ;;  %1679 = vmatpush1.bf16.msra.mxu0 %v6367_v7  ;;  %v1711_v7 = vld [vmem:[#allocation2 + $0x6] ss:$0 sm:$0xff] }
 0x366   :  { %1435 = vmatprep.subr.bf16.mxu1 %v6325_v37  ;;  %1680 = vmatprep.subr.bf16.mxu0 %v6372_v8  ;;  %v6347_v37 = vld [vmem:[#allocation8 + $0x8] ss:$0 sps:$4 sm:$0x77]  }
 0x369   :  { %1436 = vmatpush1.bf16.msra.mxu1 %v6323_v38  ;;  %1681 = vmatpush1.bf16.msra.mxu0 %v6370_v9 }
 0x36a   :  { %1439 = vmatprep.subr.bf16.mxu1 %v6328_v39  ;;  %1684 = vmatprep.subr.bf16.mxu0 %v6375_v10 }
 0x36d   :  { %1440 = vmatpush2.bf16.msra.mxu1 %v6326_v40  ;;  %1685 = vmatpush2.bf16.msra.mxu0 %v6373_v11 }
 0x36e   :  { %1441 = vmatprep.subr.bf16.mxu1 %v6331_v41  ;;  %1686 = vmatprep.subr.bf16.mxu0 %v6378_v12 }
 0x371   :  { %1442 = vmatpush2.bf16.msra.mxu1 %v6329_v42  ;;  %1687 = vmatpush2.bf16.msra.mxu0 %v6376_v13  ;;  %v1728_v42 = vsel %vm1726_vm10, %v6347_v37, 0 }
 0x372   :  { %1443 = vmatprep.subr.bf16.mxu1 %v6334_v43  ;;  %1688 = vmatprep.subr.bf16.mxu0 %v6381_v14  ;;  %v6348_v43 = vld [vmem:[#allocation8] sm:$0xff]  }
 0x375   :  { %1444 = vmatpush2.bf16.msra.mxu1 %v6332_v44  ;;  %1689 = vmatpush2.bf16.msra.mxu0 %v6379_v15  ;;  %v1707_v44 = vld [vmem:[%s8044_s22] sm:$0x3] }
 0x376   :  { %1445 = vmatprep.subr.bf16.mxu1 %v6337_v45  ;;  %1690 = vmatprep.subr.bf16.mxu0 %v6384_v16  ;;  %v1712_v45 = vpack.c.bf16 %v1707_v44, %v1707_v44 }
 0x379   :  { %1446 = vmatpush2.bf16.msra.mxu1 %v6335_v46  ;;  %1691 = vmatpush2.bf16.msra.mxu0 %v6382_v17  ;;  %v6390_v46 = vld [vmem:[%s8043_s19 + $0x94] ss:$8 sps:$4 sm:$0xff]  }
 0x37a   :  { %1447 = vmatprep.subr.bf16.mxu1 %v6340_v47  ;;  %1692 = vmatprep.subr.bf16.mxu0 %v6387_v18  ;;  %v6388_v47 = vld [vmem:[%s8043_s19 + $0x90] ss:$8 sps:$4 sm:$0xff]  }
 0x37d   :  { %1448 = vmatpush2.bf16.msra.mxu1 %v6338_v48  ;;  %1693 = vmatpush2.bf16.msra.mxu0 %v6385_v19  ;;  %v6391_v48 = vld [vmem:[#allocation10 + $0x10] sm:$0x3f]  }
 0x37e   :  { %1449 = vmatprep.subr.bf16.mxu1 %v6343_v49  ;;  %1694 = vmatprep.subr.bf16.mxu0 %v6390_v46  ;;  %v1804_v49 = vsel %vm1802_vm13, %v6391_v48, 0  ;;  %v6397_v19 = vld [vmem:[%s8045_s18 + $0x10] sm:$0x3f]   ;;  %v6403_v48 = vld [vmem:[#allocation13 + $0x8] sm:$0xff]  }
 0x37f   :  { %v1878_v20 = vsel %vm1802_vm13, %v6397_v19, 0  ;;  %v6434_v19 = vld [vmem:[#allocation16 + $0x14] ss:$8 sps:$4 sm:$0xff]  }
 0x381   :  { %1450 = vmatpush2.bf16.msra.mxu1 %v6341_v50  ;;  %1695 = vmatpush2.bf16.msra.mxu0 %v6388_v47  ;;  %v6394_v50 = vld [vmem:[%s8043_s19 + $0x84] ss:$8 sps:$4 sm:$0xff]  }
 0x382   :  { %1451 = vmatprep.subr.bf16.mxu1 %v6346_v51  ;;  %v6392_v51 = vld [vmem:[%s8043_s19 + $0x80] ss:$8 sps:$4 sm:$0xff]   ;;  %1696 = vmatprep.subr.bf16.mxu0 %v6394_v50  ;;  %v6405_v50 = vld [vmem:[#allocation14 + $0x24] ss:$8 sps:$4 sm:$0x3f]  }
 0x385   :  { %1452 = vmatpush2.bf16.msra.mxu1 %v6344_v52  ;;  %v6395_v52 = vld [vmem:[#allocation10 + $0x8] sm:$0xff]   ;;  %1697 = vmatpush2.bf16.msra.mxu0 %v6392_v51  ;;  %v6407_v51 = vld [vmem:[#allocation14 + $0x20] ss:$8 sps:$4 sm:$0x3f]  }
 0x386   :  { %6002 = vmatprep.subr.bf16.mxu1 %v7246_v0  ;;  %6020 = vmatprep.subr.bf16.mxu0 %v7246_v0 }
 0x40c   :  { %v1168_v23 = vpop.f32.mrf.mxu0  ;;  %v1209_v24 = vpop.f32.mrf.mxu1 }
 0x40d   :  { %v1169_v25 = vadd.f32 %v1168_v23, %v863_v21  ;;  %v6398_v21 = vld [vmem:[%s8045_s18 + $0x8] sm:$0xff]   ;;  %v6400_v23 = vld [vmem:[#allocation11 + $0x8] ss:$0 sps:$4 sm:$0x77]  }
 0x40e   :  { %v1170_v26 = vpop.f32.mrf.mxu0  ;;  %v1211_v27 = vpop.f32.mrf.mxu1 }
 0x40f   :  { %v1210_v28 = vadd.f32 %v1209_v24, %v1169_v25  ;;  %v1171_v29 = vadd.f32 %v1170_v26, %v867_v22  ;;  %v6399_v22 = vld [vmem:[%s8045_s18] sm:$0xff]   ;;  %v1938_v24 = vsel %vm1726_vm10, %v6400_v23, 0  ;;  %v6440_v23 = vld [vmem:[#allocation16 + $0xa4] ss:$8 sps:$4 sm:$0xff]  }
 0x410   :  { %v1172_v30 = vpop.f32.mrf.mxu0  ;;  %v1213_v31 = vpop.f32.mrf.mxu1 }
 0x411   :  { %vm1216_vm8 = vcmp.ge.f32.partialorder %v1210_v28, 0.0  ;;  %v1218_v32 = vmul.f32 0.01, %v1210_v28  ;;  %v1212_v33 = vadd.f32 %v1211_v27, %v1171_v29  ;;  %v1779_v27 = vld [vmem:[#allocation2 + $0x7] ss:$0 sm:$0xff] }
 0x412   :  { %v1173_v34 = vpop.f32.mrf.mxu0  ;;  %v1214_v35 = vpop.f32.mrf.mxu1 }
 0x413   :  { %vm1217_vm9 = vcmp.ge.f32.partialorder %v1212_v33, 0.0  ;;  %v1219_v36 = vmul.f32 0.01, %v1212_v33  ;;  %v1220_v38 = vsel %vm1216_vm8, %v1210_v28, %v1218_v32  ;;  %vm2302_vm8 = vcmask 392192  }
 0x414   :  { %v1254_v41 = vpack.c.bf16 %v1220_v38, %v1220_v38  ;;  %v6401_v38 = vld [vmem:[#allocation11] sm:$0xff]  }
 0x415   :  { %v1221_v39 = vsel %vm1217_vm9, %v1212_v33, %v1219_v36 }
 0x416   :  { %v1255_v40 = vpack.c.bf16 %v1221_v39, %v1221_v39  ;;  %v6402_v39 = vld [vmem:[#allocation13 + $0x10] sm:$0x3f]  }
 0x418   :  { %5479 = vmatprep.mubr.msk.bf16.mxu1 %vm1417_vm11, %v1255_v40  ;;  %v2012_v40 = vsel %vm1802_vm13, %v6402_v39, 0  ;;  %v6444_v39 = vld [vmem:[#allocation16 + $0x80] ss:$8 sps:$4 sm:$0xff]  }
 0x419   :  { %1454 = vmatmul.mubr.bf16.vlgmr.msra.gmra.mxu1 %v1254_v41  ;;  %v1855_v41 = vld [vmem:[#allocation2 + $0x20] ss:$0 sm:$0xff] }
 0x41a   :  { %6003 = vmatpush3.bf16.msra.mxu1 %v1728_v42  ;;  %6006 = vmatprep.mubr.msk.bf16.mxu1 %vm7247_vm0, %v7246_v0 }
 0x41b   :  { %6004 = vmatprep.subr.bf16.mxu1 %v7246_v0 }
 0x41e   :  { %6005 = vmatpush3.bf16.msra.mxu1 %v6348_v43 }
 0x41f   :  { %6010 = vmatprep.subr.bf16.mxu1 %v7246_v0 }
 0x421   :  { %6007 = vmatmul.mubr.msk.bf16.vlgmr.msra.gmra.mxu1 %vm1722_vm12, %v1712_v45 }
 0x422   :  { %6016 = vmatprep.mubr.msk.bf16.mxu1 %vm7247_vm0, %v7246_v0  ;;  %6011 = vmatpush3.bf16.msra.mxu1 %v1804_v49  ;;  %v6404_v49 = vld [vmem:[#allocation13] sm:$0xff]  }
 0x423   :  { %6012 = vmatprep.subr.bf16.mxu1 %v7246_v0 }
 0x426   :  { %6013 = vmatpush3.bf16.msra.mxu1 %v6395_v52  ;;  %v2109_v52 = vsel %vm1802_vm13, %v6407_v51, 0  ;;  %v6462_v51 = vld [vmem:[#allocation17 + $0x20] ss:$8 sps:$4 sm:$0xff]  }
 0x427   :  { %6014 = vmatprep.subr.bf16.mxu1 %v7246_v0 }
 0x42a   :  { %6015 = vmatpush3.bf16.msra.mxu1 %v6396_v53  ;;  %v1923_v53 = vld [vmem:[#allocation2 + $0x21] ss:$0 sm:$0xff] }
 0x42b   :  { %6030 = vmatprep.subr.bf16.mxu1 %v7246_v0 }
 0x4d9   :  { %v1455_v57 = vpop.f32.mrf.mxu1 }
 0x4da   :  { %v1456_v58 = vadd.f32 %v1455_v57, %v1260_v55 }
 0x4db   :  { %v1457_v60 = vpop.f32.mrf.mxu1 }
 0x4dc   :  { %vm1462_vm14 = vcmp.ge.f32.partialorder %v1456_v58, 0.0  ;;  %v1464_v61 = vmul.f32 0.01, %v1456_v58  ;;  %v1458_v1 = vadd.f32 %v1457_v60, %v1264_v56 }
 0x4dd   :  { %v1459_v3 = vpop.f32.mrf.mxu1 }
 0x4de   :  { %vm1463_vm15 = vcmp.ge.f32.partialorder %v1458_v1, 0.0  ;;  %v1465_v4 = vmul.f32 0.01, %v1458_v1  ;;  %v1466_v5 = vsel %vm1462_vm14, %v1456_v58, %v1464_v61  ;;  %v6410_v3 = vld [vmem:[#allocation14 + $0x14] ss:$8 sps:$4 sm:$0xff]  }
 0x4df   :  { %v1460_v6 = vpop.f32.mrf.mxu1  ;;  %v1500_v11 = vpack.c.bf16 %v1466_v5, %v1466_v5  ;;  %v6413_v5 = vld [vmem:[#allocation14 + $0x4] ss:$8 sps:$4 sm:$0xff]  }
 0x4e0   :  { %v1467_v8 = vsel %vm1463_vm15, %v1458_v1, %v1465_v4  ;;  %v6408_v4 = vld [vmem:[#allocation14 + $0x10] ss:$8 sps:$4 sm:$0xff]   ;;  %v6411_v6 = vld [vmem:[#allocation14] ss:$8 sps:$4 sm:$0xff]  }
 0x4e1   :  { %v1501_v9 = vpack.c.bf16 %v1467_v8, %v1467_v8  ;;  %v1764_v10 = vpop.f32.mrf.mxu1  ;;  %v6416_v8 = vld [vmem:[#allocation16 + $0x74] ss:$8 sps:$4 sm:$0xff]  }
 0x4e2   :  { %v1765_v12 = vadd.f32 %v1764_v10, %v1711_v7  ;;  %v6414_v7 = vld [vmem:[#allocation16 + $0x70] ss:$8 sps:$4 sm:$0xff]   ;;  %v6417_v10 = vld [vmem:[#allocation16 + $0x60] ss:$8 sps:$4 sm:$0xff]  }
 0x4e3   :  { %5510 = vmatprep.mubr.msk.bf16.mxu0 %vm1417_vm11, %v1501_v9  ;;  %v6008_v13 = vpop.f32.mrf.mxu1  ;;  %v6419_v9 = vld [vmem:[#allocation16 + $0x64] ss:$8 sps:$4 sm:$0xff]  }
 0x4e4   :  { %vm1770_vm3 = vcmp.ge.f32.partialorder %v1765_v12, 0.0  ;;  %v1771_v14 = vmul.f32 0.01, %v1765_v12  ;;  %1699 = vmatmul.mubr.bf16.vlgmr.msra.gmra.mxu0 %v1500_v11  ;;  %v6422_v11 = vld [vmem:[#allocation16 + $0x54] ss:$8 sps:$4 sm:$0xff]  }
 0x4e5   :  { %v1767_v15 = vpop.f32.mrf.mxu1  ;;  %6026 = vmatprep.mubr.msk.bf16.mxu0 %vm7247_vm0, %v7246_v0  ;;  %6021 = vmatpush3.bf16.msra.mxu0 %v1878_v20  ;;  %v6425_v13 = vld [vmem:[#allocation16 + $0x44] ss:$8 sps:$4 sm:$0xff]   ;;  %v6432_v20 = vld [vmem:[#allocation16 + $0x10] ss:$8 sps:$4 sm:$0xff]  }
 0x4e6   :  { %v1772_v16 = vsel %vm1770_vm3, %v1765_v12, %v1771_v14  ;;  %6022 = vmatprep.subr.bf16.mxu0 %v7246_v0  ;;  %v6420_v12 = vld [vmem:[#allocation16 + $0x50] ss:$8 sps:$4 sm:$0xff]   ;;  %v6423_v14 = vld [vmem:[#allocation16 + $0x40] ss:$8 sps:$4 sm:$0xff]   ;;  %v6428_v15 = vld [vmem:[#allocation16 + $0x34] ss:$8 sps:$4 sm:$0xff]  }
 0x4e7   :  { %v1780_v17 = vpack.c.bf16 %v1772_v16, %v1772_v16  ;;  %v6009_v18 = vpop.f32.mrf.mxu1  ;;  %v6426_v16 = vld [vmem:[#allocation16 + $0x30] ss:$8 sps:$4 sm:$0xff]   ;;  %vm3148_vm3 = vcmask 523264  }
 0x4e8   :  { %v6429_v18 = vld [vmem:[#allocation16 + $0x20] ss:$8 sps:$4 sm:$0xff]  }
 0x4e9   :  { %6017 = vmatmul.mubr.msk.bf16.vlgmr.msra.gmra.mxu1 %vm1798_vm4, %v1780_v17  ;;  %6023 = vmatpush3.bf16.msra.mxu0 %v6398_v21  ;;  %v6431_v17 = vld [vmem:[#allocation16 + $0x24] ss:$8 sps:$4 sm:$0xff]  }
 0x4ea   :  { %6034 = vmatprep.mubr.msk.bf16.mxu1 %vm7247_vm0, %v7246_v0  ;;  %6024 = vmatprep.subr.bf16.mxu0 %v7246_v0  ;;  %v6437_v21 = vld [vmem:[#allocation16 + $0x4] ss:$8 sps:$4 sm:$0xff]  }
 0x4eb   :  { %6031 = vmatpush3.bf16.msra.mxu1 %v1938_v24  ;;  %v6438_v24 = vld [vmem:[#allocation16 + $0xa0] ss:$8 sps:$4 sm:$0xff]  }
 0x4ec   :  { %6032 = vmatprep.subr.bf16.mxu1 %v7246_v0 }
 0x4ed   :  { %6025 = vmatpush3.bf16.msra.mxu0 %v6399_v22  ;;  %v6435_v22 = vld [vmem:[#allocation16] ss:$8 sps:$4 sm:$0xff]  }
 0x4ee   :  { %6038 = vmatprep.subr.bf16.mxu0 %v7246_v0 }
 0x4ef   :  { %6033 = vmatpush3.bf16.msra.mxu1 %v6401_v38  ;;  %v6446_v38 = vld [vmem:[#allocation16 + $0x84] ss:$8 sps:$4 sm:$0xff]  }
 0x4f0   :  { %5535 = vmatprep.subr.msk.bf16.mxu1 %vm1802_vm13, %v6405_v50  ;;  %v6464_v50 = vld [vmem:[#allocation17 + $0x24] ss:$8 sps:$4 sm:$0xff]  }
 0x5a4   :  { %v7682_v25 = vpop.f32.mrf.mxu0 }
 0x5a6   :  { %v7684_v26 = vpop.f32.mrf.mxu0 }
 0x5a8   :  { %v1704_v28 = vpop.f32.mrf.mxu0 }
 0x5a9   :  { %v1840_v29 = vpop.f32.mrf.mxu1 }
 0x5aa   :  { %v1841_v30 = vadd.f32 %v1840_v29, %v1779_v27  ;;  %v1705_v31 = vpop.f32.mrf.mxu0  ;;  %v1989_v27 = vld [vmem:[#allocation2 + $0x22] ss:$0 sm:$0xff] }
 0x5ab   :  { %v6018_v32 = vpop.f32.mrf.mxu1 }
 0x5ac   :  { %vm1846_vm5 = vcmp.ge.f32.partialorder %v1841_v30, 0.0  ;;  %v1847_v33 = vmul.f32 0.01, %v1841_v30 }
 0x5ad   :  { %v1843_v34 = vpop.f32.mrf.mxu1 }
 0x5ae   :  { %v1848_v35 = vsel %vm1846_vm5, %v1841_v30, %v1847_v33 }
 0x5af   :  { %v1856_v36 = vpack.c.bf16 %v1848_v35, %v1848_v35  ;;  %v6019_v37 = vpop.f32.mrf.mxu1 }
 0x5b0   :  { %v6441_v37 = vld [vmem:[#allocation16 + $0x90] ss:$8 sps:$4 sm:$0xff]  }
 0x5b1   :  { %6027 = vmatmul.mubr.msk.bf16.vlgmr.msra.gmra.mxu0 %vm1798_vm4, %v1856_v36  ;;  %v6443_v36 = vld [vmem:[#allocation16 + $0x94] ss:$8 sps:$4 sm:$0xff]  }
 0x5b2   :  { %6044 = vmatprep.mubr.msk.bf16.mxu0 %vm7247_vm0, %v7246_v0  ;;  %6039 = vmatpush3.bf16.msra.mxu0 %v2012_v40  ;;  %v6447_v40 = vld [vmem:[#allocation17 + $0x70] ss:$8 sps:$4 sm:$0xff]  }
 0x5b3   :  { %6040 = vmatprep.subr.bf16.mxu0 %v7246_v0 }
 0x5b6   :  { %6041 = vmatpush3.bf16.msra.mxu0 %v6403_v48  ;;  %v6461_v48 = vld [vmem:[#allocation17 + $0x34] ss:$8 sps:$4 sm:$0xff]  }
 0x5b7   :  { %6042 = vmatprep.subr.bf16.mxu0 %v7246_v0 }
 0x5ba   :  { %6043 = vmatpush3.bf16.msra.mxu0 %v6404_v49  ;;  %v6459_v49 = vld [vmem:[#allocation17 + $0x30] ss:$8 sps:$4 sm:$0xff]  }
 0x5bb   :  { %2306 = vmatprep.subr.bf16.mxu0 %v6416_v8 }
 0x671   :  { %v1914_v42 = vpop.f32.mrf.mxu0 }
 0x672   :  { %v1915_v43 = vadd.f32 %v1914_v42, %v1855_v41  ;;  %v6449_v41 = vld [vmem:[#allocation17 + $0x74] ss:$8 sps:$4 sm:$0xff]   ;;  %v6452_v42 = vld [vmem:[#allocation17 + $0x64] ss:$8 sps:$4 sm:$0xff]  }
 0x673   :  { %v6028_v44 = vpop.f32.mrf.mxu0 }
 0x674   :  { %v1924_v45 = vpack.c.bf16 %v1915_v43, %v1915_v43  ;;  %v6450_v43 = vld [vmem:[#allocation17 + $0x60] ss:$8 sps:$4 sm:$0xff]   ;;  %v6455_v44 = vld [vmem:[#allocation17 + $0x54] ss:$8 sps:$4 sm:$0xff]  }
 0x675   :  { %v1917_v46 = vpop.f32.mrf.mxu0 }
 0x676   :  { %6035 = vmatmul.mubr.msk.bf16.vlgmr.msra.gmra.mxu1 %vm1722_vm12, %v1924_v45  ;;  %v6453_v45 = vld [vmem:[#allocation17 + $0x50] ss:$8 sps:$4 sm:$0xff]   ;;  %v6458_v46 = vld [vmem:[#allocation17 + $0x44] ss:$8 sps:$4 sm:$0xff]  }
 0x677   :  { %v6029_v47 = vpop.f32.mrf.mxu0  ;;  %2146 = vmatprep.mubr.bf16.mxu1 %v7248_v59  ;;  %2125 = vmatpush1.bf16.msra.mxu1 %v2109_v52  ;;  %v6467_v52 = vld [vmem:[#allocation17 + $0x14] ss:$8 sps:$4 sm:$0xff]  }
 0x678   :  { %2126 = vmatprep.subr.bf16.mxu1 %v6410_v3  ;;  %v6456_v47 = vld [vmem:[#allocation17 + $0x40] ss:$8 sps:$4 sm:$0xff]  }
 0x67b   :  { %2127 = vmatpush1.bf16.msra.mxu1 %v6408_v4 }
 0x67c   :  { %2128 = vmatprep.subr.bf16.mxu1 %v6413_v5 }
 0x67f   :  { %2129 = vmatpush1.bf16.msra.mxu1 %v6411_v6 }
 0x680   :  { %2503 = vmatprep.subr.bf16.mxu1 %v6449_v41 }
 0x736   :  { %v1974_v54 = vpop.f32.mrf.mxu1 }
 0x737   :  { %v1975_v55 = vadd.f32 %v1974_v54, %v1923_v53  ;;  %v6465_v53 = vld [vmem:[#allocation17 + $0x10] ss:$8 sps:$4 sm:$0xff]   ;;  %v6470_v54 = vld [vmem:[#allocation17 + $0x4] ss:$8 sps:$4 sm:$0xff]  }
 0x738   :  { %v6036_v56 = vpop.f32.mrf.mxu1 }
 0x739   :  { %vm1980_vm6 = vcmp.ge.f32.partialorder %v1975_v55, 0.0  ;;  %v1981_v57 = vmul.f32 0.01, %v1975_v55  ;;  %v6473_v56 = vld [vmem:[#allocation17 + $0xa4] ss:$8 sps:$4 sm:$0xff]  }
 0x73a   :  { %v1977_v58 = vpop.f32.mrf.mxu1 }
 0x73b   :  { %v1982_v60 = vsel %vm1980_vm6, %v1975_v55, %v1981_v57  ;;  %v6468_v55 = vld [vmem:[#allocation17] ss:$8 sps:$4 sm:$0xff]  }
 0x73c   :  { %v1990_v61 = vpack.c.bf16 %v1982_v60, %v1982_v60  ;;  %v6037_v1 = vpop.f32.mrf.mxu1  ;;  %v6471_v57 = vld [vmem:[#allocation17 + $0xa0] ss:$8 sps:$4 sm:$0xff]  }
 0x73d   :  { %v2064_v58 = vld [vmem:[#allocation2 + $0x23] ss:$8 sm:$0x3] }
 0x73e   :  { %6045 = vmatmul.mubr.msk.bf16.vlgmr.msra.gmra.mxu0 %vm1798_vm4, %v1990_v61  ;;  %v2070_v60 = vrot.slane %v2064_v58, %v7579_v62  ;;  %v2074_v61 = vrot.slane %v2064_v58, %v7583_v2  ;;  %v6519_v58 = vld [vmem:[#allocation20 + $0x50] ss:$8 sps:$4 sm:$0xff]  }
 0x73f   :  { %2307 = vmatpush1.bf16.msra.mxu0 %v6414_v7 }
 0x740   :  { %2308 = vmatprep.subr.bf16.mxu0 %v6419_v9 }
 0x743   :  { %2309 = vmatpush1.bf16.msra.mxu0 %v6417_v10  ;;  %v6476_v10 = vld [vmem:[#allocation17 + $0x94] ss:$8 sps:$4 sm:$0xff]  }
 0x744   :  { %2310 = vmatprep.subr.bf16.mxu0 %v6422_v11  ;;  %v6474_v11 = vld [vmem:[#allocation17 + $0x90] ss:$8 sps:$4 sm:$0xff]  }
 0x747   :  { %2311 = vmatpush1.bf16.msra.mxu0 %v6420_v12  ;;  %v6479_v12 = vld [vmem:[#allocation17 + $0x84] ss:$8 sps:$4 sm:$0xff]  }
 0x748   :  { %2312 = vmatprep.subr.bf16.mxu0 %v6425_v13  ;;  %v6477_v13 = vld [vmem:[#allocation17 + $0x80] ss:$8 sps:$4 sm:$0xff]  }
 0x74b   :  { %2313 = vmatpush1.bf16.msra.mxu0 %v6423_v14  ;;  %v6480_v14 = vld [vmem:[#allocation19 + $0x70] ss:$8 sps:$4 sm:$0xff]  }
 0x74c   :  { %2314 = vmatprep.subr.bf16.mxu0 %v6428_v15  ;;  %v6482_v15 = vld [vmem:[#allocation19 + $0x74] ss:$8 sps:$4 sm:$0xff]  }
 0x74f   :  { %2315 = vmatpush1.bf16.msra.mxu0 %v6426_v16  ;;  %v6485_v16 = vld [vmem:[#allocation19 + $0x64] ss:$8 sps:$4 sm:$0xff]  }
 0x750   :  { %2316 = vmatprep.subr.bf16.mxu0 %v6431_v17  ;;  %v6483_v17 = vld [vmem:[#allocation19 + $0x60] ss:$8 sps:$4 sm:$0xff]  }
 0x753   :  { %2317 = vmatpush1.bf16.msra.mxu0 %v6429_v18  ;;  %v6488_v18 = vld [vmem:[#allocation19 + $0x54] ss:$8 sps:$4 sm:$0xff]  }
 0x754   :  { %2318 = vmatprep.subr.bf16.mxu0 %v6434_v19  ;;  %v6486_v19 = vld [vmem:[#allocation19 + $0x50] ss:$8 sps:$4 sm:$0xff]  }
 0x757   :  { %2319 = vmatpush1.bf16.msra.mxu0 %v6432_v20  ;;  %v6491_v20 = vld [vmem:[#allocation19 + $0x44] ss:$8 sps:$4 sm:$0xff]  }
 0x758   :  { %2320 = vmatprep.subr.bf16.mxu0 %v6437_v21  ;;  %v6489_v21 = vld [vmem:[#allocation19 + $0x40] ss:$8 sps:$4 sm:$0xff]  }
 0x75b   :  { %2321 = vmatpush1.bf16.msra.mxu0 %v6435_v22  ;;  %v6494_v22 = vld [vmem:[#allocation19 + $0x34] ss:$8 sps:$4 sm:$0xff]  }
 0x75c   :  { %2332 = vmatprep.subr.bf16.mxu0 %v6440_v23  ;;  %v6492_v23 = vld [vmem:[#allocation19 + $0x30] ss:$8 sps:$4 sm:$0xff]  }
 0x75f   :  { %2333 = vmatpush2.bf16.msra.mxu0 %v6438_v24  ;;  %v6497_v24 = vld [vmem:[#allocation19 + $0x24] ss:$8 sps:$4 sm:$0xff]  }
 0x760   :  { %2334 = vmatprep.subr.bf16.mxu0 %v6443_v36 }
 0x763   :  { %2335 = vmatpush2.bf16.msra.mxu0 %v6441_v37 }
 0x764   :  { %2336 = vmatprep.subr.bf16.mxu0 %v6446_v38 }
 0x767   :  { %2337 = vmatpush2.bf16.msra.mxu0 %v6444_v39 }
 0x768   :  { %2700 = vmatprep.subr.bf16.mxu0 %v6482_v15 }
 0x7fe   :  { %v2048_v28 = vpop.f32.mrf.mxu0 }
 0x7ff   :  { %v2049_v29 = vadd.f32 %v2048_v28, %v1989_v27  ;;  %v6495_v27 = vld [vmem:[#allocation19 + $0x20] ss:$8 sps:$4 sm:$0xff]   ;;  %v6500_v28 = vld [vmem:[#allocation19 + $0x14] ss:$8 sps:$4 sm:$0xff]  }
 0x800   :  { %v6046_v30 = vpop.f32.mrf.mxu0 }
 0x801   :  { %vm2054_vm7 = vcmp.ge.f32.partialorder %v2049_v29, 0.0  ;;  %v2055_v31 = vmul.f32 0.01, %v2049_v29  ;;  %v6503_v30 = vld [vmem:[#allocation19 + $0x4] ss:$8 sps:$4 sm:$0xff]  }
 0x802   :  { %v2051_v32 = vpop.f32.mrf.mxu0 }
 0x803   :  { %v2056_v33 = vsel %vm2054_vm7, %v2049_v29, %v2055_v31  ;;  %v6498_v29 = vld [vmem:[#allocation19 + $0x10] ss:$8 sps:$4 sm:$0xff]   ;;  %v6501_v31 = vld [vmem:[#allocation19] ss:$8 sps:$4 sm:$0xff]   ;;  %v6506_v32 = vld [vmem:[#allocation19 + $0xa4] ss:$8 sps:$4 sm:$0xff]  }
 0x804   :  { %v2065_v34 = vpack.c.bf16 %v2056_v33, %v2056_v33  ;;  %v6047_v35 = vpop.f32.mrf.mxu0  ;;  %v6504_v33 = vld [vmem:[#allocation19 + $0xa0] ss:$8 sps:$4 sm:$0xff]  }
 0x806   :  { %5536 = vmatmul.mubr.msk.bf16.vlgmr.msra.gmra.mxu1 %vm1798_vm4, %v2065_v34  ;;  %v2178_v34 = vld [vmem:[#allocation2 + $0x24] ss:$8 sm:$0x3] }
 0x807   :  { %2504 = vmatpush1.bf16.msra.mxu1 %v6447_v40  ;;  %v2185_v35 = vrot.slane %v2178_v34, %v7579_v62  ;;  %v2189_v36 = vrot.slane %v2178_v34, %v7583_v2  ;;  %v6547_v34 = vld [vmem:[%s8046_s23 + $0x38] sm:$0xff]  }
 0x808   :  { %2505 = vmatprep.subr.bf16.mxu1 %v6452_v42 }
 0x80b   :  { %2506 = vmatpush1.bf16.msra.mxu1 %v6450_v43 }
 0x80c   :  { %2507 = vmatprep.subr.bf16.mxu1 %v6455_v44 }
 0x80f   :  { %2508 = vmatpush1.bf16.msra.mxu1 %v6453_v45 }
 0x810   :  { %2509 = vmatprep.subr.bf16.mxu1 %v6458_v46 }
 0x813   :  { %2510 = vmatpush1.bf16.msra.mxu1 %v6456_v47 }
 0x814   :  { %2511 = vmatprep.subr.bf16.mxu1 %v6461_v48 }
 0x817   :  { %2512 = vmatpush1.bf16.msra.mxu1 %v6459_v49  ;;  %v6509_v49 = vld [vmem:[#allocation19 + $0x94] ss:$8 sps:$4 sm:$0xff]  }
 0x818   :  { %2513 = vmatprep.subr.bf16.mxu1 %v6464_v50  ;;  %v6507_v50 = vld [vmem:[#allocation19 + $0x90] ss:$8 sps:$4 sm:$0xff]  }
 0x81b   :  { %2514 = vmatpush1.bf16.msra.mxu1 %v6462_v51  ;;  %v6512_v51 = vld [vmem:[#allocation19 + $0x84] ss:$8 sps:$4 sm:$0xff]  }
 0x81c   :  { %2515 = vmatprep.subr.bf16.mxu1 %v6467_v52  ;;  %v6510_v52 = vld [vmem:[#allocation19 + $0x80] ss:$8 sps:$4 sm:$0xff]  }
 0x81f   :  { %2516 = vmatpush1.bf16.msra.mxu1 %v6465_v53  ;;  %v6513_v53 = vld [vmem:[#allocation20 + $0x70] ss:$8 sps:$4 sm:$0xff]  }
 0x820   :  { %2517 = vmatprep.subr.bf16.mxu1 %v6470_v54  ;;  %v6515_v54 = vld [vmem:[#allocation20 + $0x74] ss:$8 sps:$4 sm:$0xff]  }
 0x823   :  { %2518 = vmatpush1.bf16.msra.mxu1 %v6468_v55  ;;  %v6518_v55 = vld [vmem:[#allocation20 + $0x64] ss:$8 sps:$4 sm:$0xff]  }
 0x824   :  { %2529 = vmatprep.subr.bf16.mxu1 %v6473_v56  ;;  %v6516_v56 = vld [vmem:[#allocation20 + $0x60] ss:$8 sps:$4 sm:$0xff]  }
 0x827   :  { %2530 = vmatpush2.bf16.msra.mxu1 %v6471_v57  ;;  %v6521_v57 = vld [vmem:[#allocation20 + $0x54] ss:$8 sps:$4 sm:$0xff]  }
 0x828   :  { %2531 = vmatprep.subr.bf16.mxu1 %v6476_v10  ;;  %v6539_v10 = vld [vmem:[#allocation20 + $0xa4] ss:$8 sps:$4 sm:$0xff]  }
 0x82b   :  { %2532 = vmatpush2.bf16.msra.mxu1 %v6474_v11  ;;  %v6537_v11 = vld [vmem:[#allocation20 + $0xa0] ss:$8 sps:$4 sm:$0xff]  }
 0x82c   :  { %2533 = vmatprep.subr.bf16.mxu1 %v6479_v12  ;;  %v2376_v12 = vld [vmem:[#allocation2 + $0x25] ss:$8 sm:$0x3] }
 0x82f   :  { %2534 = vmatpush2.bf16.msra.mxu1 %v6477_v13  ;;  %v2383_v13 = vrot.slane %v2376_v12, %v7579_v62 }
 0x830   :  { %2893 = vmatprep.subr.bf16.mxu1 %v6515_v54 }
 0x8c6   :  { %v2148_v1 = vpop.f32.mrf.mxu1 }
 0x8c7   :  { %v2149_v3 = vadd.f32 %v2148_v1, %v2070_v60  ;;  %v6524_v60 = vld [vmem:[#allocation20 + $0x44] ss:$8 sps:$4 sm:$0xff]   ;;  %v6527_v1 = vld [vmem:[#allocation20 + $0x34] ss:$8 sps:$4 sm:$0xff]  }
 0x8c8   :  { %v2150_v4 = vpop.f32.mrf.mxu1 }
 0x8c9   :  { %v2151_v5 = vadd.f32 %v2150_v4, %v2074_v61  ;;  %v2179_v8 = vpack.c.bf16 %v2149_v3, %v2149_v3  ;;  %v6522_v61 = vld [vmem:[#allocation20 + $0x40] ss:$8 sps:$4 sm:$0xff]   ;;  %v6525_v3 = vld [vmem:[#allocation20 + $0x30] ss:$8 sps:$4 sm:$0xff]   ;;  %v6530_v4 = vld [vmem:[#allocation20 + $0x24] ss:$8 sps:$4 sm:$0xff]  }
 0x8ca   :  { %v2152_v6 = vpop.f32.mrf.mxu1 }
 0x8cb   :  { %v2180_v7 = vpack.c.bf16 %v2151_v5, %v2151_v5  ;;  %v6528_v5 = vld [vmem:[#allocation20 + $0x20] ss:$8 sps:$4 sm:$0xff]   ;;  %v6533_v6 = vld [vmem:[#allocation20 + $0x14] ss:$8 sps:$4 sm:$0xff]  }
 0x8cc   :  { %v2153_v9 = vpop.f32.mrf.mxu1 }
 0x8cd   :  { %5559 = vmatprep.mubr.msk.bf16.mxu0 %vm2302_vm8, %v2180_v7  ;;  %v6531_v7 = vld [vmem:[#allocation20 + $0x10] ss:$8 sps:$4 sm:$0xff]   ;;  %v6534_v9 = vld [vmem:[#allocation20] ss:$8 sps:$4 sm:$0xff]  }
 0x8ce   :  { %2339 = vmatmul.mubr.bf16.vlgmr.msra.gmra.mxu0 %v2179_v8  ;;  %v6536_v8 = vld [vmem:[#allocation20 + $0x4] ss:$8 sps:$4 sm:$0xff]  }
 0x8cf   :  { %2701 = vmatpush1.bf16.msra.mxu0 %v6480_v14  ;;  %v2387_v14 = vrot.slane %v2376_v12, %v7583_v2 }
 0x8d0   :  { %2702 = vmatprep.subr.bf16.mxu0 %v6485_v16 }
 0x8d3   :  { %2703 = vmatpush1.bf16.msra.mxu0 %v6483_v17 }
 0x8d4   :  { %2704 = vmatprep.subr.bf16.mxu0 %v6488_v18 }
 0x8d7   :  { %2705 = vmatpush1.bf16.msra.mxu0 %v6486_v19 }
 0x8d8   :  { %2706 = vmatprep.subr.bf16.mxu0 %v6491_v20 }
 0x8db   :  { %2707 = vmatpush1.bf16.msra.mxu0 %v6489_v21 }
 0x8dc   :  { %2708 = vmatprep.subr.bf16.mxu0 %v6494_v22 }
 0x8df   :  { %2709 = vmatpush1.bf16.msra.mxu0 %v6492_v23 }
 0x8e0   :  { %2710 = vmatprep.subr.bf16.mxu0 %v6497_v24 }
 0x8e3   :  { %2711 = vmatpush1.bf16.msra.mxu0 %v6495_v27 }
 0x8e4   :  { %2712 = vmatprep.subr.bf16.mxu0 %v6500_v28 }
 0x8e7   :  { %2713 = vmatpush1.bf16.msra.mxu0 %v6498_v29  ;;  %v6542_v29 = vld [vmem:[#allocation20 + $0x94] ss:$8 sps:$4 sm:$0xff]  }
 0x8e8   :  { %2714 = vmatprep.subr.bf16.mxu0 %v6503_v30  ;;  %v6540_v30 = vld [vmem:[#allocation20 + $0x90] ss:$8 sps:$4 sm:$0xff]  }
 0x8eb   :  { %2715 = vmatpush1.bf16.msra.mxu0 %v6501_v31  ;;  %v6545_v31 = vld [vmem:[#allocation20 + $0x84] ss:$8 sps:$4 sm:$0xff]  }
 0x8ec   :  { %2726 = vmatprep.subr.bf16.mxu0 %v6506_v32  ;;  %v6543_v32 = vld [vmem:[#allocation20 + $0x80] ss:$8 sps:$4 sm:$0xff]  }
 0x8ef   :  { %2727 = vmatpush2.bf16.msra.mxu0 %v6504_v33  ;;  %v6546_v33 = vld [vmem:[%s8046_s23 + $0x78] sm:$0xff]  }
 0x8f0   :  { %2728 = vmatprep.subr.bf16.mxu0 %v6509_v49 }
 0x8f3   :  { %2729 = vmatpush2.bf16.msra.mxu0 %v6507_v50 }
 0x8f4   :  { %2730 = vmatprep.subr.bf16.mxu0 %v6512_v51 }
 0x8f7   :  { %2731 = vmatpush2.bf16.msra.mxu0 %v6510_v52 }
 0x8f8   :  { %5899 = vmatprep.subr.bf16.mxu0 %v6546_v33  ;;  %v6173_v33 = vld [vmem:[#allocation22 + $0x8] ss:$0 sps:$4 sm:$0x33]  }
 0x98e   :  { %v2340_v37 = vpop.f32.mrf.mxu0 }
 0x98f   :  { %v2341_v38 = vadd.f32 %v2340_v37, %v2185_v35  ;;  %v6548_v35 = vld [vmem:[%s8046_s23 + $0x70] sm:$0xff]   ;;  %v6550_v37 = vld [vmem:[%s8046_s23 + $0x68] sm:$0xff]  }
 0x990   :  { %v2342_v39 = vpop.f32.mrf.mxu0 }
 0x991   :  { %vm2347_vm9 = vcmp.ge.f32.partialorder %v2341_v38, 0.0  ;;  %v2349_v40 = vmul.f32 0.01, %v2341_v38  ;;  %v2343_v41 = vadd.f32 %v2342_v39, %v2189_v36  ;;  %v6549_v36 = vld [vmem:[%s8046_s23 + $0x30] sm:$0xff]   ;;  %v6552_v39 = vld [vmem:[%s8046_s23 + $0x60] sm:$0xff]  }
 0x992   :  { %v2344_v42 = vpop.f32.mrf.mxu0 }
 0x993   :  { %vm2348_vm10 = vcmp.ge.f32.partialorder %v2343_v41, 0.0  ;;  %v2350_v43 = vmul.f32 0.01, %v2343_v41  ;;  %v2351_v44 = vsel %vm2347_vm9, %v2341_v38, %v2349_v40  ;;  %v6551_v38 = vld [vmem:[%s8046_s23 + $0x28] sm:$0xff]   ;;  %v6553_v40 = vld [vmem:[%s8046_s23 + $0x20] sm:$0xff]   ;;  %v6555_v42 = vld [vmem:[%s8046_s23 + $0x18] sm:$0xff]  }
 0x994   :  { %v2345_v45 = vpop.f32.mrf.mxu0  ;;  %v2377_v48 = vpack.c.bf16 %v2351_v44, %v2351_v44  ;;  %v2573_v44 = vld [vmem:[#allocation2 + $0x26] ss:$8 sm:$0x3] }
 0x995   :  { %v2352_v46 = vsel %vm2348_vm10, %v2343_v41, %v2350_v43  ;;  %v6554_v41 = vld [vmem:[%s8046_s23 + $0x58] sm:$0xff]   ;;  %v6556_v43 = vld [vmem:[%s8046_s23 + $0x50] sm:$0xff]   ;;  %v1499_v45 = vld [vmem:[#allocation2 + $0x5] ss:$8 sm:$0x3]  ;;  %v2584_v49 = vrot.slane %v2573_v44, %v7583_v2 }
 0x996   :  { %v2378_v47 = vpack.c.bf16 %v2352_v46, %v2352_v46  ;;  %v2580_v46 = vrot.slane %v2573_v44, %v7579_v62 }
 0x998   :  { %5582 = vmatprep.mubr.msk.bf16.mxu1 %vm2302_vm8, %v2378_v47  ;;  %v1506_v47 = vrot.slane %v1499_v45, %v7579_v62 }
 0x999   :  { %2536 = vmatmul.mubr.bf16.vlgmr.msra.gmra.mxu1 %v2377_v48  ;;  %v1510_v48 = vrot.slane %v1499_v45, %v7583_v2 }
 0x99a   :  { %2894 = vmatpush1.bf16.msra.mxu1 %v6513_v53  ;;  %v1701_v52 = vadd.f32 %v7682_v25, %v1506_v47  ;;  %v6557_v25 = vld [vmem:[%s8046_s23 + $0x10] sm:$0xff]  }
 0x99b   :  { %2895 = vmatprep.subr.bf16.mxu1 %v6518_v55  ;;  %v1703_v54 = vadd.f32 %v7684_v26, %v1510_v48  ;;  %v6559_v26 = vld [vmem:[%s8046_s23 + $0x8] sm:$0xff]  }
 0x99c   :  { %v6567_v48 = vld [vmem:[#allocation23 + $0x30] ss:$8 sps:$4 sm:$0xff]  }
 0x99e   :  { %2896 = vmatpush1.bf16.msra.mxu1 %v6516_v56 }
 0x99f   :  { %2897 = vmatprep.subr.bf16.mxu1 %v6521_v57 }
 0x9a2   :  { %2898 = vmatpush1.bf16.msra.mxu1 %v6519_v58 }
 0x9a3   :  { %2899 = vmatprep.subr.bf16.mxu1 %v6524_v60 }
 0x9a6   :  { %2900 = vmatpush1.bf16.msra.mxu1 %v6522_v61 }
 0x9a7   :  { %2901 = vmatprep.subr.bf16.mxu1 %v6527_v1 }
 0x9aa   :  { %2902 = vmatpush1.bf16.msra.mxu1 %v6525_v3  ;;  %v6558_v3 = vld [vmem:[%s8046_s23 + $0x48] sm:$0xff]  }
 0x9ab   :  { %2903 = vmatprep.subr.bf16.mxu1 %v6530_v4  ;;  %v6560_v4 = vld [vmem:[%s8046_s23 + $0x40] sm:$0xff]  }
 0x9ae   :  { %2904 = vmatpush1.bf16.msra.mxu1 %v6528_v5  ;;  %v6561_v5 = vld [vmem:[%s8046_s23] sm:$0xff]  }
 0x9af   :  { %2905 = vmatprep.subr.bf16.mxu1 %v6533_v6  ;;  %v6562_v6 = vld [vmem:[%s8047_s26 + $0x18] sm:$0xff]  }
 0x9b2   :  { %2906 = vmatpush1.bf16.msra.mxu1 %v6531_v7  ;;  %v2766_v7 = vld [vmem:[#allocation2 + $0x27] ss:$8 sm:$0x3] }
 0x9b3   :  { %2907 = vmatprep.subr.bf16.mxu1 %v6536_v8  ;;  %v2773_v8 = vrot.slane %v2766_v7, %v7579_v62 }
 0x9b6   :  { %2908 = vmatpush1.bf16.msra.mxu1 %v6534_v9  ;;  %v2777_v9 = vrot.slane %v2766_v7, %v7583_v2  ;;  %v6594_v7 = vld [vmem:[%s8048_s6 + $0x20] ss:$8 sps:$4 sm:$0xff]  }
 0x9b7   :  { %2919 = vmatprep.subr.bf16.mxu1 %v6539_v10 }
 0x9ba   :  { %2920 = vmatpush2.bf16.msra.mxu1 %v6537_v11 }
 0x9bb   :  { %2921 = vmatprep.subr.bf16.mxu1 %v6542_v29 }
 0x9be   :  { %2922 = vmatpush2.bf16.msra.mxu1 %v6540_v30 }
 0x9bf   :  { %2923 = vmatprep.subr.bf16.mxu1 %v6545_v31 }
 0x9c2   :  { %2924 = vmatpush2.bf16.msra.mxu1 %v6543_v32 }
 0x9c3   :  { %6048 = vmatprep.subr.bf16.mxu1 %v7246_v0 }
 0xa59   :  { %v2537_v15 = vpop.f32.mrf.mxu1 }
 0xa5a   :  { %v2538_v16 = vadd.f32 %v2537_v15, %v2383_v13 }
 0xa5b   :  { %v2539_v17 = vpop.f32.mrf.mxu1 }
 0xa5c   :  { %vm2544_vm11 = vcmp.ge.f32.partialorder %v2538_v16, 0.0  ;;  %v2546_v18 = vmul.f32 0.01, %v2538_v16  ;;  %v2540_v19 = vadd.f32 %v2539_v17, %v2387_v14 }
 0xa5d   :  { %v2541_v20 = vpop.f32.mrf.mxu1 }
 0xa5e   :  { %vm2545_vm12 = vcmp.ge.f32.partialorder %v2540_v19, 0.0  ;;  %v2547_v21 = vmul.f32 0.01, %v2540_v19  ;;  %v2548_v22 = vsel %vm2544_vm11, %v2538_v16, %v2546_v18 }
 0xa5f   :  { %v2542_v23 = vpop.f32.mrf.mxu1  ;;  %v2574_v28 = vpack.c.bf16 %v2548_v22, %v2548_v22  ;;  %v6563_v22 = vld [vmem:[%s8047_s26 + $0x10] sm:$0xff]  }
 0xa60   :  { %v2549_v24 = vsel %vm2545_vm12, %v2540_v19, %v2547_v21  ;;  %v6564_v23 = vld [vmem:[%s8047_s26 + $0x8] sm:$0xff]  }
 0xa61   :  { %v2575_v27 = vpack.c.bf16 %v2549_v24, %v2549_v24  ;;  %v6565_v24 = vld [vmem:[%s8047_s26] sm:$0xff]  }
 0xa63   :  { %5605 = vmatprep.mubr.msk.bf16.mxu0 %vm2302_vm8, %v2575_v27 }
 0xa64   :  { %2733 = vmatmul.mubr.bf16.vlgmr.msra.gmra.mxu0 %v2574_v28  ;;  %v2972_v28 = vld [vmem:[#allocation2 + $0x40] ss:$0 sm:$0xff] }
 0xa65   :  { %5900 = vmatpush3.bf16.msra.mxu0 %v6547_v34 }
 0xa66   :  { %5901 = vmatprep.subr.bf16.mxu0 %v6548_v35 }
 0xa69   :  { %5902 = vmatpush3.bf16.msra.mxu0 %v6549_v36 }
 0xa6a   :  { %5903 = vmatprep.subr.bf16.mxu0 %v6550_v37  ;;  %v3214_v37 = vsel %vm372_vm1, %v6173_v33, 0  ;;  %vm3209_vm1 = vcmask 162816  }
 0xa6d   :  { %5904 = vmatpush3.bf16.msra.mxu0 %v6551_v38 }
 0xa6e   :  { %5905 = vmatprep.subr.bf16.mxu0 %v6552_v39  ;;  %v6566_v39 = vld [vmem:[#allocation22] sm:$0xff]  }
 0xa71   :  { %5906 = vmatpush3.bf16.msra.mxu0 %v6553_v40  ;;  %v6569_v40 = vld [vmem:[#allocation23 + $0x34] ss:$8 sps:$4 sm:$0xff]  }
 0xa72   :  { %5907 = vmatprep.subr.bf16.mxu0 %v6554_v41  ;;  %v3122_v41 = vld [vmem:[#allocation2 + $0x41] ss:$0 sm:$0xff] }
 0xa75   :  { %5908 = vmatpush3.bf16.msra.mxu0 %v6555_v42 }
 0xa76   :  { %5909 = vmatprep.subr.bf16.mxu0 %v6556_v43 }
 0xa79   :  { %5910 = vmatpush3.bf16.msra.mxu0 %v6557_v25  ;;  %v6585_v25 = vld [vmem:[%s8048_s6 + $0x50] ss:$8 sps:$4 sm:$0xff]  }
 0xa7a   :  { %5911 = vmatprep.subr.bf16.mxu0 %v6558_v3  ;;  %v6590_v3 = vld [vmem:[%s8048_s6 + $0x44] ss:$8 sps:$4 sm:$0xff]  }
 0xa7d   :  { %5912 = vmatpush3.bf16.msra.mxu0 %v6559_v26  ;;  %v6588_v26 = vld [vmem:[%s8048_s6 + $0x40] ss:$8 sps:$4 sm:$0xff]  }
 0xa7e   :  { %5913 = vmatprep.subr.bf16.mxu0 %v6560_v4  ;;  %v6593_v4 = vld [vmem:[%s8048_s6 + $0x34] ss:$8 sps:$4 sm:$0xff]  }
 0xa81   :  { %5914 = vmatpush3.bf16.msra.mxu0 %v6561_v5  ;;  %v6591_v5 = vld [vmem:[%s8048_s6 + $0x30] ss:$8 sps:$4 sm:$0xff]  }
 0xb24   :  { %v2734_v50 = vpop.f32.mrf.mxu0 }
 0xb25   :  { %v2735_v51 = vadd.f32 %v2734_v50, %v2580_v46 }
 0xb26   :  { %v2736_v53 = vpop.f32.mrf.mxu0 }
 0xb27   :  { %v2737_v55 = vadd.f32 %v2736_v53, %v2584_v49  ;;  %v2741_v56 = vadd.f32 %v2735_v51, %v1701_v52  ;;  %v6572_v51 = vld [vmem:[#allocation23 + $0x24] ss:$8 sps:$4 sm:$0xff]   ;;  %v6570_v52 = vld [vmem:[#allocation23 + $0x20] ss:$8 sps:$4 sm:$0xff]   ;;  %v6575_v53 = vld [vmem:[#allocation23 + $0x14] ss:$8 sps:$4 sm:$0xff]  }
 0xb28   :  { %v2738_v57 = vpop.f32.mrf.mxu0 }
 0xb29   :  { %v2742_v58 = vadd.f32 %v2737_v55, %v1703_v54  ;;  %v2767_v1 = vpack.c.bf16 %v2741_v56, %v2741_v56  ;;  %v6573_v54 = vld [vmem:[#allocation23 + $0x10] ss:$8 sps:$4 sm:$0xff]   ;;  %v6578_v55 = vld [vmem:[#allocation23 + $0x4] ss:$8 sps:$4 sm:$0xff]   ;;  %v6576_v56 = vld [vmem:[#allocation23] ss:$8 sps:$4 sm:$0xff]  }
 0xb2a   :  { %v2739_v60 = vpop.f32.mrf.mxu0  ;;  %v6579_v57 = vld [vmem:[%s8048_s6 + $0x70] ss:$8 sps:$4 sm:$0xff]  }
 0xb2b   :  { %v2768_v61 = vpack.c.bf16 %v2742_v58, %v2742_v58  ;;  %v6581_v58 = vld [vmem:[%s8048_s6 + $0x74] ss:$8 sps:$4 sm:$0xff]   ;;  %v6584_v60 = vld [vmem:[%s8048_s6 + $0x64] ss:$8 sps:$4 sm:$0xff]  }
 0xb2c   :  { %3578 = vmatprep.subr.bf16.mxu0 %v6581_v58  ;;  %v6635_v58 = vld [vmem:[%s8049_s1 + $0x7c] ss:$12 sps:$4 sm:$0xff]  }
 0xb2d   :  { %5628 = vmatprep.mubr.msk.bf16.mxu1 %vm2302_vm8, %v2768_v61  ;;  %v6582_v61 = vld [vmem:[%s8048_s6 + $0x60] ss:$8 sps:$4 sm:$0xff]  }
 0xb2e   :  { %2926 = vmatmul.mubr.bf16.vlgmr.msra.gmra.mxu1 %v2767_v1  ;;  %v6587_v1 = vld [vmem:[%s8048_s6 + $0x54] ss:$8 sps:$4 sm:$0xff]  }
 0xb2f   :  { %6056 = vmatprep.mubr.msk.bf16.mxu1 %vm7247_vm0, %v7246_v0  ;;  %6049 = vmatpush3.bf16.msra.mxu1 %v6562_v6  ;;  %v6596_v6 = vld [vmem:[%s8048_s6 + $0x24] ss:$8 sps:$4 sm:$0xff]  }
 0xb30   :  { %6050 = vmatprep.subr.bf16.mxu1 %v7246_v0 }
 0xb33   :  { %6051 = vmatpush3.bf16.msra.mxu1 %v6563_v22  ;;  %v6620_v22 = vld [vmem:[%s8048_s6 + $0xa4] ss:$8 sps:$4 sm:$0xff]  }
 0xb34   :  { %6052 = vmatprep.subr.bf16.mxu1 %v7246_v0 }
 0xb37   :  { %6053 = vmatpush3.bf16.msra.mxu1 %v6564_v23  ;;  %v6618_v23 = vld [vmem:[%s8048_s6 + $0xa0] ss:$8 sps:$4 sm:$0xff]  }
 0xb38   :  { %6054 = vmatprep.subr.bf16.mxu1 %v7246_v0 }
 0xb3b   :  { %6055 = vmatpush3.bf16.msra.mxu1 %v6565_v24  ;;  %v3198_v24 = vld [vmem:[#allocation2 + $0x42] ss:$0 sm:$0xff] }
 0xb3c   :  { %6060 = vmatprep.subr.bf16.mxu1 %v7246_v0 }
 0xbee   :  { %v2927_v10 = vpop.f32.mrf.mxu1 }
 0xbef   :  { %v2928_v11 = vadd.f32 %v2927_v10, %v2773_v8  ;;  %v6599_v8 = vld [vmem:[%s8048_s6 + $0x14] ss:$8 sps:$4 sm:$0xff]   ;;  %v6602_v10 = vld [vmem:[%s8048_s6 + $0x4] ss:$8 sps:$4 sm:$0xff]  }
 0xbf0   :  { %v2929_v12 = vpop.f32.mrf.mxu1 }
 0xbf1   :  { %vm2934_vm13 = vcmp.ge.f32.partialorder %v2928_v11, 0.0  ;;  %v2936_v13 = vmul.f32 0.01, %v2928_v11  ;;  %v2930_v14 = vadd.f32 %v2929_v12, %v2777_v9  ;;  %v6597_v9 = vld [vmem:[%s8048_s6 + $0x10] ss:$8 sps:$4 sm:$0xff]  }
 0xbf2   :  { %v2931_v15 = vpop.f32.mrf.mxu1  ;;  %v6605_v12 = vld [vmem:[%s8048_s6 + $0xf4] ss:$8 sps:$4 sm:$0xff]  }
 0xbf3   :  { %vm2935_vm14 = vcmp.ge.f32.partialorder %v2930_v14, 0.0  ;;  %v2937_v16 = vmul.f32 0.01, %v2930_v14  ;;  %v2938_v17 = vsel %vm2934_vm13, %v2928_v11, %v2936_v13  ;;  %v6600_v11 = vld [vmem:[%s8048_s6] ss:$8 sps:$4 sm:$0xff]  }
 0xbf4   :  { %v2932_v18 = vpop.f32.mrf.mxu1  ;;  %v2973_v21 = vpack.c.bf16 %v2938_v17, %v2938_v17  ;;  %v6603_v13 = vld [vmem:[%s8048_s6 + $0xf0] ss:$8 sps:$4 sm:$0xff]   ;;  %v6606_v15 = vld [vmem:[%s8048_s6 + $0xe0] ss:$8 sps:$4 sm:$0xff]  }
 0xbf5   :  { %v2939_v19 = vsel %vm2935_vm14, %v2930_v14, %v2937_v16  ;;  %v6608_v14 = vld [vmem:[%s8048_s6 + $0xe4] ss:$8 sps:$4 sm:$0xff]   ;;  %v6611_v16 = vld [vmem:[%s8048_s6 + $0xd4] ss:$8 sps:$4 sm:$0xff]   ;;  %v6609_v17 = vld [vmem:[%s8048_s6 + $0xd0] ss:$8 sps:$4 sm:$0xff]  }
 0xbf6   :  { %v2974_v20 = vpack.c.bf16 %v2939_v19, %v2939_v19  ;;  %v6614_v18 = vld [vmem:[%s8048_s6 + $0xc4] ss:$8 sps:$4 sm:$0xff]   ;;  %v6612_v19 = vld [vmem:[%s8048_s6 + $0xc0] ss:$8 sps:$4 sm:$0xff]   ;;  %vm4431_vm14 = vcmask 785408  }
 0xbf8   :  { %3103 = vmatprep.mubr.bf16.mxu0 %v2974_v20  ;;  %v6617_v20 = vld [vmem:[%s8048_s6 + $0xb4] ss:$8 sps:$4 sm:$0xff]  }
 0xbf9   :  { %3104 = vmatmul.mubr.bf16.vlgmr.msra.gmra.mxu0 %v2973_v21  ;;  %v6615_v21 = vld [vmem:[%s8048_s6 + $0xb0] ss:$8 sps:$4 sm:$0xff]  }
 0xbfa   :  { %3579 = vmatpush1.bf16.msra.mxu0 %v6579_v57  ;;  %v6630_v57 = vld [vmem:[%s8049_s1 + $0x90] ss:$12 sps:$4 sm:$0xff]  }
 0xbfb   :  { %3580 = vmatprep.subr.bf16.mxu0 %v6584_v60  ;;  %v6633_v60 = vld [vmem:[%s8049_s1 + $0x78] ss:$12 sps:$4 sm:$0xff]  }
 0xbfe   :  { %3581 = vmatpush1.bf16.msra.mxu0 %v6582_v61  ;;  %v6638_v61 = vld [vmem:[%s8049_s1 + $0x64] ss:$12 sps:$4 sm:$0xff]  }
 0xbff   :  { %3582 = vmatprep.subr.bf16.mxu0 %v6587_v1  ;;  %v6636_v1 = vld [vmem:[%s8049_s1 + $0x60] ss:$12 sps:$4 sm:$0xff]  }
 0xc02   :  { %3583 = vmatpush1.bf16.msra.mxu0 %v6585_v25  ;;  %v6641_v25 = vld [vmem:[%s8049_s1 + $0x4c] ss:$12 sps:$4 sm:$0xff]  }
 0xc03   :  { %3584 = vmatprep.subr.bf16.mxu0 %v6590_v3  ;;  %v6639_v3 = vld [vmem:[%s8049_s1 + $0x48] ss:$12 sps:$4 sm:$0xff]  }
 0xc06   :  { %3585 = vmatpush1.bf16.msra.mxu0 %v6588_v26  ;;  %v6644_v26 = vld [vmem:[%s8049_s1 + $0x34] ss:$12 sps:$4 sm:$0xff]  }
 0xc07   :  { %3586 = vmatprep.subr.bf16.mxu0 %v6593_v4  ;;  %v6642_v4 = vld [vmem:[%s8049_s1 + $0x30] ss:$12 sps:$4 sm:$0xff]  }
 0xc0a   :  { %3587 = vmatpush1.bf16.msra.mxu0 %v6591_v5  ;;  %v6647_v5 = vld [vmem:[%s8049_s1 + $0x1c] ss:$12 sps:$4 sm:$0xff]  }
 0xc0b   :  { %3588 = vmatprep.subr.bf16.mxu0 %v6596_v6  ;;  %v6645_v6 = vld [vmem:[%s8049_s1 + $0x18] ss:$12 sps:$4 sm:$0xff]  }
 0xc0e   :  { %3589 = vmatpush1.bf16.msra.mxu0 %v6594_v7  ;;  %v6650_v7 = vld [vmem:[%s8049_s1 + $0x4] ss:$12 sps:$4 sm:$0xff]  }
 0xc0f   :  { %3590 = vmatprep.subr.bf16.mxu0 %v6599_v8  ;;  %v6648_v8 = vld [vmem:[%s8049_s1] ss:$12 sps:$4 sm:$0xff]  }
 0xc12   :  { %3591 = vmatpush1.bf16.msra.mxu0 %v6597_v9  ;;  %v6653_v9 = vld [vmem:[%s8049_s1 + $0xf4] ss:$12 sps:$4 sm:$0xff]  }
 0xc13   :  { %3592 = vmatprep.subr.bf16.mxu0 %v6602_v10  ;;  %v6651_v10 = vld [vmem:[%s8049_s1 + $0xf0] ss:$12 sps:$4 sm:$0xff]  }
 0xc16   :  { %3593 = vmatpush1.bf16.msra.mxu0 %v6600_v11  ;;  %v6656_v11 = vld [vmem:[%s8049_s1 + $0xdc] ss:$12 sps:$4 sm:$0xff]  }
 0xc17   :  { %3594 = vmatprep.subr.bf16.mxu0 %v6605_v12  ;;  %v6654_v12 = vld [vmem:[%s8049_s1 + $0xd8] ss:$12 sps:$4 sm:$0xff]  }
 0xc1a   :  { %3595 = vmatpush2.bf16.msra.mxu0 %v6603_v13  ;;  %v6659_v13 = vld [vmem:[%s8049_s1 + $0xc4] ss:$12 sps:$4 sm:$0xff]  }
 0xc1b   :  { %3596 = vmatprep.subr.bf16.mxu0 %v6608_v14  ;;  %v6657_v14 = vld [vmem:[%s8049_s1 + $0xc0] ss:$12 sps:$4 sm:$0xff]  }
 0xc1e   :  { %3597 = vmatpush2.bf16.msra.mxu0 %v6606_v15  ;;  %v6671_v15 = vld [vmem:[%s8050_s29 + $0xa8] ss:$12 sps:$4 sm:$0xff]  }
 0xc1f   :  { %3598 = vmatprep.subr.bf16.mxu0 %v6611_v16  ;;  %v6673_v16 = vld [vmem:[%s8050_s29 + $0xac] ss:$12 sps:$4 sm:$0xff]  }
 0xc22   :  { %3599 = vmatpush2.bf16.msra.mxu0 %v6609_v17  ;;  %v6676_v17 = vld [vmem:[%s8050_s29 + $0x94] ss:$12 sps:$4 sm:$0xff]  }
 0xc23   :  { %3600 = vmatprep.subr.bf16.mxu0 %v6614_v18  ;;  %v6674_v18 = vld [vmem:[%s8050_s29 + $0x90] ss:$12 sps:$4 sm:$0xff]  }
 0xc26   :  { %3601 = vmatpush2.bf16.msra.mxu0 %v6612_v19  ;;  %v6679_v19 = vld [vmem:[%s8050_s29 + $0x7c] ss:$12 sps:$4 sm:$0xff]  }
 0xc27   :  { %3602 = vmatprep.subr.bf16.mxu0 %v6617_v20  ;;  %v6677_v20 = vld [vmem:[%s8050_s29 + $0x78] ss:$12 sps:$4 sm:$0xff]  }
 0xc2a   :  { %3603 = vmatpush2.bf16.msra.mxu0 %v6615_v21  ;;  %v6682_v21 = vld [vmem:[%s8050_s29 + $0x64] ss:$12 sps:$4 sm:$0xff]  }
 0xc2b   :  { %3604 = vmatprep.subr.bf16.mxu0 %v6620_v22  ;;  %v6680_v22 = vld [vmem:[%s8050_s29 + $0x60] ss:$12 sps:$4 sm:$0xff]  }
 0xc2e   :  { %3605 = vmatpush2.bf16.msra.mxu0 %v6618_v23  ;;  %v6685_v23 = vld [vmem:[%s8050_s29 + $0x4c] ss:$12 sps:$4 sm:$0xff]  }
 0xcb9   :  { %v5915_v27 = vpop.f32.mrf.mxu0 }
 0xcbb   :  { %v5916_v29 = vpop.f32.mrf.mxu0 }
 0xcbc   :  { %v5917_v30 = vadd.f32 %v5916_v29, %v5915_v27 }
 0xcbd   :  { %v5918_v31 = vpop.f32.mrf.mxu0 }
 0xcbe   :  { %v3106_v32 = vadd.f32 %v5917_v30, %v2972_v28 }
 0xcbf   :  { %v5919_v34 = vpop.f32.mrf.mxu0 }
 0xcc0   :  { %vm3111_vm15 = vcmp.ge.f32.partialorder %v3106_v32, 0.0  ;;  %v3112_v35 = vmul.f32 0.01, %v3106_v32 }
 0xcc2   :  { %v3113_v36 = vsel %vm3111_vm15, %v3106_v32, %v3112_v35  ;;  %v6623_v35 = vld [vmem:[%s8048_s6 + $0x94] ss:$8 sps:$4 sm:$0xff]  }
 0xcc3   :  { %v3123_v38 = vpack.c.bf16 %v3113_v36, %v3113_v36  ;;  %v6621_v36 = vld [vmem:[%s8048_s6 + $0x90] ss:$8 sps:$4 sm:$0xff]   ;;  %3606 = vmatprep.subr.bf16.mxu0 %v6623_v35  ;;  %v6695_v35 = vld [vmem:[%s8050_s29 + $0x168] ss:$12 sps:$4 sm:$0xff]  }
 0xcc4   :  { %3607 = vmatpush2.bf16.msra.mxu0 %v6621_v36  ;;  %v6700_v36 = vld [vmem:[%s8050_s29 + $0x154] ss:$12 sps:$4 sm:$0xff]  }
 0xcc5   :  { %6057 = vmatmul.mubr.msk.bf16.vlgmr.msra.gmra.mxu1 %vm3148_vm3, %v3123_v38  ;;  %v6624_v38 = vld [vmem:[%s8048_s6 + $0x80] ss:$8 sps:$4 sm:$0xff]  }
 0xcc6   :  { %6061 = vmatpush3.bf16.msra.mxu1 %v3214_v37  ;;  %6064 = vmatprep.mubr.msk.bf16.mxu1 %vm7247_vm0, %v7246_v0  ;;  %v6626_v37 = vld [vmem:[%s8048_s6 + $0x84] ss:$8 sps:$4 sm:$0xff]  }
 0xcc7   :  { %6062 = vmatprep.subr.bf16.mxu1 %v7246_v0  ;;  %3608 = vmatprep.subr.bf16.mxu0 %v6626_v37 }
 0xcc8   :  { %3609 = vmatpush2.bf16.msra.mxu0 %v6624_v38  ;;  %v6698_v38 = vld [vmem:[%s8050_s29 + $0x150] ss:$12 sps:$4 sm:$0xff]  }
 0xcc9   :  { %4435 = vmatprep.subr.bf16.mxu0 %v6673_v16  ;;  %v6665_v16 = vld [vmem:[%s8049_s1 + $0x38] ss:$12 sps:$4 sm:$0xff]  }
 0xcca   :  { %6063 = vmatpush3.bf16.msra.mxu1 %v6566_v39  ;;  %v3268_v39 = vld [vmem:[#allocation2 + $0x43] ss:$8 sm:$0x3] }
 0xccb   :  { %3332 = vmatprep.subr.bf16.mxu1 %v6569_v40  ;;  %v3274_v40 = vrot.slane %v3268_v39, %v7579_v62 }
 0xd85   :  { %v3186_v42 = vpop.f32.mrf.mxu1 }
 0xd86   :  { %v3187_v43 = vadd.f32 %v3186_v42, %v3122_v41  ;;  %v3278_v41 = vrot.slane %v3268_v39, %v7583_v2 }
 0xd87   :  { %v6058_v44 = vpop.f32.mrf.mxu1 }
 0xd88   :  { %vm3192_vm4 = vcmp.ge.f32.partialorder %v3187_v43, 0.0  ;;  %v3193_v45 = vmul.f32 0.01, %v3187_v43 }
 0xd89   :  { %v3189_v46 = vpop.f32.mrf.mxu1 }
 0xd8a   :  { %v3194_v47 = vsel %vm3192_vm4, %v3187_v43, %v3193_v45 }
 0xd8b   :  { %v3199_v49 = vpack.c.bf16 %v3194_v47, %v3194_v47  ;;  %v6059_v50 = vpop.f32.mrf.mxu1 }
 0xd8d   :  { %6065 = vmatmul.mubr.msk.bf16.vlgmr.msra.gmra.mxu1 %vm3209_vm1, %v3199_v49  ;;  %vm5296_vm1 = vcmask 82944  }
 0xd8e   :  { %3333 = vmatpush1.bf16.msra.mxu1 %v6567_v48  ;;  %3356 = vmatprep.mubr.bf16.mxu1 %v7248_v59 }
 0xd8f   :  { %3334 = vmatprep.subr.bf16.mxu1 %v6572_v51 }
 0xd92   :  { %3335 = vmatpush1.bf16.msra.mxu1 %v6570_v52 }
 0xd93   :  { %3336 = vmatprep.subr.bf16.mxu1 %v6575_v53 }
 0xd96   :  { %3337 = vmatpush1.bf16.msra.mxu1 %v6573_v54  ;;  %v6629_v54 = vld [vmem:[%s8049_s1 + $0xac] ss:$12 sps:$4 sm:$0xff]  }
 0xd97   :  { %3338 = vmatprep.subr.bf16.mxu1 %v6578_v55  ;;  %v6627_v55 = vld [vmem:[%s8049_s1 + $0xa8] ss:$12 sps:$4 sm:$0xff]  }
 0xd9a   :  { %3339 = vmatpush1.bf16.msra.mxu1 %v6576_v56  ;;  %v6632_v56 = vld [vmem:[%s8049_s1 + $0x94] ss:$12 sps:$4 sm:$0xff]  }
 0xd9b   :  { %3880 = vmatprep.subr.bf16.mxu1 %v6629_v54 }
 0xe4d   :  { %v3250_v27 = vpop.f32.mrf.mxu1 }
 0xe4e   :  { %v3251_v28 = vadd.f32 %v3250_v27, %v3198_v24  ;;  %v6683_v24 = vld [vmem:[%s8050_s29 + $0x48] ss:$12 sps:$4 sm:$0xff]  }
 0xe4f   :  { %v6066_v29 = vpop.f32.mrf.mxu1  ;;  %v6688_v27 = vld [vmem:[%s8050_s29 + $0x34] ss:$12 sps:$4 sm:$0xff]  }
 0xe50   :  { %vm3256_vm5 = vcmp.ge.f32.partialorder %v3251_v28, 0.0  ;;  %v3257_v30 = vmul.f32 0.01, %v3251_v28  ;;  %v6691_v29 = vld [vmem:[%s8050_s29 + $0x1c] ss:$12 sps:$4 sm:$0xff]  }
 0xe51   :  { %v3253_v31 = vpop.f32.mrf.mxu1 }
 0xe52   :  { %v3258_v32 = vsel %vm3256_vm5, %v3251_v28, %v3257_v30  ;;  %v6686_v28 = vld [vmem:[%s8050_s29 + $0x30] ss:$12 sps:$4 sm:$0xff]   ;;  %v6689_v30 = vld [vmem:[%s8050_s29 + $0x18] ss:$12 sps:$4 sm:$0xff]  }
 0xe53   :  { %v3269_v33 = vpack.c.bf16 %v3258_v32, %v3258_v32  ;;  %v6067_v34 = vpop.f32.mrf.mxu1  ;;  %v6694_v31 = vld [vmem:[%s8050_s29 + $0x4] ss:$12 sps:$4 sm:$0xff]   ;;  %v6692_v32 = vld [vmem:[%s8050_s29] ss:$12 sps:$4 sm:$0xff]  }
 0xe54   :  { %v3404_v34 = vld [vmem:[#allocation2 + $0x44] ss:$8 sm:$0x3] }
 0xe55   :  { %5661 = vmatmul.mubr.msk.bf16.vlgmr.msra.gmra.mxu1 %vm3148_vm3, %v3269_v33  ;;  %v6697_v33 = vld [vmem:[%s8050_s29 + $0x16c] ss:$12 sps:$4 sm:$0xff]   ;;  %v3411_v37 = vrot.slane %v3404_v34, %v7579_v62  ;;  %v3415_v39 = vrot.slane %v3404_v34, %v7583_v2  ;;  %v6733_v34 = vld [vmem:[%s8050_s29 + $0x1b4] ss:$12 sps:$4 sm:$0xff]  }
 0xe56   :  { %3881 = vmatpush1.bf16.msra.mxu1 %v6627_v55  ;;  %v6709_v55 = vld [vmem:[%s8050_s29 + $0x10c] ss:$12 sps:$4 sm:$0xff]  }
 0xe57   :  { %3882 = vmatprep.subr.bf16.mxu1 %v6632_v56 }
 0xe5a   :  { %3883 = vmatpush1.bf16.msra.mxu1 %v6630_v57  ;;  %v6707_v57 = vld [vmem:[%s8050_s29 + $0x108] ss:$12 sps:$4 sm:$0xff]  }
 0xe5b   :  { %3884 = vmatprep.subr.bf16.mxu1 %v6635_v58  ;;  %v6712_v58 = vld [vmem:[%s8050_s29 + $0xf4] ss:$12 sps:$4 sm:$0xff]  }
 0xe5e   :  { %3885 = vmatpush1.bf16.msra.mxu1 %v6633_v60  ;;  %v6710_v60 = vld [vmem:[%s8050_s29 + $0xf0] ss:$12 sps:$4 sm:$0xff]  }
 0xe5f   :  { %3886 = vmatprep.subr.bf16.mxu1 %v6638_v61 }
 0xe62   :  { %3887 = vmatpush1.bf16.msra.mxu1 %v6636_v1 }
 0xe63   :  { %3888 = vmatprep.subr.bf16.mxu1 %v6641_v25 }
 0xe66   :  { %3889 = vmatpush1.bf16.msra.mxu1 %v6639_v3 }
 0xe67   :  { %3890 = vmatprep.subr.bf16.mxu1 %v6644_v26 }
 0xe6a   :  { %3891 = vmatpush1.bf16.msra.mxu1 %v6642_v4 }
 0xe6b   :  { %3892 = vmatprep.subr.bf16.mxu1 %v6647_v5 }
 0xe6e   :  { %3893 = vmatpush1.bf16.msra.mxu1 %v6645_v6 }
 0xe6f   :  { %3894 = vmatprep.subr.bf16.mxu1 %v6650_v7 }
 0xe72   :  { %3895 = vmatpush1.bf16.msra.mxu1 %v6648_v8 }
 0xe73   :  { %3906 = vmatprep.subr.bf16.mxu1 %v6653_v9 }
 0xe76   :  { %3907 = vmatpush2.bf16.msra.mxu1 %v6651_v10  ;;  %v6660_v10 = vld [vmem:[%s8049_s1 + $0xb0] ss:$12 sps:$4 sm:$0xff]  }
 0xe77   :  { %3908 = vmatprep.subr.bf16.mxu1 %v6656_v11 }
 0xe7a   :  { %3909 = vmatpush2.bf16.msra.mxu1 %v6654_v12  ;;  %v6661_v12 = vld [vmem:[%s8049_s1 + $0x98] ss:$12 sps:$4 sm:$0xff]  }
 0xe7b   :  { %3910 = vmatprep.subr.bf16.mxu1 %v6659_v13  ;;  %v6662_v13 = vld [vmem:[%s8049_s1 + $0x80] ss:$12 sps:$4 sm:$0xff]  }
 0xe7e   :  { %3911 = vmatpush2.bf16.msra.mxu1 %v6657_v14  ;;  %v6663_v14 = vld [vmem:[%s8049_s1 + $0x68] ss:$12 sps:$4 sm:$0xff]  }
 0xe7f   :  { %3921 = vmatprep.subr.bf16.mxu1 %v7248_v59 }
 0xf15   :  { %v3358_v42 = vpop.f32.mrf.mxu1 }
 0xf16   :  { %v3359_v43 = vadd.f32 %v3358_v42, %v3274_v40  ;;  %v6703_v40 = vld [vmem:[%s8050_s29 + $0x13c] ss:$12 sps:$4 sm:$0xff]  }
 0xf17   :  { %v3360_v44 = vpop.f32.mrf.mxu1 }
 0xf18   :  { %vm3365_vm6 = vcmp.ge.f32.partialorder %v3359_v43, 0.0  ;;  %v3367_v45 = vmul.f32 0.01, %v3359_v43  ;;  %v3361_v46 = vadd.f32 %v3360_v44, %v3278_v41  ;;  %v6701_v44 = vld [vmem:[%s8050_s29 + $0x138] ss:$12 sps:$4 sm:$0xff]  }
 0xf19   :  { %v3362_v47 = vpop.f32.mrf.mxu1 }
 0xf1a   :  { %vm3366_vm7 = vcmp.ge.f32.partialorder %v3361_v46, 0.0  ;;  %v3368_v48 = vmul.f32 0.01, %v3361_v46  ;;  %v3369_v49 = vsel %vm3365_vm6, %v3359_v43, %v3367_v45  ;;  %v6706_v47 = vld [vmem:[%s8050_s29 + $0x124] ss:$12 sps:$4 sm:$0xff]  }
 0xf1b   :  { %v3363_v50 = vpop.f32.mrf.mxu1  ;;  %v3405_v53 = vpack.c.bf16 %v3369_v49, %v3369_v49 }
 0xf1c   :  { %v3370_v51 = vsel %vm3366_vm7, %v3361_v46, %v3368_v48 }
 0xf1d   :  { %v3406_v52 = vpack.c.bf16 %v3370_v51, %v3370_v51 }
 0xf1f   :  { %3610 = vmatprep.mubr.bf16.mxu0 %v3406_v52  ;;  %v6704_v52 = vld [vmem:[%s8050_s29 + $0x120] ss:$12 sps:$4 sm:$0xff]  }
 0xf20   :  { %3611 = vmatmul.mubr.bf16.vlgmr.msra.gmra.mxu0 %v3405_v53 }
 0xf21   :  { %4436 = vmatpush1.bf16.msra.mxu0 %v6671_v15  ;;  %v6664_v15 = vld [vmem:[%s8049_s1 + $0x50] ss:$12 sps:$4 sm:$0xff]  }
 0xf22   :  { %4437 = vmatprep.subr.bf16.mxu0 %v6676_v17  ;;  %v6666_v17 = vld [vmem:[%s8049_s1 + $0x20] ss:$12 sps:$4 sm:$0xff]  }
 0xf25   :  { %4438 = vmatpush1.bf16.msra.mxu0 %v6674_v18  ;;  %v6667_v18 = vld [vmem:[%s8049_s1 + $0x8] ss:$12 sps:$4 sm:$0xff]  }
 0xf26   :  { %4439 = vmatprep.subr.bf16.mxu0 %v6679_v19  ;;  %v6668_v19 = vld [vmem:[%s8049_s1 + $0xf8] ss:$12 sps:$4 sm:$0xff]  }
 0xf29   :  { %4440 = vmatpush1.bf16.msra.mxu0 %v6677_v20  ;;  %v6669_v20 = vld [vmem:[%s8049_s1 + $0xe0] ss:$12 sps:$4 sm:$0xff]  }
 0xf2a   :  { %4441 = vmatprep.subr.bf16.mxu0 %v6682_v21  ;;  %v6670_v21 = vld [vmem:[%s8049_s1 + $0xc8] ss:$12 sps:$4 sm:$0xff]  }
 0xf2d   :  { %4442 = vmatpush1.bf16.msra.mxu0 %v6680_v22  ;;  %v6715_v22 = vld [vmem:[%s8050_s29 + $0xdc] ss:$12 sps:$4 sm:$0xff]  }
 0xf2e   :  { %4443 = vmatprep.subr.bf16.mxu0 %v6685_v23  ;;  %v6713_v23 = vld [vmem:[%s8050_s29 + $0xd8] ss:$12 sps:$4 sm:$0xff]  }
 0xf31   :  { %4444 = vmatpush1.bf16.msra.mxu0 %v6683_v24  ;;  %v6716_v24 = vld [vmem:[%s8050_s29 + $0xc0] ss:$12 sps:$4 sm:$0xff]  }
 0xf32   :  { %4445 = vmatprep.subr.bf16.mxu0 %v6688_v27  ;;  %v6718_v27 = vld [vmem:[%s8050_s29 + $0xc4] ss:$12 sps:$4 sm:$0xff]  }
 0xf35   :  { %4446 = vmatpush1.bf16.msra.mxu0 %v6686_v28  ;;  %v6719_v28 = vld [vmem:[%s8050_s29 + $0x1f8] ss:$12 sps:$4 sm:$0xff]  }
 0xf36   :  { %4447 = vmatprep.subr.bf16.mxu0 %v6691_v29  ;;  %v6721_v29 = vld [vmem:[%s8050_s29 + $0x1fc] ss:$12 sps:$4 sm:$0xff]  }
 0xf39   :  { %4448 = vmatpush1.bf16.msra.mxu0 %v6689_v30  ;;  %v6725_v30 = vld [vmem:[%s8050_s29 + $0x1e4] ss:$12 sps:$4 sm:$0xff]  }
 0xf3a   :  { %4449 = vmatprep.subr.bf16.mxu0 %v6694_v31  ;;  %v6723_v31 = vld [vmem:[%s8050_s29 + $0x1e0] ss:$12 sps:$4 sm:$0xff]  }
 0xf3d   :  { %4450 = vmatpush1.bf16.msra.mxu0 %v6692_v32  ;;  %v6729_v32 = vld [vmem:[%s8050_s29 + $0x1cc] ss:$12 sps:$4 sm:$0xff]  }
 0xf3e   :  { %4451 = vmatprep.subr.bf16.mxu0 %v6697_v33  ;;  %v6727_v33 = vld [vmem:[%s8050_s29 + $0x1c8] ss:$12 sps:$4 sm:$0xff]  }
 0xf41   :  { %4452 = vmatpush2.bf16.msra.mxu0 %v6695_v35  ;;  %v6731_v35 = vld [vmem:[%s8050_s29 + $0x1b0] ss:$12 sps:$4 sm:$0xff]  }
 0xf42   :  { %4453 = vmatprep.subr.bf16.mxu0 %v6700_v36  ;;  %v6737_v36 = vld [vmem:[%s8050_s29 + $0x19c] ss:$12 sps:$4 sm:$0xff]  }
 0xf45   :  { %4454 = vmatpush2.bf16.msra.mxu0 %v6698_v38  ;;  %v6741_v38 = vld [vmem:[%s8050_s29 + $0x184] ss:$12 sps:$4 sm:$0xff]  }
 0xf46   :  { %4455 = vmatprep.subr.bf16.mxu0 %v6703_v40  ;;  %v6743_v40 = vld [vmem:[%s8050_s29 + $0x170] ss:$12 sps:$4 sm:$0xff]  }
 0xf49   :  { %4456 = vmatpush2.bf16.msra.mxu0 %v6701_v44 }
 0xf4a   :  { %4457 = vmatprep.subr.bf16.mxu0 %v6706_v47 }
 0xf4d   :  { %4458 = vmatpush2.bf16.msra.mxu0 %v6704_v52 }
 0xf4e   :  { %4459 = vmatprep.subr.bf16.mxu0 %v6709_v55  ;;  %v6722_v55 = vld [vmem:[%s8050_s29 + $0x200] ss:$12 sps:$4 sm:$0xff]  }
 0xf51   :  { %4460 = vmatpush2.bf16.msra.mxu0 %v6707_v57  ;;  %v6726_v57 = vld [vmem:[%s8050_s29 + $0x1e8] ss:$12 sps:$4 sm:$0xff]  }
 0xf52   :  { %4461 = vmatprep.subr.bf16.mxu0 %v6712_v58  ;;  %v6730_v58 = vld [vmem:[%s8050_s29 + $0x1d0] ss:$12 sps:$4 sm:$0xff]  }
 0xf55   :  { %4462 = vmatpush2.bf16.msra.mxu0 %v6710_v60  ;;  %v6734_v60 = vld [vmem:[%s8050_s29 + $0x1b8] ss:$12 sps:$4 sm:$0xff]  }
 0xf56   :  { %4463 = vmatprep.subr.bf16.mxu0 %v6715_v22  ;;  %v6770_v22 = vld [vmem:[%s8051_s17 + $0x44] ss:$8 sps:$4 sm:$0xff]  }
 0xf59   :  { %4464 = vmatpush2.bf16.msra.mxu0 %v6713_v23  ;;  %v6750_v23 = vld [vmem:[%s8050_s29 + $0x68] ss:$12 sps:$4 sm:$0xff]  }
 0xf5a   :  { %4465 = vmatprep.subr.bf16.mxu0 %v6718_v27  ;;  %v6768_v27 = vld [vmem:[%s8051_s17 + $0x40] ss:$8 sps:$4 sm:$0xff]  }
 0xf5d   :  { %4466 = vmatpush2.bf16.msra.mxu0 %v6716_v24  ;;  %v6751_v24 = vld [vmem:[%s8050_s29 + $0x110] ss:$12 sps:$4 sm:$0xff]  }
 0xf5e   :  { %6068 = vmatprep.subr.bf16.mxu0 %v7246_v0 }
 0xfe0   :  { %v3612_v41 = vpop.f32.mrf.mxu0 }
 0xfe1   :  { %v3613_v42 = vadd.f32 %v3612_v41, %v3411_v37  ;;  %v6735_v37 = vld [vmem:[%s8050_s29 + $0x198] ss:$12 sps:$4 sm:$0xff]  }
 0xfe2   :  { %v3614_v43 = vpop.f32.mrf.mxu0  ;;  %v3682_v41 = vld [vmem:[#allocation2 + $0x45] ss:$8 sm:$0x7] }
 0xfe3   :  { %v3619_v45 = vand.u32 2147483647, %v3613_v42  ;;  %v3615_v46 = vadd.f32 %v3614_v43, %v3415_v39  ;;  %vm3631_vm9 = vcmp.ge.f32.partialorder %v3613_v42, 0.0  ;;  %v6739_v39 = vld [vmem:[%s8050_s29 + $0x180] ss:$12 sps:$4 sm:$0xff]   ;;  %v3689_v42 = vrot.slane %v3682_v41, %v7579_v62 }
 0xfe4   :  { %v3616_v48 = vpop.f32.mrf.mxu0  ;;  %v3693_v43 = vrot.slane %v3682_v41, %v7583_v2 }
 0xfe5   :  { %v3621_v49 = vsub.f32 0.0, %v3619_v45  ;;  %v3620_v50 = vand.u32 2147483647, %v3615_v46  ;;  %vm3632_vm10 = vcmp.ge.f32.partialorder %v3615_v46, 0.0 }
 0xfe6   :  { %v3617_v51 = vpop.f32.mrf.mxu0 }
 0xfe7   :  { %v3623_v53 = vmul.f32 1.442695, %v3621_v49  ;;  %v3622_v54 = vsub.f32 0.0, %v3620_v50 }
 0xfe9   :  { %6848 = vpow2.f32 %v3623_v53  ;;  %v3625_v56 = vmul.f32 1.442695, %v3622_v54 }
 0xfeb   :  { %6850 = vpow2.f32 %v3625_v56 }
 0xff6   :  { %v6849_v61 = vpop.eup %6848 }
 0xff7   :  { %v3627_v1 = vadd.f32 1.0, %v6849_v61  ;;  %v6738_v61 = vld [vmem:[%s8050_s29 + $0x1a0] ss:$12 sps:$4 sm:$0xff]  }
 0xff8   :  { %v6851_v25 = vpop.eup %6850 }
 0xff9   :  { %6852 = vrcp.f32 %v3627_v1  ;;  %v3628_v3 = vadd.f32 1.0, %v6851_v25  ;;  %v6742_v1 = vld [vmem:[%s8050_s29 + $0x188] ss:$12 sps:$4 sm:$0xff]  }
 0xffa   :  { %v6761_v25 = vld [vmem:[%s8051_s17 + $0x74] ss:$8 sps:$4 sm:$0xff]  }
 0xffb   :  { %6854 = vrcp.f32 %v3628_v3  ;;  %v3697_v3 = vrot.slane %v3682_v41, %v7581_v63  ;;  %v6782_v41 = vld [vmem:[%s8051_s17 + $0x4] ss:$8 sps:$4 sm:$0xff]  }
0x1006   :  { %v6853_v26 = vpop.eup %6852 }
0x1007   :  { %v3633_v4 = vsub.f32 1.0, %v6853_v26 }
0x1008   :  { %v6855_v5 = vpop.eup %6854 }
0x1009   :  { %v3634_v6 = vsub.f32 1.0, %v6855_v5  ;;  %v3635_v7 = vsel %vm3631_vm9, %v6853_v26, %v3633_v4 }
0x100a   :  { %v3683_v11 = vpack.c.bf16 %v3635_v7, %v3635_v7 }
0x100b   :  { %v3636_v8 = vsel %vm3632_vm10, %v6855_v5, %v3634_v6 }
0x100c   :  { %v3684_v9 = vpack.c.bf16 %v3636_v8, %v3636_v8 }
0x100e   :  { %5727 = vmatprep.mubr.msk.bf16.mxu1 %vm2302_vm8, %v3684_v9 }
0x100f   :  { %3913 = vmatmul.mubr.bf16.vlgmr.msra.gmra.mxu1 %v3683_v11 }
0x1010   :  { %3922 = vmatpush1.bf16.msra.mxu1 %v6660_v10  ;;  %5728 = vmatprep.mubr.msk.bf16.mxu1 %vm2302_vm8, %v3684_v9  ;;  %v6744_v9 = vld [vmem:[%s8050_s29 + $0xb0] ss:$12 sps:$4 sm:$0xff]  }
0x1011   :  { %3923 = vmatprep.subr.bf16.mxu1 %v7248_v59 }
0x1014   :  { %3924 = vmatpush1.bf16.msra.mxu1 %v6661_v12  ;;  %v6745_v12 = vld [vmem:[%s8050_s29 + $0x158] ss:$12 sps:$4 sm:$0xff]  }
0x1015   :  { %3925 = vmatprep.subr.bf16.mxu1 %v7248_v59 }
0x1018   :  { %3926 = vmatpush1.bf16.msra.mxu1 %v6662_v13  ;;  %v6759_v13 = vld [vmem:[%s8051_s17 + $0x70] ss:$8 sps:$4 sm:$0xff]  }
0x1019   :  { %3927 = vmatprep.subr.bf16.mxu1 %v7248_v59 }
0x101c   :  { %3928 = vmatpush1.bf16.msra.mxu1 %v6663_v14  ;;  %v6764_v14 = vld [vmem:[%s8051_s17 + $0x64] ss:$8 sps:$4 sm:$0xff]  }
0x101d   :  { %3929 = vmatprep.subr.bf16.mxu1 %v7248_v59 }
0x1020   :  { %3930 = vmatpush1.bf16.msra.mxu1 %v6664_v15  ;;  %v6746_v15 = vld [vmem:[%s8050_s29 + $0x98] ss:$12 sps:$4 sm:$0xff]  }
0x1021   :  { %3931 = vmatprep.subr.bf16.mxu1 %v7248_v59 }
0x1024   :  { %3932 = vmatpush1.bf16.msra.mxu1 %v6665_v16  ;;  %v6747_v16 = vld [vmem:[%s8050_s29 + $0x140] ss:$12 sps:$4 sm:$0xff]  }
0x1025   :  { %3933 = vmatprep.subr.bf16.mxu1 %v7248_v59 }
0x1028   :  { %3934 = vmatpush1.bf16.msra.mxu1 %v6666_v17  ;;  %v6762_v17 = vld [vmem:[%s8051_s17 + $0x60] ss:$8 sps:$4 sm:$0xff]  }
0x1029   :  { %3935 = vmatprep.subr.bf16.mxu1 %v7248_v59 }
0x102c   :  { %3936 = vmatpush1.bf16.msra.mxu1 %v6667_v18  ;;  %v6767_v18 = vld [vmem:[%s8051_s17 + $0x54] ss:$8 sps:$4 sm:$0xff]  }
0x102d   :  { %3947 = vmatprep.subr.bf16.mxu1 %v7248_v59 }
0x1030   :  { %3948 = vmatpush2.bf16.msra.mxu1 %v6668_v19  ;;  %v6748_v19 = vld [vmem:[%s8050_s29 + $0x80] ss:$12 sps:$4 sm:$0xff]  }
0x1031   :  { %3949 = vmatprep.subr.bf16.mxu1 %v7248_v59 }
0x1034   :  { %3950 = vmatpush2.bf16.msra.mxu1 %v6669_v20  ;;  %v6749_v20 = vld [vmem:[%s8050_s29 + $0x128] ss:$12 sps:$4 sm:$0xff]  }
0x1035   :  { %3951 = vmatprep.subr.bf16.mxu1 %v7248_v59 }
0x1038   :  { %3952 = vmatpush2.bf16.msra.mxu1 %v6670_v21  ;;  %v6765_v21 = vld [vmem:[%s8051_s17 + $0x50] ss:$8 sps:$4 sm:$0xff]  }
0x1039   :  { %4480 = vmatprep.subr.bf16.mxu1 %v6721_v29  ;;  %v6753_v29 = vld [vmem:[%s8050_s29 + $0xf8] ss:$12 sps:$4 sm:$0xff]  }
0x103b   :  { %3954 = vmatmul.mubr.bf16.vlgmr.msra.gmra.mxu1 %v3683_v11 }
0x103c   :  { %4508 = vmatprep.mubr.bf16.mxu1 %v7248_v59  ;;  %4481 = vmatpush1.bf16.msra.mxu1 %v6719_v28  ;;  %v6752_v28 = vld [vmem:[%s8050_s29 + $0x50] ss:$12 sps:$4 sm:$0xff]  }
0x103d   :  { %4482 = vmatprep.subr.bf16.mxu1 %v6725_v30  ;;  %v6754_v30 = vld [vmem:[%s8050_s29 + $0x38] ss:$12 sps:$4 sm:$0xff]  }
0x1040   :  { %4483 = vmatpush1.bf16.msra.mxu1 %v6723_v31  ;;  %v6755_v31 = vld [vmem:[%s8050_s29 + $0xe0] ss:$12 sps:$4 sm:$0xff]  }
0x1041   :  { %4484 = vmatprep.subr.bf16.mxu1 %v6729_v32  ;;  %v6756_v32 = vld [vmem:[%s8050_s29 + $0x20] ss:$12 sps:$4 sm:$0xff]  }
0x1044   :  { %4485 = vmatpush1.bf16.msra.mxu1 %v6727_v33  ;;  %v6757_v33 = vld [vmem:[%s8050_s29 + $0xc8] ss:$12 sps:$4 sm:$0xff]  }
0x1045   :  { %4486 = vmatprep.subr.bf16.mxu1 %v6733_v34  ;;  %v6758_v34 = vld [vmem:[%s8050_s29 + $0x8] ss:$12 sps:$4 sm:$0xff]  }
0x1048   :  { %4487 = vmatpush1.bf16.msra.mxu1 %v6731_v35  ;;  %v6771_v35 = vld [vmem:[%s8051_s17 + $0x30] ss:$8 sps:$4 sm:$0xff]  }
0x1049   :  { %4488 = vmatprep.subr.bf16.mxu1 %v6737_v36  ;;  %v6773_v36 = vld [vmem:[%s8051_s17 + $0x34] ss:$8 sps:$4 sm:$0xff]  }
0x104c   :  { %4489 = vmatpush1.bf16.msra.mxu1 %v6735_v37  ;;  %v6774_v37 = vld [vmem:[%s8051_s17 + $0x20] ss:$8 sps:$4 sm:$0xff]  }
0x104d   :  { %4490 = vmatprep.subr.bf16.mxu1 %v6741_v38  ;;  %v6776_v38 = vld [vmem:[%s8051_s17 + $0x24] ss:$8 sps:$4 sm:$0xff]  }
0x1050   :  { %4491 = vmatpush1.bf16.msra.mxu1 %v6739_v39  ;;  %v6779_v39 = vld [vmem:[%s8051_s17 + $0x14] ss:$8 sps:$4 sm:$0xff]  }
0x1051   :  { %5929 = vmatprep.subr.bf16.mxu1 %v6743_v40  ;;  %v6777_v40 = vld [vmem:[%s8051_s17 + $0x10] ss:$8 sps:$4 sm:$0xff]  }
0x10cf   :  { %v3914_v44 = vpop.f32.mrf.mxu1 }
0x10d0   :  { %v3915_v45 = vadd.f32 %v3914_v44, %v3689_v42  ;;  %v6780_v42 = vld [vmem:[%s8051_s17] ss:$8 sps:$4 sm:$0xff]   ;;  %v6783_v44 = vld [vmem:[%s8051_s17 + $0xf0] ss:$8 sps:$4 sm:$0xff]  }
0x10d1   :  { %v3916_v46 = vpop.f32.mrf.mxu1 }
0x10d2   :  { %vm3961_vm11 = vcmp.ge.f32.partialorder %v3915_v45, 0.0  ;;  %v3964_v47 = vmul.f32 0.01, %v3915_v45  ;;  %v3917_v48 = vadd.f32 %v3916_v46, %v3693_v43  ;;  %v6785_v43 = vld [vmem:[%s8051_s17 + $0xf4] ss:$8 sps:$4 sm:$0xff]  }
0x10d3   :  { %v3918_v49 = vpop.f32.mrf.mxu1  ;;  %v6786_v46 = vld [vmem:[%s8051_s17 + $0xe0] ss:$8 sps:$4 sm:$0xff]  }
0x10d4   :  { %vm3962_vm12 = vcmp.ge.f32.partialorder %v3917_v48, 0.0  ;;  %v3965_v50 = vmul.f32 0.01, %v3917_v48  ;;  %v3967_v51 = vsel %vm3961_vm11, %v3915_v45, %v3964_v47  ;;  %v6788_v45 = vld [vmem:[%s8051_s17 + $0xe4] ss:$8 sps:$4 sm:$0xff]  }
0x10d5   :  { %v3919_v52 = vpop.f32.mrf.mxu1  ;;  %v7882_v56 = vpack.c.bf16 %v3967_v51, %v3967_v51  ;;  %v6791_v47 = vld [vmem:[%s8051_s17 + $0xd4] ss:$8 sps:$4 sm:$0xff]   ;;  %v6794_v49 = vld [vmem:[%s8051_s17 + $0xc4] ss:$8 sps:$4 sm:$0xff]  }
0x10d6   :  { %v3968_v53 = vsel %vm3962_vm12, %v3917_v48, %v3965_v50  ;;  %v6789_v48 = vld [vmem:[%s8051_s17 + $0xd0] ss:$8 sps:$4 sm:$0xff]   ;;  %v6792_v50 = vld [vmem:[%s8051_s17 + $0xc0] ss:$8 sps:$4 sm:$0xff]   ;;  %v6797_v51 = vld [vmem:[%s8051_s17 + $0xb4] ss:$8 sps:$4 sm:$0xff]  }
0x10d7   :  { %v4061_v54 = vpack.c.bf16 %v3968_v53, %v3968_v53  ;;  %v6795_v52 = vld [vmem:[%s8051_s17 + $0xb0] ss:$8 sps:$4 sm:$0xff]   ;;  %v6800_v53 = vld [vmem:[%s8051_s17 + $0xa4] ss:$8 sps:$4 sm:$0xff]  }
0x10d9   :  { %4467 = vmatprep.mubr.bf16.mxu0 %v4061_v54 }
0x10da   :  { %4468 = vmatmul.mubr.bf16.vlgmr.msra.gmra.mxu0 %v7882_v56 }
0x10db   :  { %6069 = vmatpush3.bf16.msra.mxu0 %v6722_v55  ;;  %6080 = vmatprep.mubr.msk.bf16.mxu0 %vm7247_vm0, %v7246_v0  ;;  %v6803_v55 = vld [vmem:[%s8051_s17 + $0x94] ss:$8 sps:$4 sm:$0xff]  }
0x10dc   :  { %6070 = vmatprep.subr.bf16.mxu0 %v7246_v0 }
0x10df   :  { %6071 = vmatpush3.bf16.msra.mxu0 %v6726_v57  ;;  %v6804_v57 = vld [vmem:[%s8051_s17 + $0x80] ss:$8 sps:$4 sm:$0xff]  }
0x10e0   :  { %6072 = vmatprep.subr.bf16.mxu0 %v7246_v0 }
0x10e3   :  { %6073 = vmatpush3.bf16.msra.mxu0 %v6730_v58  ;;  %v6806_v58 = vld [vmem:[%s8051_s17 + $0x84] ss:$8 sps:$4 sm:$0xff]  }
0x10e4   :  { %6074 = vmatprep.subr.bf16.mxu0 %v7246_v0 }
0x10e7   :  { %6075 = vmatpush3.bf16.msra.mxu0 %v6734_v60  ;;  %v6807_v60 = vld [vmem:[%s8051_s17 + $0x150] ss:$8 sps:$4 sm:$0xff]  }
0x10e8   :  { %6076 = vmatprep.subr.bf16.mxu0 %v7246_v0 }
0x10eb   :  { %6077 = vmatpush3.bf16.msra.mxu0 %v6738_v61  ;;  %v6809_v61 = vld [vmem:[%s8051_s17 + $0x154] ss:$8 sps:$4 sm:$0xff]  }
0x10ec   :  { %6078 = vmatprep.subr.bf16.mxu0 %v7246_v0 }
0x10ef   :  { %6079 = vmatpush3.bf16.msra.mxu0 %v6742_v1  ;;  %v6812_v1 = vld [vmem:[%s8051_s17 + $0x144] ss:$8 sps:$4 sm:$0xff]  }
0x10f0   :  { %4889 = vmatprep.subr.bf16.mxu0 %v6761_v25  ;;  %v6810_v25 = vld [vmem:[%s8051_s17 + $0x140] ss:$8 sps:$4 sm:$0xff]  }
0x10fb   :  { %v3955_v26 = vpop.f32.mrf.mxu1 }
0x10fc   :  { %v3956_v4 = vadd.f32 %v3955_v26, %v3697_v3  ;;  %v6815_v3 = vld [vmem:[%s8051_s17 + $0x134] ss:$8 sps:$4 sm:$0xff]   ;;  %v6813_v26 = vld [vmem:[%s8051_s17 + $0x130] ss:$8 sps:$4 sm:$0xff]  }
0x10fd   :  { %v3957_v5 = vpop.f32.mrf.mxu1 }
0x10fe   :  { %vm3963_vm13 = vcmp.ge.f32.partialorder %v3956_v4, 0.0  ;;  %v3966_v6 = vmul.f32 0.01, %v3956_v4  ;;  %v6816_v5 = vld [vmem:[%s8051_s17 + $0x120] ss:$8 sps:$4 sm:$0xff]  }
0x10ff   :  { %v3958_v7 = vpop.f32.mrf.mxu1 }
0x1100   :  { %v3969_v8 = vsel %vm3963_vm13, %v3956_v4, %v3966_v6  ;;  %v6818_v4 = vld [vmem:[%s8051_s17 + $0x124] ss:$8 sps:$4 sm:$0xff]   ;;  %v6821_v6 = vld [vmem:[%s8051_s17 + $0x114] ss:$8 sps:$4 sm:$0xff]   ;;  %v6819_v7 = vld [vmem:[%s8051_s17 + $0x110] ss:$8 sps:$4 sm:$0xff]  }
0x1101   :  { %v4062_v10 = vpack.c.bf16 %v3969_v8, %v3969_v8  ;;  %v3959_v11 = vpop.f32.mrf.mxu1  ;;  %v6824_v8 = vld [vmem:[%s8051_s17 + $0x104] ss:$8 sps:$4 sm:$0xff]  }
0x1103   :  { %5795 = vmatmul.mubr.msk.bf16.vlgmr.msra.gmra.mxu1 %vm4431_vm14, %v4062_v10  ;;  %6081 = vmatmul.mubr.msk.bf16.vlgmr.msra.gmra.mxu0 %vm4431_vm14, %v4062_v10 }
0x1104   :  { %5930 = vmatpush3.bf16.msra.mxu1 %v6744_v9  ;;  %4549 = vmatprep.mubr.bf16.mxu1 %v4061_v54  ;;  %v6798_v54 = vld [vmem:[%s8051_s17 + $0xa0] ss:$8 sps:$4 sm:$0xff]  }
0x1105   :  { %5931 = vmatprep.subr.bf16.mxu1 %v6745_v12  ;;  %4890 = vmatpush1.bf16.msra.mxu0 %v6759_v13  ;;  %v6822_v9 = vld [vmem:[%s8051_s17 + $0x100] ss:$8 sps:$4 sm:$0xff]  }
0x1106   :  { %4891 = vmatprep.subr.bf16.mxu0 %v6764_v14  ;;  %v4059_v14 = vld [vmem:[#allocation2 + $0x46] ss:$8 sm:$0x7] }
0x1108   :  { %5932 = vmatpush3.bf16.msra.mxu1 %v6746_v15  ;;  %v4067_v15 = vrot.slane %v4059_v14, %v7579_v62 }
0x1109   :  { %5933 = vmatprep.subr.bf16.mxu1 %v6747_v16  ;;  %4892 = vmatpush1.bf16.msra.mxu0 %v6762_v17  ;;  %v4071_v16 = vrot.slane %v4059_v14, %v7583_v2 }
0x110a   :  { %4893 = vmatprep.subr.bf16.mxu0 %v6767_v18 }
0x110c   :  { %5934 = vmatpush3.bf16.msra.mxu1 %v6748_v19 }
0x110d   :  { %5935 = vmatprep.subr.bf16.mxu1 %v6749_v20  ;;  %4894 = vmatpush1.bf16.msra.mxu0 %v6765_v21 }
0x110e   :  { %4895 = vmatprep.subr.bf16.mxu0 %v6770_v22 }
0x1110   :  { %5936 = vmatpush3.bf16.msra.mxu1 %v6750_v23 }
0x1111   :  { %5937 = vmatprep.subr.bf16.mxu1 %v6751_v24  ;;  %4896 = vmatpush1.bf16.msra.mxu0 %v6768_v27 }
0x1112   :  { %4897 = vmatprep.subr.bf16.mxu0 %v6773_v36 }
0x1114   :  { %5938 = vmatpush3.bf16.msra.mxu1 %v6752_v28 }
0x1115   :  { %5939 = vmatprep.subr.bf16.mxu1 %v6753_v29  ;;  %4898 = vmatpush1.bf16.msra.mxu0 %v6771_v35 }
0x1116   :  { %4899 = vmatprep.subr.bf16.mxu0 %v6776_v38  ;;  %v4075_v38 = vrot.slane %v4059_v14, %v7581_v63  ;;  %v6827_v63 = vld [vmem:[#allocation25 + $0x28] sm:$0xff]  }
0x1118   :  { %5940 = vmatpush3.bf16.msra.mxu1 %v6754_v30 }
0x1119   :  { %5941 = vmatprep.subr.bf16.mxu1 %v6755_v31  ;;  %4900 = vmatpush1.bf16.msra.mxu0 %v6774_v37 }
0x111a   :  { %4901 = vmatprep.subr.bf16.mxu0 %v6779_v39 }
0x111c   :  { %5942 = vmatpush3.bf16.msra.mxu1 %v6756_v32 }
0x111d   :  { %5943 = vmatprep.subr.bf16.mxu1 %v6757_v33  ;;  %4902 = vmatpush1.bf16.msra.mxu0 %v6777_v40 }
0x111e   :  { %4903 = vmatprep.subr.bf16.mxu0 %v6782_v41 }
0x1120   :  { %5944 = vmatpush3.bf16.msra.mxu1 %v6758_v34 }
0x1121   :  { %4904 = vmatpush1.bf16.msra.mxu0 %v6780_v42  ;;  %4934 = vmatprep.subr.bf16.mxu1 %v6809_v61  ;;  %v6837_v61 = vld [vmem:[%s7403_s8 + $0x20] sm:$0xff]  }
0x1122   :  { %4905 = vmatprep.subr.bf16.mxu0 %v6785_v43 }
0x1123   :  { %4550 = vmatmul.mubr.bf16.vlgmr.msra.gmra.mxu1 %v7882_v56  ;;  %v6801_v56 = vld [vmem:[%s8051_s17 + $0x90] ss:$8 sps:$4 sm:$0xff]  }
0x1124   :  { %4962 = vmatprep.mubr.bf16.mxu1 %v7248_v59  ;;  %4935 = vmatpush1.bf16.msra.mxu1 %v6807_v60 }
0x1125   :  { %4906 = vmatpush2.bf16.msra.mxu0 %v6783_v44  ;;  %4936 = vmatprep.subr.bf16.mxu1 %v6812_v1  ;;  %v6838_v1 = vld [vmem:[%s7403_s8 + $0x18] sm:$0xff]  }
0x1126   :  { %4907 = vmatprep.subr.bf16.mxu0 %v6788_v45 }
0x1128   :  { %4937 = vmatpush1.bf16.msra.mxu1 %v6810_v25  ;;  %v6839_v25 = vld [vmem:[%s7403_s8 + $0x10] sm:$0xff]  }
0x1129   :  { %4908 = vmatpush2.bf16.msra.mxu0 %v6786_v46  ;;  %4938 = vmatprep.subr.bf16.mxu1 %v6815_v3 }
0x112a   :  { %4909 = vmatprep.subr.bf16.mxu0 %v6791_v47  ;;  %v6825_v47 = vld [vmem:[#allocation25 + $0x38] sm:$0xff]  }
0x112c   :  { %4939 = vmatpush1.bf16.msra.mxu1 %v6813_v26 }
0x112d   :  { %4910 = vmatpush2.bf16.msra.mxu0 %v6789_v48  ;;  %4940 = vmatprep.subr.bf16.mxu1 %v6818_v4 }
0x112e   :  { %4911 = vmatprep.subr.bf16.mxu0 %v6794_v49  ;;  %v6826_v49 = vld [vmem:[#allocation25 + $0x30] sm:$0xff]  }
0x1130   :  { %4941 = vmatpush1.bf16.msra.mxu1 %v6816_v5  ;;  %v4651_v5 = vld [vmem:[#allocation2 + $0x47] ss:$8 sm:$0x3] }
0x1131   :  { %4912 = vmatpush2.bf16.msra.mxu0 %v6792_v50  ;;  %4942 = vmatprep.subr.bf16.mxu1 %v6821_v6  ;;  %v6828_v50 = vld [vmem:[#allocation25 + $0x20] sm:$0xff]   ;;  %v4659_v6 = vrot.slane %v4651_v5, %v7579_v62  ;;  %v6840_v62 = vld [vmem:[%s7403_s8 + $0x8] sm:$0xff]  }
0x1132   :  { %4913 = vmatprep.subr.bf16.mxu0 %v6797_v51  ;;  %v6829_v51 = vld [vmem:[#allocation25 + $0x18] sm:$0xff]  }
0x1134   :  { %4943 = vmatpush1.bf16.msra.mxu1 %v6819_v7  ;;  %v4663_v7 = vrot.slane %v4651_v5, %v7583_v2  ;;  %v6841_v2 = vld [vmem:[%s7403_s8] sm:$0xff]  }
0x1135   :  { %4914 = vmatpush2.bf16.msra.mxu0 %v6795_v52  ;;  %4944 = vmatprep.subr.bf16.mxu1 %v6824_v8  ;;  %v6830_v52 = vld [vmem:[#allocation25 + $0x10] sm:$0xff]  }
0x1136   :  { %4915 = vmatprep.subr.bf16.mxu0 %v6800_v53  ;;  %v6831_v53 = vld [vmem:[#allocation25 + $0x8] sm:$0xff]  }
0x1138   :  { %4945 = vmatpush1.bf16.msra.mxu1 %v6822_v9 }
0x1139   :  { %4916 = vmatpush2.bf16.msra.mxu0 %v6798_v54  ;;  %5065 = vmatprep.subr.bf16.mxu1 %v7248_v59  ;;  %v6832_v54 = vld [vmem:[#allocation25] sm:$0xff]  }
0x113a   :  { %4917 = vmatprep.subr.bf16.mxu0 %v6803_v55  ;;  %v6833_v55 = vld [vmem:[#allocation25 + $0x50] sm:$0xff]  }
0x113d   :  { %4918 = vmatpush2.bf16.msra.mxu0 %v6801_v56  ;;  %v6834_v56 = vld [vmem:[#allocation25 + $0x48] sm:$0xff]  }
0x113e   :  { %4919 = vmatprep.subr.bf16.mxu0 %v6806_v58  ;;  %v6836_v58 = vld [vmem:[%s7403_s8 + $0x28] ss:$0 sps:$4 sm:$0xff]   ;;  %s7249_s8 = smov [#allocation26]  }
0x113f   :  { %v5159_v60 = vsel %vm477_vm2, %v6836_v58, 0  ;;  %s5304_s2 = sshll.u32 %s7249_s8, 4  ;;  %s5305_s2 = int_to_ptr.vmem [resolvable:$true] %s5304_s2 }
0x1140   :  { %p7161_p6 = scmp.lt.s32.totalorder %s5305_s2, %s5305_s2 }
0x1141   :  { %4920 = vmatpush2.bf16.msra.mxu0 %v6804_v57  ;;  %v6835_v57 = vld [vmem:[#allocation25 + $0x40] sm:$0xff]  }
0x1142   :  { %6084 = vmatprep.subr.bf16.mxu0 %v7246_v0 }
0x119a   :  { %v4469_v10 = vpop.f32.mrf.mxu0 }
0x119b   :  { %v4470_v17 = vadd.f32 %v4469_v10, %v4067_v15 }
0x119c   :  { %v4471_v11 = vpop.f32.mrf.mxu0 }
0x119d   :  { %v4472_v20 = vadd.f32 %v4471_v11, %v4071_v16 }
0x119e   :  { %v4473_v12 = vpop.f32.mrf.mxu0 }
0x11a0   :  { %v4474_v13 = vpop.f32.mrf.mxu0 }
0x11c3   :  { %v4510_v18 = vpop.f32.mrf.mxu1  ;;  %v4591_v19 = vpop.f32.mrf.mxu0 }
0x11c4   :  { %v4511_v21 = vadd.f32 %v4510_v18, %v4470_v17  ;;  %v6842_v18 = vld [vmem:[%s7408_s9 + $0x28] ss:$0 sps:$4 sm:$0xff]  }
0x11c5   :  { %v4512_v22 = vpop.f32.mrf.mxu1  ;;  %v6082_v23 = vpop.f32.mrf.mxu0 }
0x11c6   :  { %vm4597_vm15 = vcmp.ge.f32.partialorder %v4511_v21, 0.0  ;;  %v4600_v24 = vmul.f32 0.01, %v4511_v21  ;;  %v4513_v27 = vadd.f32 %v4512_v22, %v4472_v20  ;;  %v6843_v20 = vld [vmem:[%s7408_s9 + $0x20] sm:$0xff]   ;;  %v6845_v22 = vld [vmem:[%s7408_s9 + $0x10] sm:$0xff]  }
0x11c7   :  { %v4514_v28 = vpop.f32.mrf.mxu1  ;;  %v4594_v29 = vpop.f32.mrf.mxu0  ;;  %v4993_v23 = vld [vmem:[#allocation2 + $0x60] ss:$0 sm:$0xff] }
0x11c8   :  { %vm4598_vm3 = vcmp.ge.f32.partialorder %v4513_v27, 0.0  ;;  %v4601_v30 = vmul.f32 0.01, %v4513_v27  ;;  %v4603_v31 = vsel %vm4597_vm15, %v4511_v21, %v4600_v24  ;;  %v6844_v21 = vld [vmem:[%s7408_s9 + $0x18] sm:$0xff]  }
0x11c9   :  { %v4515_v32 = vpop.f32.mrf.mxu1  ;;  %v6083_v33 = vpop.f32.mrf.mxu0  ;;  %v4652_v36 = vpack.c.bf16 %v4603_v31, %v4603_v31 }
0x11ca   :  { %v4604_v34 = vsel %vm4598_vm3, %v4513_v27, %v4601_v30 }
0x11cb   :  { %v4653_v35 = vpack.c.bf16 %v4604_v34, %v4604_v34  ;;  %v6846_v34 = vld [vmem:[%s7408_s9 + $0x8] sm:$0xff]  }
0x11cd   :  { %4921 = vmatprep.mubr.bf16.mxu0 %v4653_v35  ;;  %v6847_v35 = vld [vmem:[%s7408_s9] sm:$0xff]   ;;  %s7156_s9 = scalar_lea.vmem %s5305_s2, 32 }
0x11ce   :  { %4922 = vmatmul.mubr.bf16.vlgmr.msra.gmra.mxu0 %v4652_v36  ;;  %v5119_v36 = vld [vmem:[#allocation2 + $0x61] ss:$0 sm:$0xff]  ;;  %p7157_p5 = scmp.ne.s32.totalorder %s5305_s2, %s7156_s9  ;;  %p7162_p7 = scmp.lt.s32.totalorder %s7156_s9, %s7156_s9 }
0x11cf   :  { %6096 = vmatprep.mubr.msk.bf16.mxu0 %vm7247_vm0, %v7246_v0  ;;  %6085 = vmatpush3.bf16.msra.mxu0 %v5159_v60 }
0x11d0   :  { %6086 = vmatprep.subr.bf16.mxu0 %v7246_v0  ;;  %p7163_p8 = por %p7162_p7, %p7161_p6 }
0x11d2   :  { %p7164_p9 = pnand %p7163_p8, %p7157_p5 }
0x11d3   :  { %6087 = vmatpush3.bf16.msra.mxu0 %v6837_v61 }
0x11d4   :  { %6088 = vmatprep.subr.bf16.mxu0 %v7246_v0 }
0x11d7   :  { %6089 = vmatpush3.bf16.msra.mxu0 %v6838_v1 }
0x11d8   :  { %6090 = vmatprep.subr.bf16.mxu0 %v7246_v0 }
0x11db   :  { %6091 = vmatpush3.bf16.msra.mxu0 %v6839_v25 }
0x11dc   :  { %6092 = vmatprep.subr.bf16.mxu0 %v7246_v0 }
0x11df   :  { %6093 = vmatpush3.bf16.msra.mxu0 %v6840_v62 }
0x11e0   :  { %6094 = vmatprep.subr.bf16.mxu0 %v7246_v0 }
0x11e3   :  { %v5945_v37 = vpop.f32.mrf.mxu1  ;;  %6095 = vmatpush3.bf16.msra.mxu0 %v6841_v2 }
0x11e5   :  { %v5946_v39 = vpop.f32.mrf.mxu1 }
0x11e6   :  { %v5947_v40 = vadd.f32 %v5946_v39, %v5945_v37 }
0x11e7   :  { %v5948_v41 = vpop.f32.mrf.mxu1 }
0x11e8   :  { %v4552_v42 = vadd.f32 %v5947_v40, %v4075_v38 }
0x11e9   :  { %v5949_v43 = vpop.f32.mrf.mxu1 }
0x11ea   :  { %v4592_v44 = vadd.f32 %v4591_v19, %v4552_v42  ;;  %v5254_v19 = vsel %vm477_vm2, %v6842_v18, 0  ;;  %vm5154_vm2 = vcmask 719872  }
0x11ec   :  { %vm4599_vm4 = vcmp.ge.f32.partialorder %v4592_v44, 0.0  ;;  %v4602_v45 = vmul.f32 0.01, %v4592_v44 }
0x11ee   :  { %v4605_v46 = vsel %vm4599_vm4, %v4592_v44, %v4602_v45  ;;  %v5215_v45 = vld [vmem:[#allocation2 + $0x62] ss:$0 sm:$0xff] }
0x11ef   :  { %v4654_v48 = vpack.c.bf16 %v4605_v46, %v4605_v46 }
0x11f1   :  { %5841 = vmatmul.mubr.msk.bf16.vlgmr.msra.gmra.mxu1 %vm4431_vm14, %v4654_v48 }
0x11f2   :  { %5066 = vmatpush1.bf16.msra.mxu1 %v6825_v47 }
0x11f3   :  { %5067 = vmatprep.subr.bf16.mxu1 %v7248_v59 }
0x11f6   :  { %5068 = vmatpush1.bf16.msra.mxu1 %v6826_v49 }
0x11f7   :  { %5069 = vmatprep.subr.bf16.mxu1 %v7248_v59 }
0x11fa   :  { %5070 = vmatpush1.bf16.msra.mxu1 %v6827_v63 }
0x11fb   :  { %5071 = vmatprep.subr.bf16.mxu1 %v7248_v59 }
0x11fe   :  { %5072 = vmatpush1.bf16.msra.mxu1 %v6828_v50 }
0x11ff   :  { %5073 = vmatprep.subr.bf16.mxu1 %v7248_v59 }
0x1202   :  { %5074 = vmatpush1.bf16.msra.mxu1 %v6829_v51 }
0x1203   :  { %5075 = vmatprep.subr.bf16.mxu1 %v7248_v59 }
0x1206   :  { %5076 = vmatpush1.bf16.msra.mxu1 %v6830_v52 }
0x1207   :  { %5077 = vmatprep.subr.bf16.mxu1 %v7248_v59 }
0x120a   :  { %5078 = vmatpush1.bf16.msra.mxu1 %v6831_v53 }
0x120b   :  { %5079 = vmatprep.subr.bf16.mxu1 %v7248_v59 }
0x120e   :  { %5080 = vmatpush1.bf16.msra.mxu1 %v6832_v54 }
0x120f   :  { %5091 = vmatprep.subr.bf16.mxu1 %v7248_v59 }
0x1212   :  { %5092 = vmatpush2.bf16.msra.mxu1 %v6833_v55 }
0x1213   :  { %5093 = vmatprep.subr.bf16.mxu1 %v7248_v59 }
0x1216   :  { %5094 = vmatpush2.bf16.msra.mxu1 %v6834_v56 }
0x1217   :  { %5095 = vmatprep.subr.bf16.mxu1 %v7248_v59 }
0x121a   :  { %5096 = vmatpush2.bf16.msra.mxu1 %v6835_v57 }
0x121b   :  { %6100 = vmatprep.subr.bf16.mxu1 %v7246_v0 }
0x128e   :  { %v4923_v59 = vpop.f32.mrf.mxu0 }
0x128f   :  { %v4924_v8 = vadd.f32 %v4923_v59, %v4659_v6 }
0x1290   :  { %v4925_v3 = vpop.f32.mrf.mxu0 }
0x1291   :  { %v4926_v10 = vadd.f32 %v4925_v3, %v4663_v7 }
0x1292   :  { %v4927_v26 = vpop.f32.mrf.mxu0 }
0x1294   :  { %v4928_v4 = vpop.f32.mrf.mxu0 }
0x12b1   :  { %v4964_v9 = vpop.f32.mrf.mxu1 }
0x12b2   :  { %v4965_v11 = vadd.f32 %v4964_v9, %v4924_v8 }
0x12b3   :  { %v4966_v12 = vpop.f32.mrf.mxu1 }
0x12b4   :  { %v4967_v13 = vadd.f32 %v4966_v12, %v4926_v10  ;;  %v4994_v16 = vpack.c.bf16 %v4965_v11, %v4965_v11 }
0x12b5   :  { %v4968_v14 = vpop.f32.mrf.mxu1 }
0x12b6   :  { %v4995_v15 = vpack.c.bf16 %v4967_v13, %v4967_v13 }
0x12b7   :  { %v4969_v17 = vpop.f32.mrf.mxu1 }
0x12b8   :  { %5853 = vmatprep.mubr.msk.bf16.mxu1 %vm2302_vm8, %v4995_v15 }
0x12b9   :  { %5098 = vmatmul.mubr.bf16.vlgmr.msra.gmra.mxu1 %v4994_v16 }
0x12ba   :  { %6112 = vmatprep.mubr.msk.bf16.mxu1 %vm7247_vm0, %v7246_v0  ;;  %6101 = vmatpush3.bf16.msra.mxu1 %v5254_v19 }
0x12bb   :  { %6102 = vmatprep.subr.bf16.mxu1 %v7246_v0 }
0x12be   :  { %6103 = vmatpush3.bf16.msra.mxu1 %v6843_v20 }
0x12bf   :  { %6104 = vmatprep.subr.bf16.mxu1 %v7246_v0 }
0x12c2   :  { %6105 = vmatpush3.bf16.msra.mxu1 %v6844_v21 }
0x12c3   :  { %6106 = vmatprep.subr.bf16.mxu1 %v7246_v0 }
0x12c6   :  { %6107 = vmatpush3.bf16.msra.mxu1 %v6845_v22 }
0x12c7   :  { %6108 = vmatprep.subr.bf16.mxu1 %v7246_v0 }
0x12ca   :  { %6109 = vmatpush3.bf16.msra.mxu1 %v6846_v34 }
0x12cb   :  { %6110 = vmatprep.subr.bf16.mxu1 %v7246_v0 }
0x12ce   :  { %6111 = vmatpush3.bf16.msra.mxu1 %v6847_v35 }
0x1379   :  { %v5099_v24 = vpop.f32.mrf.mxu1 }
0x137a   :  { %v5100_v27 = vadd.f32 %v5099_v24, %v4993_v23 }
0x137b   :  { %v5101_v28 = vpop.f32.mrf.mxu1 }
0x137c   :  { %vm5105_vm0 = vcmp.ge.f32.partialorder %v5100_v27, 0.0  ;;  %v5106_v29 = vmul.f32 0.01, %v5100_v27 }
0x137d   :  { %v5102_v30 = vpop.f32.mrf.mxu1 }
0x137e   :  { %v5107_v31 = vsel %vm5105_vm0, %v5100_v27, %v5106_v29 }
0x137f   :  { %v5120_v32 = vpack.c.bf16 %v5107_v31, %v5107_v31  ;;  %v5103_v33 = vpop.f32.mrf.mxu1 }
0x1381   :  { %6097 = vmatmul.mubr.msk.bf16.vlgmr.msra.gmra.mxu0 %vm5154_vm2, %v5120_v32 }
0x1441   :  { %v5195_v37 = vpop.f32.mrf.mxu0 }
0x1442   :  { %v5196_v38 = vadd.f32 %v5195_v37, %v5119_v36 }
0x1443   :  { %v6098_v39 = vpop.f32.mrf.mxu0 }
0x1444   :  { %vm5201_vm8 = vcmp.ge.f32.partialorder %v5196_v38, 0.0  ;;  %v5202_v40 = vmul.f32 0.01, %v5196_v38 }
0x1445   :  { %v5198_v41 = vpop.f32.mrf.mxu0 }
0x1446   :  { %v5203_v42 = vsel %vm5201_vm8, %v5196_v38, %v5202_v40 }
0x1447   :  { %v5216_v43 = vpack.c.bf16 %v5203_v42, %v5203_v42  ;;  %v6099_v44 = vpop.f32.mrf.mxu0 }
0x1449   :  { %6113 = vmatmul.mubr.msk.bf16.vlgmr.msra.gmra.mxu1 %vm5154_vm2, %v5216_v43 }
0x1509   :  { %v5290_v46 = vpop.f32.mrf.mxu1 }
0x150a   :  { %v5291_v0 = vadd.f32 %v5290_v46, %v5215_v45 }
0x150b   :  { %v6114_v47 = vpop.f32.mrf.mxu1 }
0x150c   :  { %5297 = vst.msk [vmem:[#allocation26] sm:$0x3] %vm5296_vm1, %v5291_v0 }
0x150d   :  { %v5293_v48 = vpop.f32.mrf.mxu1 }
0x150e   :  { %7167 = shalt.err (!%p7164_p9)
}
0x150f   :  { %5307 = dma.vmem_to_hbm [thread:$0]  %s5305_s2, 32, %s7413_s5, [#allocation4]   ;;  %v6115_v49 = vpop.f32.mrf.mxu1 }
0x1510   :  { %7192 = dma.done.wait [#allocation4], 32  }
0x1511   :  { %7193 = vsyncadd [#allocation4], 4294967264 }
0x1512   :  { %5311 = vsyncpa [#allocation3], 1 }
0x1513   :  { %5312 = vsyncpa [#allocation6], 1 }
0x1514   :  { %5313 = vsyncpa [#allocation9], 1 }
0x1515   :  { %5314 = vsyncpa [#allocation12], 1 }
0x1516   :  { %5315 = vsyncpa [#allocation15], 1 }
0x1517   :  { %5316 = vsyncpa [#allocation18], 1 }
0x1518   :  { %5317 = vsyncpa [#allocation21], 1 }
0x1519   :  { %5318 = vsyncpa [#allocation24], 1 }
0x151a   :  { %5319 = vsyncpa [#allocation4], 1 }

</bundles_post_ra>
